<compile_context>
chip_gen: v7x
topology: tpu7x:2x2x1
jax: 0.10.0
libtpu: 0.0.40
codegen_flags: <defaults>
</compile_context>

<pallas_src>
import jax
import jax.numpy as jnp
from jax import lax
from jax.experimental import pallas as pl
from jax.experimental.pallas import tpu as pltpu

EPS = 1e-5
CP = 128   # lane-dense channel padding (vreg lane width)
LH = 16    # left halo width: interior starts on a bf16 sublane-tile boundary
RH = 16    # right halo width (only its first column is ever addressed, and it is masked)


def _conv3x3_acc(lft, ctr, rgt, w_ref, h, m, acc=None):
    """3x3 'same' conv as 9 accumulated K=128 MXU matmuls (no im2col buffer).

    lft/ctr/rgt: (B, H+2, W, CP) bf16 planes holding input cols x-1 / x / x+1
                 (zero wherever the 3x3 window falls outside the image).
    w_ref:       (9, CP, CP) bf16 per-tap weights, tap index = ky*3 + kx.
    Returns an (m, CP) float32 accumulator (accumulates onto `acc` if given).
    """
    for dy in range(3):
        for dx, plane in enumerate((lft, ctr, rgt)):
            tap = plane[:, dy:dy + h].reshape(m, CP)        # free leading-dim slice
            part = jnp.dot(tap, w_ref[dy * 3 + dx],
                           preferred_element_type=jnp.float32)
            acc = part if acc is None else acc + part
    return acc


def _residual_block_kernel(x_ref, w1_ref, b1_ref, w2_ref, wsc_ref, b2sc_ref,
                           out_ref, pad_ref):
    B, H, W, _ = x_ref.shape
    HP = H + 2
    M = B * H * W

    # --- shrunken halo zeroing (re-done every step: safe with per-core scratch) ---
    # Only the top/bottom pad rows over the interior columns are stored as zeros
    # (aligned (B,1,W,CP) strips). The +/-1-column pad is applied as a VPU mask on
    # the shifted planes below, so no misaligned / single-column stores are needed.
    zrow = jnp.zeros((B, 1, W, CP), jnp.bfloat16)
    pad_ref[:, 0:1, LH:LH + W, :] = zrow
    pad_ref[:, H + 1:H + 2, LH:LH + W, :] = zrow

    col = lax.broadcasted_iota(jnp.int32, (1, 1, W, CP), 2)
    not_left_pad = col > 0          # zeroes the "input col -1" column of the left plane
    not_right_pad = col < W - 1     # zeroes the "input col W"  column of the right plane

    def col_planes():
        # One aligned + two (+/-1-column) shifted loads per conv; the edge columns
        # (which would otherwise need zeroed halo columns) are masked in-register.
        ctr = pad_ref[:, :, LH:LH + W, :]
        lft = jnp.where(not_left_pad, pad_ref[:, :, LH - 1:LH - 1 + W, :], 0)
        rgt = jnp.where(not_right_pad, pad_ref[:, :, LH + 1:LH + 1 + W, :], 0)
        return lft, ctr, rgt

    x_blk = x_ref[...]                                       # (B, H, W, CP) bf16

    # ---- conv1 (3x3, BN1 scale folded into w1) + bias + ReLU --------------------
    pad_ref[:, 1:1 + H, LH:LH + W, :] = x_blk
    h1 = _conv3x3_acc(*col_planes(), w1_ref, H, M)           # (M, CP) f32
    h1 = jnp.maximum(h1 + b1_ref[...], 0.0)

    # ---- conv2 (3x3, BN2 scale folded) + fused 1x1 shortcut + folded bias -------
    pad_ref[:, 1:1 + H, LH:LH + W, :] = (
        h1.reshape(B, H, W, CP).astype(jnp.bfloat16))        # mid kept in bf16
    sc = jnp.dot(x_blk.reshape(M, CP), wsc_ref[...],
                 preferred_element_type=jnp.float32)         # shortcut = 10th matmul
    acc = _conv3x3_acc(*col_planes(), w2_ref, H, M, acc=sc)
    acc = acc + b2sc_ref[...]                                # b2 + bsc folded on host

    out_ref[...] = (jnp.maximum(acc, 0.0)
                    .reshape(B, H, W, CP).astype(out_ref.dtype))


def _pick_block_b(n):
    """Images folded into one grid step (amortize per-step overhead, raise MXU M)."""
    b = 1
    for cand in (2, 4, 8):
        if n % cand == 0:
            b = cand
    return b


def residual_block_forward(x_packed, p, block_b=None):
    """x_packed: (N, H, W, CP) bf16, channels zero-padded to 128 lanes.
    Returns (N, H, W, CP) bf16 (real channels in [..., :Cout]; padded lanes zero)."""
    N, H, W, _ = x_packed.shape
    assert W % 16 == 0, "kernel assumes W is a multiple of the bf16 sublane tile"
    if block_b is None:
        block_b = _pick_block_b(N)
    assert N % block_b == 0
    HP, WPAD = H + 2, LH + W + RH

    def const_spec(shape):
        return pl.BlockSpec(shape, lambda n: (0,) * len(shape))

    return pl.pallas_call(
        _residual_block_kernel,
        grid=(N // block_b,),
        out_shape=jax.ShapeDtypeStruct((N, H, W, CP), jnp.bfloat16),
        in_specs=[
            pl.BlockSpec((block_b, H, W, CP), lambda n: (n, 0, 0, 0)),  # x batch block
            const_spec(p["w1"].shape), const_spec(p["b1"].shape),
            const_spec(p["w2"].shape), const_spec(p["wsc"].shape),
            const_spec(p["b2sc"].shape),
        ],
        out_specs=pl.BlockSpec((block_b, H, W, CP), lambda n: (n, 0, 0, 0)),
        scratch_shapes=[pltpu.VMEM((block_b, HP, WPAD, CP), jnp.bfloat16)],
        compiler_params=pltpu.CompilerParams(
            dimension_semantics=("parallel",)),   # 2 TCs on v7x when grid > 1
    )(x_packed, p["w1"], p["b1"], p["w2"], p["wsc"], p["b2sc"])


# ----------------------------- host-side packing -----------------------------

def _fold(w, conv_b, bn_stats):
    gamma, beta, mean, var = bn_stats
    scale = gamma / jnp.sqrt(var + EPS)
    return w * scale, beta + (conv_b - mean) * scale


def pack_params(raw, cin, cout, cp=CP):
    """Fold eval-mode BN scale into conv weights, fold the shortcut bias into the
    conv2 bias, pad channels to 128 lanes, lay 3x3 weights out per-tap, cast the
    matmul operands to bf16."""
    w1f, b1f = _fold(raw["w1"], raw["cb1"], raw["bn1"])
    w2f, b2f = _fold(raw["w2"], raw["cb2"], raw["bn2"])
    wscf, bscf = _fold(raw["wsc"], raw["cbsc"], raw["bnsc"])

    def pad_w3(w, ci, co):
        wp = jnp.zeros((3, 3, cp, cp), jnp.float32).at[:, :, :ci, :co].set(w)
        return wp.reshape(9, cp, cp).astype(jnp.bfloat16)    # tap-major (ky*3+kx)

    def pad_b(b, co):
        return jnp.zeros((1, cp), jnp.float32).at[0, :co].set(b)

    wscp = jnp.zeros((cp, cp), jnp.float32).at[:cin, :cout].set(wscf)
    return dict(
        w1=pad_w3(w1f, cin, cout), b1=pad_b(b1f, cout),
        w2=pad_w3(w2f, cout, cout),
        wsc=wscp.astype(jnp.bfloat16),
        b2sc=pad_b(b2f + bscf, cout),        # shortcut BN bias folded into conv2 bias
    )


def make_raw_params(key, cin, cout):
    ks = jax.random.split(key, 18)

    def bn_stats(k0, k1, k2, k3):
        return (jax.random.uniform(k0, (cout,), minval=0.5, maxval=1.5),  # gamma
                jax.random.normal(k1, (cout,)) * 0.1,                     # beta
                jax.random.normal(k2, (cout,)) * 0.1,                     # running mean
                jax.random.uniform(k3, (cout,), minval=0.5, maxval=1.5))  # running var

    return dict(
        w1=jax.random.normal(ks[0], (3, 3, cin, cout), jnp.float32) * 0.1,
        cb1=jax.random.normal(ks[1], (cout,), jnp.float32) * 0.1,
        bn1=bn_stats(*ks[2:6]),
        w2=jax.random.normal(ks[6], (3, 3, cout, cout), jnp.float32) * 0.1,
        cb2=jax.random.normal(ks[7], (cout,), jnp.float32) * 0.1,
        bn2=bn_stats(*ks[8:12]),
        wsc=jax.random.normal(ks[12], (cin, cout), jnp.float32) * 0.1,
        cbsc=jax.random.normal(ks[13], (cout,), jnp.float32) * 0.1,
        bnsc=bn_stats(*ks[14:18]),
    )


def ref_forward(x, packed, cin, cout):
    """Pure-JAX reference for the residualblock forward (eval-mode BN folded),
    using the same bf16-rounded operands / bf16 intermediate as the kernel."""
    hp = lax.Precision.HIGHEST

    def conv3(xx, wk, ci):
        w = wk.astype(jnp.float32).reshape(3, 3, CP, CP)[:, :, :ci, :cout]
        return lax.conv_general_dilated(
            xx, w, window_strides=(1, 1), padding=[(1, 1), (1, 1)],
            dimension_numbers=("NHWC", "HWIO", "NHWC"),
            precision=hp, preferred_element_type=jnp.float32)

    h1 = jax.nn.relu(conv3(x, packed["w1"], cin) + packed["b1"][0, :cout])
    h1 = h1.astype(jnp.bfloat16).astype(jnp.float32)   # kernel keeps the mid in bf16
    h2 = conv3(h1, packed["w2"], cout)
    wsc = packed["wsc"].astype(jnp.float32)[:cin, :cout]
    sc = jnp.einsum("nhwc,cd->nhwd", x, wsc, precision=hp)
    return jax.nn.relu(h2 + sc + packed["b2sc"][0, :cout])


if __name__ == "__main__":
    N, CIN, COUT, H, W = 2, 4, 8, 16, 16   # PyTorch NCHW input: [2, 4, 16, 16]

    key = jax.random.PRNGKey(0)
    kx, kp = jax.random.split(key)
    x = jax.random.normal(kx, (N, H, W, CIN), jnp.float32)
    raw = make_raw_params(kp, CIN, COUT)
    packed = pack_params(raw, CIN, COUT)

    # lane-dense bf16 activation layout: channels zero-padded to 128
    x_packed = (jnp.zeros((N, H, W, CP), jnp.bfloat16)
                .at[..., :CIN].set(x.astype(jnp.bfloat16)))

    out_full = jax.block_until_ready(residual_block_forward(x_packed, packed))
    out = out_full[..., :COUT].astype(jnp.float32)

    x_q = x_packed[..., :CIN].astype(jnp.float32)        # same bf16 rounding as kernel
    ref = ref_forward(x_q, packed, CIN, COUT)

    assert out.shape == (N, H, W, COUT)
    assert bool(jnp.all(out_full[..., COUT:] == 0.0))     # padded lanes stay exactly zero
    err = float(jnp.max(jnp.abs(out - ref)))
    assert jnp.allclose(out, ref, rtol=2e-2, atol=2e-2), f"max err {err}"  # bf16 output
    print("KERNEL_OK")
</pallas_src>

<mosaic_0001>
module attributes {stable_mosaic.version = 11 : i64} {
  func.func @_residual_block_kernel(%arg0: i32, %arg1: memref<2x16x16x128xbf16, #tpu.memory_space<vmem>>, %arg2: memref<9x128x128xbf16, #tpu.memory_space<vmem>>, %arg3: memref<1x128xf32, #tpu.memory_space<vmem>>, %arg4: memref<9x128x128xbf16, #tpu.memory_space<vmem>>, %arg5: memref<128x128xbf16, #tpu.memory_space<vmem>>, %arg6: memref<1x128xf32, #tpu.memory_space<vmem>>, %arg7: memref<2x16x16x128xbf16, #tpu.memory_space<vmem>>, %arg8: memref<2x18x48x128xbf16, #tpu.memory_space<vmem>>) attributes {dimension_semantics = [#tpu.dimension_semantics<parallel>], iteration_bounds = array<i64: 1>, scalar_prefetch = 0 : i64, scratch_operands = 1 : i64, tpu.core_type = #tpu.core_type<tc>, window_params = [{transform_indices = @transform_0, window_bounds = array<i64: 2, 16, 16, 128>}, {pipeline_mode = #tpu.pipeline_mode<synchronous>, transform_indices = @transform_1, window_bounds = array<i64: 9, 128, 128>}, {pipeline_mode = #tpu.pipeline_mode<synchronous>, transform_indices = @transform_2, window_bounds = array<i64: 1, 128>}, {pipeline_mode = #tpu.pipeline_mode<synchronous>, transform_indices = @transform_3, window_bounds = array<i64: 9, 128, 128>}, {pipeline_mode = #tpu.pipeline_mode<synchronous>, transform_indices = @transform_4, window_bounds = array<i64: 128, 128>}, {pipeline_mode = #tpu.pipeline_mode<synchronous>, transform_indices = @transform_5, window_bounds = array<i64: 1, 128>}, {transform_indices = @transform_6, window_bounds = array<i64: 2, 16, 16, 128>}]} {
    %cst = arith.constant 0.000000e+00 : bf16
    %0 = vector.broadcast %cst : bf16 to vector<2x1x16x128xbf16>
    %c0 = arith.constant 0 : index
    %c0_0 = arith.constant 0 : index
    %c16 = arith.constant 16 : index
    %c0_1 = arith.constant 0 : index
    %1 = vector.load %arg8[%c0, %c0_0, %c16, %c0_1] : memref<2x18x48x128xbf16, #tpu.memory_space<vmem>>, vector<2x1x16x128xbf16>
    tpu.vector_store %arg8[%c0, %c0_0, %c16, %c0_1], %0 {strides = array<i32>} : memref<2x18x48x128xbf16, #tpu.memory_space<vmem>>, vector<2x1x16x128xbf16>,
    %c0_2 = arith.constant 0 : index
    %c17 = arith.constant 17 : index
    %c16_3 = arith.constant 16 : index
    %c0_4 = arith.constant 0 : index
    %2 = vector.load %arg8[%c0_2, %c17, %c16_3, %c0_4] : memref<2x18x48x128xbf16, #tpu.memory_space<vmem>>, vector<2x1x16x128xbf16>
    tpu.vector_store %arg8[%c0_2, %c17, %c16_3, %c0_4], %0 {strides = array<i32>} : memref<2x18x48x128xbf16, #tpu.memory_space<vmem>>, vector<2x1x16x128xbf16>,
    %3 = tpu.iota {dimensions = array<i32: 2>} : vector<1x1x16x128xi32>
    %c0_i32 = arith.constant 0 : i32
    %4 = vector.broadcast %c0_i32 : i32 to vector<1x1x16x128xi32>
    %5 = arith.cmpi sgt, %3, %4 : vector<1x1x16x128xi32>
    %c15_i32 = arith.constant 15 : i32
    %6 = vector.broadcast %c15_i32 : i32 to vector<1x1x16x128xi32>
    %7 = arith.cmpi slt, %3, %6 : vector<1x1x16x128xi32>
    %c0_5 = arith.constant 0 : index
    %c0_6 = arith.constant 0 : index
    %c0_7 = arith.constant 0 : index
    %c0_8 = arith.constant 0 : index
    %8 = vector.load %arg1[%c0_5, %c0_6, %c0_7, %c0_8] : memref<2x16x16x128xbf16, #tpu.memory_space<vmem>>, vector<2x16x16x128xbf16>
    %c0_9 = arith.constant 0 : index
    %c1 = arith.constant 1 : index
    %c16_10 = arith.constant 16 : index
    %c0_11 = arith.constant 0 : index
    %9 = vector.load %arg8[%c0_9, %c1, %c16_10, %c0_11] : memref<2x18x48x128xbf16, #tpu.memory_space<vmem>>, vector<2x16x16x128xbf16>
    tpu.vector_store %arg8[%c0_9, %c1, %c16_10, %c0_11], %8 {strides = array<i32>} : memref<2x18x48x128xbf16, #tpu.memory_space<vmem>>, vector<2x16x16x128xbf16>,
    %c0_12 = arith.constant 0 : index
    %c0_13 = arith.constant 0 : index
    %c16_14 = arith.constant 16 : index
    %c0_15 = arith.constant 0 : index
    %10 = vector.load %arg8[%c0_12, %c0_13, %c16_14, %c0_15] : memref<2x18x48x128xbf16, #tpu.memory_space<vmem>>, vector<2x18x16x128xbf16>
    %c0_16 = arith.constant 0 : index
    %c0_17 = arith.constant 0 : index
    %c15 = arith.constant 15 : index
    %c0_18 = arith.constant 0 : index
    %11 = vector.load %arg8[%c0_16, %c0_17, %c15, %c0_18] : memref<2x18x48x128xbf16, #tpu.memory_space<vmem>>, vector<2x18x16x128xbf16>
    %c0_i32_19 = arith.constant 0 : i32
    %12 = arith.sitofp %c0_i32_19 : i32 to bf16
    %13 = vector.shape_cast %5 : vector<1x1x16x128xi1> to vector<1x1x16x128xi1>
    %14 = vector.broadcast %13 : vector<1x1x16x128xi1> to vector<2x18x16x128xi1>
    %15 = vector.broadcast %12 : bf16 to vector<2x18x16x128xbf16>
    %16 = arith.select %14, %11, %15 : vector<2x18x16x128xi1>, vector<2x18x16x128xbf16>
    %c0_20 = arith.constant 0 : index
    %c0_21 = arith.constant 0 : index
    %c17_22 = arith.constant 17 : index
    %c0_23 = arith.constant 0 : index
    %17 = vector.load %arg8[%c0_20, %c0_21, %c17_22, %c0_23] : memref<2x18x48x128xbf16, #tpu.memory_space<vmem>>, vector<2x18x16x128xbf16>
    %c0_i32_24 = arith.constant 0 : i32
    %18 = arith.sitofp %c0_i32_24 : i32 to bf16
    %19 = vector.shape_cast %7 : vector<1x1x16x128xi1> to vector<1x1x16x128xi1>
    %20 = vector.broadcast %19 : vector<1x1x16x128xi1> to vector<2x18x16x128xi1>
    %21 = vector.broadcast %18 : bf16 to vector<2x18x16x128xbf16>
    %22 = arith.select %20, %17, %21 : vector<2x18x16x128xi1>, vector<2x18x16x128xbf16>
    %23 = vector.extract_strided_slice %16 {offsets = [0, 0, 0, 0], sizes = [2, 16, 16, 128], strides = [1, 1, 1, 1]} : vector<2x18x16x128xbf16> to vector<2x16x16x128xbf16>
    %24 = vector.shape_cast %23 : vector<2x16x16x128xbf16> to vector<512x128xbf16>
    %c0_25 = arith.constant 0 : index
    %c0_26 = arith.constant 0 : index
    %c0_27 = arith.constant 0 : index
    %25 = vector.load %arg2[%c0_25, %c0_26, %c0_27] : memref<9x128x128xbf16, #tpu.memory_space<vmem>>, vector<1x128x128xbf16>
    %26 = vector.shape_cast %25 : vector<1x128x128xbf16> to vector<128x128xbf16>
    %cst_28 = arith.constant dense<0.000000e+00> : vector<512x128xf32>
    %27 = tpu.matmul %24, %26, %cst_28 {dimension_numbers = #tpu.dot_dimension_numbers<[1], [0], [0], [1], [0, 0, 1, 1], [], []>} : vector<512x128xbf16>, vector<128x128xbf16>, vector<512x128xf32> -> vector<512x128xf32>
    %28 = vector.extract_strided_slice %10 {offsets = [0, 0, 0, 0], sizes = [2, 16, 16, 128], strides = [1, 1, 1, 1]} : vector<2x18x16x128xbf16> to vector<2x16x16x128xbf16>
    %29 = vector.shape_cast %28 : vector<2x16x16x128xbf16> to vector<512x128xbf16>
    %c1_29 = arith.constant 1 : index
    %c0_30 = arith.constant 0 : index
    %c0_31 = arith.constant 0 : index
    %30 = vector.load %arg2[%c1_29, %c0_30, %c0_31] : memref<9x128x128xbf16, #tpu.memory_space<vmem>>, vector<1x128x128xbf16>
    %31 = vector.shape_cast %30 : vector<1x128x128xbf16> to vector<128x128xbf16>
    %cst_32 = arith.constant dense<0.000000e+00> : vector<512x128xf32>
    %32 = tpu.matmul %29, %31, %cst_32 {dimension_numbers = #tpu.dot_dimension_numbers<[1], [0], [0], [1], [0, 0, 1, 1], [], []>} : vector<512x128xbf16>, vector<128x128xbf16>, vector<512x128xf32> -> vector<512x128xf32>
    %33 = arith.addf %27, %32 : vector<512x128xf32>
    %34 = vector.extract_strided_slice %22 {offsets = [0, 0, 0, 0], sizes = [2, 16, 16, 128], strides = [1, 1, 1, 1]} : vector<2x18x16x128xbf16> to vector<2x16x16x128xbf16>
    %35 = vector.shape_cast %34 : vector<2x16x16x128xbf16> to vector<512x128xbf16>
    %c2 = arith.constant 2 : index
    %c0_33 = arith.constant 0 : index
    %c0_34 = arith.constant 0 : index
    %36 = vector.load %arg2[%c2, %c0_33, %c0_34] : memref<9x128x128xbf16, #tpu.memory_space<vmem>>, vector<1x128x128xbf16>
    %37 = vector.shape_cast %36 : vector<1x128x128xbf16> to vector<128x128xbf16>
    %cst_35 = arith.constant dense<0.000000e+00> : vector<512x128xf32>
    %38 = tpu.matmul %35, %37, %cst_35 {dimension_numbers = #tpu.dot_dimension_numbers<[1], [0], [0], [1], [0, 0, 1, 1], [], []>} : vector<512x128xbf16>, vector<128x128xbf16>, vector<512x128xf32> -> vector<512x128xf32>
    %39 = arith.addf %33, %38 : vector<512x128xf32>
    %40 = vector.extract_strided_slice %16 {offsets = [0, 1, 0, 0], sizes = [2, 16, 16, 128], strides = [1, 1, 1, 1]} : vector<2x18x16x128xbf16> to vector<2x16x16x128xbf16>
    %41 = vector.shape_cast %40 : vector<2x16x16x128xbf16> to vector<512x128xbf16>
    %c3 = arith.constant 3 : index
    %c0_36 = arith.constant 0 : index
    %c0_37 = arith.constant 0 : index
    %42 = vector.load %arg2[%c3, %c0_36, %c0_37] : memref<9x128x128xbf16, #tpu.memory_space<vmem>>, vector<1x128x128xbf16>
    %43 = vector.shape_cast %42 : vector<1x128x128xbf16> to vector<128x128xbf16>
    %cst_38 = arith.constant dense<0.000000e+00> : vector<512x128xf32>
    %44 = tpu.matmul %41, %43, %cst_38 {dimension_numbers = #tpu.dot_dimension_numbers<[1], [0], [0], [1], [0, 0, 1, 1], [], []>} : vector<512x128xbf16>, vector<128x128xbf16>, vector<512x128xf32> -> vector<512x128xf32>
    %45 = arith.addf %39, %44 : vector<512x128xf32>
    %46 = vector.extract_strided_slice %10 {offsets = [0, 1, 0, 0], sizes = [2, 16, 16, 128], strides = [1, 1, 1, 1]} : vector<2x18x16x128xbf16> to vector<2x16x16x128xbf16>
    %47 = vector.shape_cast %46 : vector<2x16x16x128xbf16> to vector<512x128xbf16>
    %c4 = arith.constant 4 : index
    %c0_39 = arith.constant 0 : index
    %c0_40 = arith.constant 0 : index
    %48 = vector.load %arg2[%c4, %c0_39, %c0_40] : memref<9x128x128xbf16, #tpu.memory_space<vmem>>, vector<1x128x128xbf16>
    %49 = vector.shape_cast %48 : vector<1x128x128xbf16> to vector<128x128xbf16>
    %cst_41 = arith.constant dense<0.000000e+00> : vector<512x128xf32>
    %50 = tpu.matmul %47, %49, %cst_41 {dimension_numbers = #tpu.dot_dimension_numbers<[1], [0], [0], [1], [0, 0, 1, 1], [], []>} : vector<512x128xbf16>, vector<128x128xbf16>, vector<512x128xf32> -> vector<512x128xf32>
    %51 = arith.addf %45, %50 : vector<512x128xf32>
    %52 = vector.extract_strided_slice %22 {offsets = [0, 1, 0, 0], sizes = [2, 16, 16, 128], strides = [1, 1, 1, 1]} : vector<2x18x16x128xbf16> to vector<2x16x16x128xbf16>
    %53 = vector.shape_cast %52 : vector<2x16x16x128xbf16> to vector<512x128xbf16>
    %c5 = arith.constant 5 : index
    %c0_42 = arith.constant 0 : index
    %c0_43 = arith.constant 0 : index
    %54 = vector.load %arg2[%c5, %c0_42, %c0_43] : memref<9x128x128xbf16, #tpu.memory_space<vmem>>, vector<1x128x128xbf16>
    %55 = vector.shape_cast %54 : vector<1x128x128xbf16> to vector<128x128xbf16>
    %cst_44 = arith.constant dense<0.000000e+00> : vector<512x128xf32>
    %56 = tpu.matmul %53, %55, %cst_44 {dimension_numbers = #tpu.dot_dimension_numbers<[1], [0], [0], [1], [0, 0, 1, 1], [], []>} : vector<512x128xbf16>, vector<128x128xbf16>, vector<512x128xf32> -> vector<512x128xf32>
    %57 = arith.addf %51, %56 : vector<512x128xf32>
    %58 = vector.extract_strided_slice %16 {offsets = [0, 2, 0, 0], sizes = [2, 16, 16, 128], strides = [1, 1, 1, 1]} : vector<2x18x16x128xbf16> to vector<2x16x16x128xbf16>
    %59 = vector.shape_cast %58 : vector<2x16x16x128xbf16> to vector<512x128xbf16>
    %c6 = arith.constant 6 : index
    %c0_45 = arith.constant 0 : index
    %c0_46 = arith.constant 0 : index
    %60 = vector.load %arg2[%c6, %c0_45, %c0_46] : memref<9x128x128xbf16, #tpu.memory_space<vmem>>, vector<1x128x128xbf16>
    %61 = vector.shape_cast %60 : vector<1x128x128xbf16> to vector<128x128xbf16>
    %cst_47 = arith.constant dense<0.000000e+00> : vector<512x128xf32>
    %62 = tpu.matmul %59, %61, %cst_47 {dimension_numbers = #tpu.dot_dimension_numbers<[1], [0], [0], [1], [0, 0, 1, 1], [], []>} : vector<512x128xbf16>, vector<128x128xbf16>, vector<512x128xf32> -> vector<512x128xf32>
    %63 = arith.addf %57, %62 : vector<512x128xf32>
    %64 = vector.extract_strided_slice %10 {offsets = [0, 2, 0, 0], sizes = [2, 16, 16, 128], strides = [1, 1, 1, 1]} : vector<2x18x16x128xbf16> to vector<2x16x16x128xbf16>
    %65 = vector.shape_cast %64 : vector<2x16x16x128xbf16> to vector<512x128xbf16>
    %c7 = arith.constant 7 : index
    %c0_48 = arith.constant 0 : index
    %c0_49 = arith.constant 0 : index
    %66 = vector.load %arg2[%c7, %c0_48, %c0_49] : memref<9x128x128xbf16, #tpu.memory_space<vmem>>, vector<1x128x128xbf16>
    %67 = vector.shape_cast %66 : vector<1x128x128xbf16> to vector<128x128xbf16>
    %cst_50 = arith.constant dense<0.000000e+00> : vector<512x128xf32>
    %68 = tpu.matmul %65, %67, %cst_50 {dimension_numbers = #tpu.dot_dimension_numbers<[1], [0], [0], [1], [0, 0, 1, 1], [], []>} : vector<512x128xbf16>, vector<128x128xbf16>, vector<512x128xf32> -> vector<512x128xf32>
    %69 = arith.addf %63, %68 : vector<512x128xf32>
    %70 = vector.extract_strided_slice %22 {offsets = [0, 2, 0, 0], sizes = [2, 16, 16, 128], strides = [1, 1, 1, 1]} : vector<2x18x16x128xbf16> to vector<2x16x16x128xbf16>
    %71 = vector.shape_cast %70 : vector<2x16x16x128xbf16> to vector<512x128xbf16>
    %c8 = arith.constant 8 : index
    %c0_51 = arith.constant 0 : index
    %c0_52 = arith.constant 0 : index
    %72 = vector.load %arg2[%c8, %c0_51, %c0_52] : memref<9x128x128xbf16, #tpu.memory_space<vmem>>, vector<1x128x128xbf16>
    %73 = vector.shape_cast %72 : vector<1x128x128xbf16> to vector<128x128xbf16>
    %cst_53 = arith.constant dense<0.000000e+00> : vector<512x128xf32>
    %74 = tpu.matmul %71, %73, %cst_53 {dimension_numbers = #tpu.dot_dimension_numbers<[1], [0], [0], [1], [0, 0, 1, 1], [], []>} : vector<512x128xbf16>, vector<128x128xbf16>, vector<512x128xf32> -> vector<512x128xf32>
    %75 = arith.addf %69, %74 : vector<512x128xf32>
    %c0_54 = arith.constant 0 : index
    %c0_55 = arith.constant 0 : index
    %76 = vector.load %arg3[%c0_54, %c0_55] : memref<1x128xf32, #tpu.memory_space<vmem>>, vector<1x128xf32>
    %77 = vector.broadcast %76 : vector<1x128xf32> to vector<512x128xf32>
    %78 = arith.addf %75, %77 : vector<512x128xf32>
    %cst_56 = arith.constant 0.000000e+00 : f32
    %79 = vector.broadcast %cst_56 : f32 to vector<512x128xf32>
    %80 = arith.maximumf %78, %79 : vector<512x128xf32>
    %81 = vector.shape_cast %80 : vector<512x128xf32> to vector<2x16x16x128xf32>
    %82 = arith.truncf %81 : vector<2x16x16x128xf32> to vector<2x16x16x128xbf16>
    %c0_57 = arith.constant 0 : index
    %c1_58 = arith.constant 1 : index
    %c16_59 = arith.constant 16 : index
    %c0_60 = arith.constant 0 : index
    %83 = vector.load %arg8[%c0_57, %c1_58, %c16_59, %c0_60] : memref<2x18x48x128xbf16, #tpu.memory_space<vmem>>, vector<2x16x16x128xbf16>
    tpu.vector_store %arg8[%c0_57, %c1_58, %c16_59, %c0_60], %82 {strides = array<i32>} : memref<2x18x48x128xbf16, #tpu.memory_space<vmem>>, vector<2x16x16x128xbf16>,
    %84 = vector.shape_cast %8 : vector<2x16x16x128xbf16> to vector<512x128xbf16>
    %c0_61 = arith.constant 0 : index
    %c0_62 = arith.constant 0 : index
    %85 = vector.load %arg5[%c0_61, %c0_62] : memref<128x128xbf16, #tpu.memory_space<vmem>>, vector<128x128xbf16>
    %cst_63 = arith.constant dense<0.000000e+00> : vector<512x128xf32>
    %86 = tpu.matmul %84, %85, %cst_63 {dimension_numbers = #tpu.dot_dimension_numbers<[1], [0], [0], [1], [0, 0, 1, 1], [], []>} : vector<512x128xbf16>, vector<128x128xbf16>, vector<512x128xf32> -> vector<512x128xf32>
    %c0_64 = arith.constant 0 : index
    %c0_65 = arith.constant 0 : index
    %c16_66 = arith.constant 16 : index
    %c0_67 = arith.constant 0 : index
    %87 = vector.load %arg8[%c0_64, %c0_65, %c16_66, %c0_67] : memref<2x18x48x128xbf16, #tpu.memory_space<vmem>>, vector<2x18x16x128xbf16>
    %c0_68 = arith.constant 0 : index
    %c0_69 = arith.constant 0 : index
    %c15_70 = arith.constant 15 : index
    %c0_71 = arith.constant 0 : index
    %88 = vector.load %arg8[%c0_68, %c0_69, %c15_70, %c0_71] : memref<2x18x48x128xbf16, #tpu.memory_space<vmem>>, vector<2x18x16x128xbf16>
    %c0_i32_72 = arith.constant 0 : i32
    %89 = arith.sitofp %c0_i32_72 : i32 to bf16
    %90 = vector.shape_cast %5 : vector<1x1x16x128xi1> to vector<1x1x16x128xi1>
    %91 = vector.broadcast %90 : vector<1x1x16x128xi1> to vector<2x18x16x128xi1>
    %92 = vector.broadcast %89 : bf16 to vector<2x18x16x128xbf16>
    %93 = arith.select %91, %88, %92 : vector<2x18x16x128xi1>, vector<2x18x16x128xbf16>
    %c0_73 = arith.constant 0 : index
    %c0_74 = arith.constant 0 : index
    %c17_75 = arith.constant 17 : index
    %c0_76 = arith.constant 0 : index
    %94 = vector.load %arg8[%c0_73, %c0_74, %c17_75, %c0_76] : memref<2x18x48x128xbf16, #tpu.memory_space<vmem>>, vector<2x18x16x128xbf16>
    %c0_i32_77 = arith.constant 0 : i32
    %95 = arith.sitofp %c0_i32_77 : i32 to bf16
    %96 = vector.shape_cast %7 : vector<1x1x16x128xi1> to vector<1x1x16x128xi1>
    %97 = vector.broadcast %96 : vector<1x1x16x128xi1> to vector<2x18x16x128xi1>
    %98 = vector.broadcast %95 : bf16 to vector<2x18x16x128xbf16>
    %99 = arith.select %97, %94, %98 : vector<2x18x16x128xi1>, vector<2x18x16x128xbf16>
    %100 = vector.extract_strided_slice %93 {offsets = [0, 0, 0, 0], sizes = [2, 16, 16, 128], strides = [1, 1, 1, 1]} : vector<2x18x16x128xbf16> to vector<2x16x16x128xbf16>
    %101 = vector.shape_cast %100 : vector<2x16x16x128xbf16> to vector<512x128xbf16>
    %c0_78 = arith.constant 0 : index
    %c0_79 = arith.constant 0 : index
    %c0_80 = arith.constant 0 : index
    %102 = vector.load %arg4[%c0_78, %c0_79, %c0_80] : memref<9x128x128xbf16, #tpu.memory_space<vmem>>, vector<1x128x128xbf16>
    %103 = vector.shape_cast %102 : vector<1x128x128xbf16> to vector<128x128xbf16>
    %cst_81 = arith.constant dense<0.000000e+00> : vector<512x128xf32>
    %104 = tpu.matmul %101, %103, %cst_81 {dimension_numbers = #tpu.dot_dimension_numbers<[1], [0], [0], [1], [0, 0, 1, 1], [], []>} : vector<512x128xbf16>, vector<128x128xbf16>, vector<512x128xf32> -> vector<512x128xf32>
    %105 = arith.addf %86, %104 : vector<512x128xf32>
    %106 = vector.extract_strided_slice %87 {offsets = [0, 0, 0, 0], sizes = [2, 16, 16, 128], strides = [1, 1, 1, 1]} : vector<2x18x16x128xbf16> to vector<2x16x16x128xbf16>
    %107 = vector.shape_cast %106 : vector<2x16x16x128xbf16> to vector<512x128xbf16>
    %c1_82 = arith.constant 1 : index
    %c0_83 = arith.constant 0 : index
    %c0_84 = arith.constant 0 : index
    %108 = vector.load %arg4[%c1_82, %c0_83, %c0_84] : memref<9x128x128xbf16, #tpu.memory_space<vmem>>, vector<1x128x128xbf16>
    %109 = vector.shape_cast %108 : vector<1x128x128xbf16> to vector<128x128xbf16>
    %cst_85 = arith.constant dense<0.000000e+00> : vector<512x128xf32>
    %110 = tpu.matmul %107, %109, %cst_85 {dimension_numbers = #tpu.dot_dimension_numbers<[1], [0], [0], [1], [0, 0, 1, 1], [], []>} : vector<512x128xbf16>, vector<128x128xbf16>, vector<512x128xf32> -> vector<512x128xf32>
    %111 = arith.addf %105, %110 : vector<512x128xf32>
    %112 = vector.extract_strided_slice %99 {offsets = [0, 0, 0, 0], sizes = [2, 16, 16, 128], strides = [1, 1, 1, 1]} : vector<2x18x16x128xbf16> to vector<2x16x16x128xbf16>
    %113 = vector.shape_cast %112 : vector<2x16x16x128xbf16> to vector<512x128xbf16>
    %c2_86 = arith.constant 2 : index
    %c0_87 = arith.constant 0 : index
    %c0_88 = arith.constant 0 : index
    %114 = vector.load %arg4[%c2_86, %c0_87, %c0_88] : memref<9x128x128xbf16, #tpu.memory_space<vmem>>, vector<1x128x128xbf16>
    %115 = vector.shape_cast %114 : vector<1x128x128xbf16> to vector<128x128xbf16>
    %cst_89 = arith.constant dense<0.000000e+00> : vector<512x128xf32>
    %116 = tpu.matmul %113, %115, %cst_89 {dimension_numbers = #tpu.dot_dimension_numbers<[1], [0], [0], [1], [0, 0, 1, 1], [], []>} : vector<512x128xbf16>, vector<128x128xbf16>, vector<512x128xf32> -> vector<512x128xf32>
    %117 = arith.addf %111, %116 : vector<512x128xf32>
    %118 = vector.extract_strided_slice %93 {offsets = [0, 1, 0, 0], sizes = [2, 16, 16, 128], strides = [1, 1, 1, 1]} : vector<2x18x16x128xbf16> to vector<2x16x16x128xbf16>
    %119 = vector.shape_cast %118 : vector<2x16x16x128xbf16> to vector<512x128xbf16>
    %c3_90 = arith.constant 3 : index
    %c0_91 = arith.constant 0 : index
    %c0_92 = arith.constant 0 : index
    %120 = vector.load %arg4[%c3_90, %c0_91, %c0_92] : memref<9x128x128xbf16, #tpu.memory_space<vmem>>, vector<1x128x128xbf16>
    %121 = vector.shape_cast %120 : vector<1x128x128xbf16> to vector<128x128xbf16>
    %cst_93 = arith.constant dense<0.000000e+00> : vector<512x128xf32>
    %122 = tpu.matmul %119, %121, %cst_93 {dimension_numbers = #tpu.dot_dimension_numbers<[1], [0], [0], [1], [0, 0, 1, 1], [], []>} : vector<512x128xbf16>, vector<128x128xbf16>, vector<512x128xf32> -> vector<512x128xf32>
    %123 = arith.addf %117, %122 : vector<512x128xf32>
    %124 = vector.extract_strided_slice %87 {offsets = [0, 1, 0, 0], sizes = [2, 16, 16, 128], strides = [1, 1, 1, 1]} : vector<2x18x16x128xbf16> to vector<2x16x16x128xbf16>
    %125 = vector.shape_cast %124 : vector<2x16x16x128xbf16> to vector<512x128xbf16>
    %c4_94 = arith.constant 4 : index
    %c0_95 = arith.constant 0 : index
    %c0_96 = arith.constant 0 : index
    %126 = vector.load %arg4[%c4_94, %c0_95, %c0_96] : memref<9x128x128xbf16, #tpu.memory_space<vmem>>, vector<1x128x128xbf16>
    %127 = vector.shape_cast %126 : vector<1x128x128xbf16> to vector<128x128xbf16>
    %cst_97 = arith.constant dense<0.000000e+00> : vector<512x128xf32>
    %128 = tpu.matmul %125, %127, %cst_97 {dimension_numbers = #tpu.dot_dimension_numbers<[1], [0], [0], [1], [0, 0, 1, 1], [], []>} : vector<512x128xbf16>, vector<128x128xbf16>, vector<512x128xf32> -> vector<512x128xf32>
    %129 = arith.addf %123, %128 : vector<512x128xf32>
    %130 = vector.extract_strided_slice %99 {offsets = [0, 1, 0, 0], sizes = [2, 16, 16, 128], strides = [1, 1, 1, 1]} : vector<2x18x16x128xbf16> to vector<2x16x16x128xbf16>
    %131 = vector.shape_cast %130 : vector<2x16x16x128xbf16> to vector<512x128xbf16>
    %c5_98 = arith.constant 5 : index
    %c0_99 = arith.constant 0 : index
    %c0_100 = arith.constant 0 : index
    %132 = vector.load %arg4[%c5_98, %c0_99, %c0_100] : memref<9x128x128xbf16, #tpu.memory_space<vmem>>, vector<1x128x128xbf16>
    %133 = vector.shape_cast %132 : vector<1x128x128xbf16> to vector<128x128xbf16>
    %cst_101 = arith.constant dense<0.000000e+00> : vector<512x128xf32>
    %134 = tpu.matmul %131, %133, %cst_101 {dimension_numbers = #tpu.dot_dimension_numbers<[1], [0], [0], [1], [0, 0, 1, 1], [], []>} : vector<512x128xbf16>, vector<128x128xbf16>, vector<512x128xf32> -> vector<512x128xf32>
    %135 = arith.addf %129, %134 : vector<512x128xf32>
    %136 = vector.extract_strided_slice %93 {offsets = [0, 2, 0, 0], sizes = [2, 16, 16, 128], strides = [1, 1, 1, 1]} : vector<2x18x16x128xbf16> to vector<2x16x16x128xbf16>
    %137 = vector.shape_cast %136 : vector<2x16x16x128xbf16> to vector<512x128xbf16>
    %c6_102 = arith.constant 6 : index
    %c0_103 = arith.constant 0 : index
    %c0_104 = arith.constant 0 : index
    %138 = vector.load %arg4[%c6_102, %c0_103, %c0_104] : memref<9x128x128xbf16, #tpu.memory_space<vmem>>, vector<1x128x128xbf16>
    %139 = vector.shape_cast %138 : vector<1x128x128xbf16> to vector<128x128xbf16>
    %cst_105 = arith.constant dense<0.000000e+00> : vector<512x128xf32>
    %140 = tpu.matmul %137, %139, %cst_105 {dimension_numbers = #tpu.dot_dimension_numbers<[1], [0], [0], [1], [0, 0, 1, 1], [], []>} : vector<512x128xbf16>, vector<128x128xbf16>, vector<512x128xf32> -> vector<512x128xf32>
    %141 = arith.addf %135, %140 : vector<512x128xf32>
    %142 = vector.extract_strided_slice %87 {offsets = [0, 2, 0, 0], sizes = [2, 16, 16, 128], strides = [1, 1, 1, 1]} : vector<2x18x16x128xbf16> to vector<2x16x16x128xbf16>
    %143 = vector.shape_cast %142 : vector<2x16x16x128xbf16> to vector<512x128xbf16>
    %c7_106 = arith.constant 7 : index
    %c0_107 = arith.constant 0 : index
    %c0_108 = arith.constant 0 : index
    %144 = vector.load %arg4[%c7_106, %c0_107, %c0_108] : memref<9x128x128xbf16, #tpu.memory_space<vmem>>, vector<1x128x128xbf16>
    %145 = vector.shape_cast %144 : vector<1x128x128xbf16> to vector<128x128xbf16>
    %cst_109 = arith.constant dense<0.000000e+00> : vector<512x128xf32>
    %146 = tpu.matmul %143, %145, %cst_109 {dimension_numbers = #tpu.dot_dimension_numbers<[1], [0], [0], [1], [0, 0, 1, 1], [], []>} : vector<512x128xbf16>, vector<128x128xbf16>, vector<512x128xf32> -> vector<512x128xf32>
    %147 = arith.addf %141, %146 : vector<512x128xf32>
    %148 = vector.extract_strided_slice %99 {offsets = [0, 2, 0, 0], sizes = [2, 16, 16, 128], strides = [1, 1, 1, 1]} : vector<2x18x16x128xbf16> to vector<2x16x16x128xbf16>
    %149 = vector.shape_cast %148 : vector<2x16x16x128xbf16> to vector<512x128xbf16>
    %c8_110 = arith.constant 8 : index
    %c0_111 = arith.constant 0 : index
    %c0_112 = arith.constant 0 : index
    %150 = vector.load %arg4[%c8_110, %c0_111, %c0_112] : memref<9x128x128xbf16, #tpu.memory_space<vmem>>, vector<1x128x128xbf16>
    %151 = vector.shape_cast %150 : vector<1x128x128xbf16> to vector<128x128xbf16>
    %cst_113 = arith.constant dense<0.000000e+00> : vector<512x128xf32>
    %152 = tpu.matmul %149, %151, %cst_113 {dimension_numbers = #tpu.dot_dimension_numbers<[1], [0], [0], [1], [0, 0, 1, 1], [], []>} : vector<512x128xbf16>, vector<128x128xbf16>, vector<512x128xf32> -> vector<512x128xf32>
    %153 = arith.addf %147, %152 : vector<512x128xf32>
    %c0_114 = arith.constant 0 : index
    %c0_115 = arith.constant 0 : index
    %154 = vector.load %arg6[%c0_114, %c0_115] : memref<1x128xf32, #tpu.memory_space<vmem>>, vector<1x128xf32>
    %155 = vector.broadcast %154 : vector<1x128xf32> to vector<512x128xf32>
    %156 = arith.addf %153, %155 : vector<512x128xf32>
    %cst_116 = arith.constant 0.000000e+00 : f32
    %157 = vector.broadcast %cst_116 : f32 to vector<512x128xf32>
    %158 = arith.maximumf %156, %157 : vector<512x128xf32>
    %159 = vector.shape_cast %158 : vector<512x128xf32> to vector<2x16x16x128xf32>
    %160 = arith.truncf %159 : vector<2x16x16x128xf32> to vector<2x16x16x128xbf16>
    %c0_117 = arith.constant 0 : index
    %c0_118 = arith.constant 0 : index
    %c0_119 = arith.constant 0 : index
    %c0_120 = arith.constant 0 : index
    %161 = vector.load %arg7[%c0_117, %c0_118, %c0_119, %c0_120] : memref<2x16x16x128xbf16, #tpu.memory_space<vmem>>, vector<2x16x16x128xbf16>
    tpu.vector_store %arg7[%c0_117, %c0_118, %c0_119, %c0_120], %160 {strides = array<i32>} : memref<2x16x16x128xbf16, #tpu.memory_space<vmem>>, vector<2x16x16x128xbf16>,
    return
  }
  func.func @transform_0(%arg0: i32) -> (i32, i32, i32, i32) {
    %c0_i32 = arith.constant 0 : i32
    %c0_i32_0 = arith.constant 0 : i32
    %c0_i32_1 = arith.constant 0 : i32
    %c0_i32_2 = arith.constant 0 : i32
    return %arg0, %c0_i32, %c0_i32_0, %c0_i32_1 : i32, i32, i32, i32
  }
  func.func @transform_1(%arg0: i32) -> (i32, i32, i32) {
    %c0_i32 = arith.constant 0 : i32
    %c0_i32_0 = arith.constant 0 : i32
    %c0_i32_1 = arith.constant 0 : i32
    %c0_i32_2 = arith.constant 0 : i32
    return %c0_i32, %c0_i32_0, %c0_i32_1 : i32, i32, i32
  }
  func.func @transform_2(%arg0: i32) -> (i32, i32) {
    %c0_i32 = arith.constant 0 : i32
    %c0_i32_0 = arith.constant 0 : i32
    %c0_i32_1 = arith.constant 0 : i32
    return %c0_i32, %c0_i32_0 : i32, i32
  }
  func.func @transform_3(%arg0: i32) -> (i32, i32, i32) {
    %c0_i32 = arith.constant 0 : i32
    %c0_i32_0 = arith.constant 0 : i32
    %c0_i32_1 = arith.constant 0 : i32
    %c0_i32_2 = arith.constant 0 : i32
    return %c0_i32, %c0_i32_0, %c0_i32_1 : i32, i32, i32
  }
  func.func @transform_4(%arg0: i32) -> (i32, i32) {
    %c0_i32 = arith.constant 0 : i32
    %c0_i32_0 = arith.constant 0 : i32
    %c0_i32_1 = arith.constant 0 : i32
    return %c0_i32, %c0_i32_0 : i32, i32
  }
  func.func @transform_5(%arg0: i32) -> (i32, i32) {
    %c0_i32 = arith.constant 0 : i32
    %c0_i32_0 = arith.constant 0 : i32
    %c0_i32_1 = arith.constant 0 : i32
    return %c0_i32, %c0_i32_0 : i32, i32
  }
  func.func @transform_6(%arg0: i32) -> (i32, i32, i32, i32) {
    %c0_i32 = arith.constant 0 : i32
    %c0_i32_0 = arith.constant 0 : i32
    %c0_i32_1 = arith.constant 0 : i32
    %c0_i32_2 = arith.constant 0 : i32
    return %arg0, %c0_i32, %c0_i32_0, %c0_i32_1 : i32, i32, i32, i32
  }
}

</mosaic_0001>

<bundles_post_ra>
// kernel: tpu_custom_call.1
= control target key start
LH: loop header
LB: loop body
LE: loop exit
PB: predicated region body
PF: predicated region fallthrough
CT: control target
= control target key end

     0   :  { %11 = vsyncpa [#allocation4], 0  ;;  %s17804_s0 = inlined_call_operand.hbm [shape: bf16[2,16,16,128], index: 0, kind: input, shape index: {}]   ;;  %s17805_s1 = inlined_call_operand.hbm [shape: bf16[9,128,128], index: 1, kind: input, shape index: {}]   ;;  %s17806_s2 = inlined_call_operand.vmem [shape: f32[1,128], index: 2, kind: input, shape index: {}]   ;;  %s17807_s3 = inlined_call_operand.hbm [shape: bf16[9,128,128], index: 3, kind: input, shape index: {}]   ;;  %s17808_s4 = inlined_call_operand.hbm [shape: bf16[128,128], index: 4, kind: input, shape index: {}]   ;;  %s17809_s5 = inlined_call_operand.vmem [shape: f32[1,128], index: 5, kind: input, shape index: {}]   ;;  %s17810_s6 = inlined_call_operand.hbm [shape: bf16[2,16,16,128], index: 6, kind: output, shape index: {}]  }
   0x1   :  { %12 = vsyncpa [#allocation7], 0 }
   0x2   :  { %13 = vsyncpa [#allocation10], 0 }
   0x3   :  { %14 = vsyncpa [#allocation5], 0  ;;  %s15525_s21 = smov [#allocation6]   ;;  %s15526_s23 = smov [#allocation3]  }
   0x4   :  { %s32_s22 = sshll.u32 %s15525_s21, 4  ;;  %s20_s24 = sshll.u32 %s15526_s23, 4  ;;  %s33_s22 = int_to_ptr.vmem [resolvable:$true] %s32_s22  ;;  %s15569_s24 = int_to_ptr.vmem [resolvable:$true] %s20_s24 }
   0x5   :  { %s15407_s27 = scalar_lea.hbm %s17805_s1, 9216 }
   0x6   :  { %p15408_p0 = scmp.ne.s32.totalorder %s17805_s1, %s15407_s27  ;;  %p15411_p1 = scmp.lt.u32.totalorder %s15407_s27, %s17805_s1 }
   0x8   :  { %p15413_p2 = pnand %p15411_p1, %p15408_p0 }
   0xa   :  { %15416 = shalt.err (!%p15413_p2)
}
   0xb   :  { %s15417_s8 = scalar_lea.vmem %s33_s22, 9216  ;;  %p15422_p4 = scmp.lt.s32.totalorder %s33_s22, %s33_s22 }
   0xc   :  { %p15418_p3 = scmp.ne.s32.totalorder %s33_s22, %s15417_s8  ;;  %p15423_p5 = scmp.lt.s32.totalorder %s15417_s8, %s15417_s8 }
   0xe   :  { %p15424_p6 = por %p15423_p5, %p15422_p4 }
  0x10   :  { %p15425_p7 = pnand %p15424_p6, %p15418_p3 }
  0x12   :  { %15428 = shalt.err (!%p15425_p7)
}
  0x13   :  { %s15527_s9 = smov 64   ;;  %s15528_s10 = smov 4  }
  0x14   :  { %38 = dma.hbm_to_vmem [thread:$0]  %s17805_s1, 9216, %s33_s22, [#allocation7], %s15527_s9, %s15527_s9, %s15528_s10  }
  0x15   :  { %s15429_s15 = scalar_lea.hbm %s17804_s0, 4096 }
  0x16   :  { %p15430_p8 = scmp.ne.s32.totalorder %s17804_s0, %s15429_s15  ;;  %p15433_p9 = scmp.lt.u32.totalorder %s15429_s15, %s17804_s0 }
  0x18   :  { %p15435_p10 = pnand %p15433_p9, %p15430_p8 }
  0x1a   :  { %15438 = shalt.err (!%p15435_p10)
}
  0x1b   :  { %s15439_s20 = scalar_lea.vmem %s15569_s24, 4096  ;;  %p15444_p12 = scmp.lt.s32.totalorder %s15569_s24, %s15569_s24 }
  0x1c   :  { %p15440_p11 = scmp.ne.s32.totalorder %s15569_s24, %s15439_s20  ;;  %p15445_p13 = scmp.lt.s32.totalorder %s15439_s20, %s15439_s20 }
  0x1e   :  { %p15446_p0 = por %p15445_p13, %p15444_p12 }
  0x20   :  { %p15447_p1 = pnand %p15446_p0, %p15440_p11 }
  0x22   :  { %15450 = shalt.err (!%p15447_p1)
}
  0x23   :  { %26 = dma.hbm_to_vmem [thread:$0]  %s17804_s0, 4096, %s15569_s24, [#allocation4], %s15527_s9, %s15527_s9, %s15528_s10  }
  0x24   :  { %s15529_s22 = smov [#allocation8]   ;;  %s15530_s25 = smov [#allocation9]  }
  0x25   :  { %s46_s23 = sshll.u32 %s15529_s22, 4  ;;  %s58_s26 = sshll.u32 %s15530_s25, 4  ;;  %s47_s23 = int_to_ptr.vmem [resolvable:$true] %s46_s23  ;;  %s15606_s26 = int_to_ptr.vmem [resolvable:$true] %s58_s26 }
  0x26   :  { %s15451_s29 = scalar_lea.hbm %s17807_s3, 9216 }
  0x27   :  { %p15452_p2 = scmp.ne.s32.totalorder %s17807_s3, %s15451_s29  ;;  %p15455_p3 = scmp.lt.u32.totalorder %s15451_s29, %s17807_s3 }
  0x29   :  { %p15457_p4 = pnand %p15455_p3, %p15452_p2 }
  0x2b   :  { %15460 = shalt.err (!%p15457_p4)
}
  0x2c   :  { %s15461_s0 = scalar_lea.vmem %s47_s23, 9216  ;;  %p15466_p6 = scmp.lt.s32.totalorder %s47_s23, %s47_s23 }
  0x2d   :  { %p15462_p5 = scmp.ne.s32.totalorder %s47_s23, %s15461_s0  ;;  %p15467_p7 = scmp.lt.s32.totalorder %s15461_s0, %s15461_s0 }
  0x2f   :  { %p15468_p8 = por %p15467_p7, %p15466_p6 }
  0x31   :  { %p15469_p9 = pnand %p15468_p8, %p15462_p5 }
  0x33   :  { %15472 = shalt.err (!%p15469_p9)
}
  0x34   :  { %52 = dma.hbm_to_vmem [thread:$0]  %s17807_s3, 9216, %s47_s23, [#allocation7], %s15527_s9, %s15527_s9, %s15528_s10  }
  0x35   :  { %s15473_s15 = scalar_lea.hbm %s17808_s4, 1024 }
  0x36   :  { %p15474_p10 = scmp.ne.s32.totalorder %s17808_s4, %s15473_s15  ;;  %p15477_p11 = scmp.lt.u32.totalorder %s15473_s15, %s17808_s4 }
  0x38   :  { %p15479_p12 = pnand %p15477_p11, %p15474_p10 }
  0x3a   :  { %15482 = shalt.err (!%p15479_p12)
}
  0x3b   :  { %s15483_s20 = scalar_lea.vmem %s15606_s26, 1024  ;;  %p15488_p0 = scmp.lt.s32.totalorder %s15606_s26, %s15606_s26 }
  0x3c   :  { %p15484_p13 = scmp.ne.s32.totalorder %s15606_s26, %s15483_s20  ;;  %p15489_p1 = scmp.lt.s32.totalorder %s15483_s20, %s15483_s20 }
  0x3e   :  { %p15490_p2 = por %p15489_p1, %p15488_p0 }
  0x40   :  { %p15491_p3 = pnand %p15490_p2, %p15484_p13 }
  0x42   :  { %15494 = shalt.err (!%p15491_p3)
}
  0x43   :  { %64 = dma.hbm_to_vmem [thread:$0]  %s17808_s4, 1024, %s15606_s26, [#allocation10], %s15527_s9, %s15527_s9, %s15528_s10  }
  0x44   :  { %15517 = dma.done.wait [#allocation4], 4096  }
  0x45   :  { %15518 = vsyncadd [#allocation4], 4294963200 }
  0x46   :  { %15519 = dma.done.wait [#allocation7], 18432  }
  0x47   :  { %15520 = vsyncadd [#allocation7], 4294948864 }
  0x48   :  { %15521 = dma.done.wait [#allocation10], 1024  }
  0x49   :  { %15522 = vsyncadd [#allocation10], 4294966272  ;;  %v15531_v0 = vmov 0   ;;  %v87_v1 = vlaneseq  ;;  %v15129_v3 = vld [vmem:[#allocation6 + $0x40] sm:$0xff]   ;;  %v15130_v4 = vld [vmem:[#allocation6 + $0x48] sm:$0xff]   ;;  %vm15532_vm1 = vmmov 1  }
  0x4a   :  { %82 = vst [vmem:[#allocation2 + $0x8] sm:$0xff] %v15531_v0  ;;  %12512 = vmatprep.mubr.bf16.mxu0 %v15531_v0  ;;  %12496 = vmatprep.subr.bf16.mxu0 %v15129_v3  ;;  %v15131_v6 = vld [vmem:[#allocation6 + $0x50] sm:$0xff]   ;;  %vm460_vm2 = vmpackc.low %vm15532_vm1, %vm15532_vm1  ;;  %v15132_v7 = vld [vmem:[#allocation6 + $0x58] sm:$0xff]   ;;  %vm711_vm8 = vsmask.f32 256 }
  0x4b   :  { %v15645_v2 = vshrl.u32 %v87_v1, 7  ;;  %12497 = vmatpush3.bf16.msra.mxu0 %v15129_v3  ;;  %v15649_v8 = vsel %vm460_vm2, 65537, %v15531_v0  ;;  %v15652_v10 = vld [vmem:[#allocation3] sm:$0xff]   ;;  %v15658_v12 = vld [vmem:[#allocation3 + $0x8] sm:$0xff]   ;;  %v15661_v14 = vld [vmem:[#allocation3 + $0x10] sm:$0xff]   ;;  %v15779_v1 = vrot.slane %v15531_v0, 7 }
  0x4c   :  { %12498 = vmatprep.subr.bf16.mxu0 %v15130_v4  ;;  %351 = vst [vmem:[#allocation2 + $0x20] sm:$0xff] %v15652_v10  ;;  %v15133_v13 = vld [vmem:[#allocation6 + $0x60] sm:$0xff]   ;;  %352 = vst [vmem:[#allocation2 + $0x38] sm:$0xff] %v15658_v12  ;;  %v15663_v15 = vld [vmem:[#allocation3 + $0x18] sm:$0xff]   ;;  %vm1835_vm11 = vsmask.f32 7424 }
  0x4d   :  { %v89_v5 = vadd.s32 8, %v15645_v2  ;;  %v15665_v16 = vld [vmem:[#allocation3 + $0x20] sm:$0xff]   ;;  %353 = vst [vmem:[#allocation2 + $0x50] sm:$0xff] %v15661_v14  ;;  %v15134_v17 = vld [vmem:[#allocation6 + $0x68] sm:$0xff]   ;;  %354 = vst [vmem:[#allocation2 + $0x68] sm:$0xff] %v15663_v15  ;;  %vm90_vm4 = vcmp.gt.s32.totalorder %v15645_v2, 0 }
  0x4e   :  { %355 = vst [vmem:[#allocation2 + $0x80] sm:$0xff] %v15665_v16  ;;  %v15670_v18 = vld [vmem:[#allocation3 + $0x28] sm:$0xff]   ;;  %v15135_v19 = vld [vmem:[#allocation6 + $0x70] sm:$0xff]   ;;  %v15675_v21 = vld [vmem:[#allocation3 + $0x38] sm:$0xff]  }
  0x4f   :  { %vm93_vm0 = vcmp.lt.s32.totalorder %v89_v5, 15  ;;  %12499 = vmatpush3.bf16.msra.mxu0 %v15130_v4  ;;  %v15672_v20 = vld [vmem:[#allocation3 + $0x30] sm:$0xff]   ;;  %356 = vst [vmem:[#allocation2 + $0x98] sm:$0xff] %v15670_v18  ;;  %v15678_v22 = vld [vmem:[#allocation3 + $0x40] sm:$0xff]   ;;  %358 = vst [vmem:[#allocation2 + $0xc8] sm:$0xff] %v15675_v21 }
  0x50   :  { %12500 = vmatprep.subr.bf16.mxu0 %v15131_v6  ;;  %vm624_vm3 = vmpackc.low %vm93_vm0, %vm93_vm0  ;;  %357 = vst [vmem:[#allocation2 + $0xb0] sm:$0xff] %v15672_v20  ;;  %v15136_v23 = vld [vmem:[#allocation6 + $0x78] sm:$0xff]   ;;  %v15682_v24 = vld [vmem:[#allocation3 + $0x48] sm:$0xff]  }
  0x51   :  { %v626_v9 = vsel %vm624_vm3, 65537, %v15531_v0  ;;  %359 = vst [vmem:[#allocation2 + $0xe0] sm:$0xff] %v15678_v22  ;;  %v15684_v25 = vld [vmem:[#allocation3 + $0x50] sm:$0xff]   ;;  %360 = vst [vmem:[#allocation2 + $0xf8] sm:$0xff] %v15682_v24  ;;  %v15687_v26 = vld [vmem:[#allocation3 + $0x58] sm:$0xff]  }
  0x52   :  { %v15655_v11 = vcombine.low %v15649_v8, %v626_v9  ;;  %361 = vst [vmem:[#allocation2 + $0x110] sm:$0xff] %v15684_v25  ;;  %v15690_v27 = vld [vmem:[#allocation3 + $0x60] sm:$0xff]   ;;  %362 = vst [vmem:[#allocation2 + $0x128] sm:$0xff] %v15687_v26  ;;  %v15694_v29 = vld [vmem:[#allocation3 + $0x68] sm:$0xff]  }
  0x53   :  { %12501 = vmatpush3.bf16.msra.mxu0 %v15131_v6  ;;  %v15138_v28 = vld [vmem:[#allocation6] sm:$0xff]   ;;  %363 = vst [vmem:[#allocation2 + $0x140] sm:$0xff] %v15690_v27  ;;  %v15696_v30 = vld [vmem:[#allocation3 + $0x70] sm:$0xff]   ;;  %364 = vst [vmem:[#allocation2 + $0x158] sm:$0xff] %v15694_v29 }
  0x54   :  { %12502 = vmatprep.subr.bf16.mxu0 %v15132_v7  ;;  %v15699_v31 = vld [vmem:[#allocation3 + $0x80] sm:$0xff]   ;;  %v15143_v32 = vld [vmem:[#allocation6 + $0x8] sm:$0xff]   ;;  %365 = vst [vmem:[#allocation2 + $0x170] sm:$0xff] %v15696_v30  ;;  %v15705_v34 = vld [vmem:[#allocation3 + $0x90] sm:$0xff]  }
  0x55   :  { %367 = vst [vmem:[#allocation2 + $0x1d0] sm:$0xff] %v15699_v31  ;;  %v15703_v33 = vld [vmem:[#allocation3 + $0x88] sm:$0xff]   ;;  %v15708_v35 = vld [vmem:[#allocation3 + $0x98] sm:$0xff]   ;;  %369 = vst [vmem:[#allocation2 + $0x200] sm:$0xff] %v15705_v34 }
  0x56   :  { %368 = vst [vmem:[#allocation2 + $0x1e8] sm:$0xff] %v15703_v33  ;;  %v15712_v36 = vld [vmem:[#allocation3 + $0xa0] sm:$0xff]   ;;  %v15148_v37 = vld [vmem:[#allocation6 + $0x10] sm:$0xff]   ;;  %370 = vst [vmem:[#allocation2 + $0x218] sm:$0xff] %v15708_v35 }
  0x57   :  { %12503 = vmatpush3.bf16.msra.mxu0 %v15132_v7  ;;  %371 = vst [vmem:[#allocation2 + $0x230] sm:$0xff] %v15712_v36  ;;  %v15163_v38 = vld [vmem:[#allocation3 + $0xa8] sm:$0xff]   ;;  %v15717_v39 = vld [vmem:[#allocation3 + $0xb0] sm:$0xff]   ;;  %v15719_v40 = vld [vmem:[#allocation3 + $0xb8] sm:$0xff]  }
  0x58   :  { %12504 = vmatprep.subr.bf16.mxu0 %v15133_v13  ;;  %372 = vst [vmem:[#allocation2 + $0x248] sm:$0xff] %v15163_v38  ;;  %373 = vst [vmem:[#allocation2 + $0x260] sm:$0xff] %v15717_v39  ;;  %v15722_v41 = vld [vmem:[#allocation3 + $0xc0] sm:$0xff]   ;;  %v15153_v42 = vld [vmem:[#allocation6 + $0x18] sm:$0xff]  }
  0x59   :  { %374 = vst [vmem:[#allocation2 + $0x278] sm:$0xff] %v15719_v40  ;;  %375 = vst [vmem:[#allocation2 + $0x290] sm:$0xff] %v15722_v41  ;;  %v15168_v43 = vld [vmem:[#allocation3 + $0xc8] sm:$0xff]   ;;  %v15157_v44 = vld [vmem:[#allocation6 + $0x20] sm:$0xff]  }
  0x5a   :  { %v15169_v45 = vld [vmem:[#allocation3 + $0xd0] sm:$0xff]   ;;  %376 = vst [vmem:[#allocation2 + $0x2a8] sm:$0xff] %v15168_v43  ;;  %v15170_v46 = vld [vmem:[#allocation3 + $0xd8] sm:$0xff]   ;;  %v15728_v47 = vld [vmem:[#allocation3 + $0xe0] sm:$0xff]  }
  0x5b   :  { %12505 = vmatpush3.bf16.msra.mxu0 %v15133_v13  ;;  %377 = vst [vmem:[#allocation2 + $0x2c0] sm:$0xff] %v15169_v45  ;;  %378 = vst [vmem:[#allocation2 + $0x2d8] sm:$0xff] %v15170_v46  ;;  %v15731_v48 = vld [vmem:[#allocation3 + $0xe8] sm:$0xff]   ;;  %v15733_v49 = vld [vmem:[#allocation3 + $0xf0] sm:$0xff]  }
  0x5c   :  { %12506 = vmatprep.subr.bf16.mxu0 %v15134_v17  ;;  %379 = vst [vmem:[#allocation2 + $0x2f0] sm:$0xff] %v15728_v47  ;;  %v15162_v50 = vld [vmem:[#allocation6 + $0x28] sm:$0xff]   ;;  %380 = vst [vmem:[#allocation2 + $0x308] sm:$0xff] %v15731_v48  ;;  %v15167_v51 = vld [vmem:[#allocation6 + $0x30] sm:$0xff]  }
  0x5d   :  { %381 = vst [vmem:[#allocation2 + $0x320] sm:$0xff] %v15733_v49  ;;  %v15172_v52 = vld [vmem:[#allocation6 + $0x38] sm:$0xff]   ;;  %v15741_v53 = vld [vmem:[#allocation6 + $0x80] sm:$0xff]   ;;  %vm459_vm5 = vmpackc.low %vm90_vm4, %vm90_vm4 }
  0x5e   :  { %v461_v54 = vsel %vm459_vm5, 65537, %v15531_v0  ;;  %v419_v60 = vld [vmem:[#allocation2] sm:$0x80]  ;;  %v420_v6 = vld [vmem:[#allocation2 + $0x18] sm:$0x80] }
  0x5f   :  { %12507 = vmatpush3.bf16.msra.mxu0 %v15134_v17  ;;  %v11261_v55 = vcombine.low %v461_v54, %v15649_v8  ;;  %v421_v8 = vld [vmem:[#allocation2 + $0x30] sm:$0x80] }
  0x60   :  { %12508 = vmatprep.subr.bf16.mxu0 %v15135_v19 }
  0x61   :  { %v467_v56 = vshll.u32 %v11261_v55, 16  ;;  %v470_v58 = vshrl.u32 %v11261_v55, 16 }
  0x63   :  { %12509 = vmatpush3.bf16.msra.mxu0 %v15135_v19  ;;  %v15760_v57 = vrot.slane %v467_v56, 1 }
  0x64   :  { %12510 = vmatprep.subr.bf16.mxu0 %v15136_v23 }
  0x65   :  { %v15765_v59 = vor.u32 %v470_v58, %v15760_v57  ;;  %vm473_vm7 = vcmp.ne.s16.totalorder %v15760_v57, 0  ;;  %v15307_v57 = vld [vmem:[#allocation8 + $0x210] sm:$0xff]  }
  0x66   :  { %v475_v63 = vsel %vm473_vm7, %v419_v60, 0  ;;  %v479_v19 = vsel %vm473_vm7, %v421_v8, 0  ;;  %v426_v60 = vld [vmem:[#allocation2 + $0xa8] sm:$0x80] }
  0x67   :  { %12511 = vmatpush3.bf16.msra.mxu0 %v15136_v23  ;;  %vm474_vm6 = vcmp.ne.s16.totalorder %v15765_v59, 0  ;;  %v713_v5 = vshrl.u32 %v475_v63, 16 }
  0x68   :  { %12576 = vmatprep.subr.bf16.mxu0 %v15138_v28  ;;  %v478_v61 = vsel %vm474_vm6, %v15652_v10, 0  ;;  %v480_v62 = vsel %vm474_vm6, %v15658_v12, 0  ;;  %v482_v4 = vsel %vm474_vm6, %v15661_v14, 0  ;;  %v484_v7 = vsel %vm474_vm6, %v15663_v15, 0 }
  0x69   :  { %v729_v2 = vshrl.u32 %v478_v61, 16  ;;  %v741_v3 = vshrl.u32 %v480_v62, 16  ;;  %v732_v9 = vshll.u32 %v478_v61, 16  ;;  %v753_v13 = vshrl.u32 %v482_v4, 16 }
  0x6a   :  { %12513 = vmatmul.mubr.bf16.vlgmr.msra.gmra.mrb[0].mxu0 %v15652_v10  ;;  %v715_v17 = vrot.slane %v713_v5, 7  ;;  %v765_v23 = vshrl.u32 %v484_v7, 16  ;;  %v488_v54 = vsel %vm474_vm6, %v15670_v18, 0  ;;  %v490_v8 = vsel %vm474_vm6, %v15672_v20, 0 }
  0x6b   :  { %12577 = vmatpush3.bf16.msra.mxu0 %v15138_v28  ;;  %12516 = vmatprep.mubr.bf16.mxu0 %v15658_v12  ;;  %v731_v10 = vrot.slane %v729_v2, 7  ;;  %v744_v12 = vshll.u32 %v480_v62, 16  ;;  %v789_v2 = vshrl.u32 %v488_v54, 16  ;;  %v792_v5 = vshll.u32 %v488_v54, 16 }
  0x6c   :  { %12578 = vmatprep.subr.bf16.mxu0 %v15143_v32 }
  0x6f   :  { %12579 = vmatpush3.bf16.msra.mxu0 %v15143_v32  ;;  %v723_v32 = vsel %vm711_vm8, %v715_v17, %v15779_v1  ;;  %v15178_v17 = vld [vmem:[#allocation6 + $0x98] sm:$0xff]  }
  0x70   :  { %12580 = vmatprep.subr.bf16.mxu0 %v15148_v37 }
  0x72   :  { %12517 = vmatmul.mubr.bf16.gmra.mrb[4].mxu0 %v15661_v14  ;;  %v477_v14 = vsel %vm473_vm7, %v420_v6, 0  ;;  %v15177_v6 = vld [vmem:[#allocation6 + $0x90] sm:$0xff]  }
  0x73   :  { %12520 = vmatprep.mubr.bf16.mxu0 %v15663_v15  ;;  %12581 = vmatpush3.bf16.msra.mxu0 %v15148_v37  ;;  %v422_v15 = vld [vmem:[#allocation2 + $0x48] sm:$0x80]  ;;  %v725_v28 = vshrl.u32 %v477_v14, 16  ;;  %v486_v37 = vsel %vm474_vm6, %v15665_v16, 0 }
  0x74   :  { %12582 = vmatprep.subr.bf16.mxu0 %v15153_v42  ;;  %v780_v63 = vshll.u32 %v486_v37, 16 }
  0x77   :  { %12583 = vmatpush3.bf16.msra.mxu0 %v15153_v42 }
  0x78   :  { %12584 = vmatprep.subr.bf16.mxu0 %v15157_v44 }
  0x7a   :  { %12521 = vmatmul.mubr.bf16.gmra.mrb[8].mxu0 %v15665_v16 }
  0x7b   :  { %12524 = vmatprep.mubr.bf16.mxu0 %v15670_v18  ;;  %12585 = vmatpush3.bf16.msra.mxu0 %v15157_v44 }
  0x7c   :  { %12586 = vmatprep.subr.bf16.mxu0 %v15162_v50 }
  0x7f   :  { %12587 = vmatpush3.bf16.msra.mxu0 %v15162_v50 }
  0x80   :  { %12588 = vmatprep.subr.bf16.mxu0 %v15167_v51 }
  0x82   :  { %12525 = vmatmul.mubr.bf16.gmra.mrb[12].mxu0 %v15672_v20 }
  0x83   :  { %12528 = vmatprep.mubr.bf16.mxu0 %v15675_v21  ;;  %12589 = vmatpush3.bf16.msra.mxu0 %v15167_v51 }
  0x84   :  { %12590 = vmatprep.subr.bf16.mxu0 %v15172_v52 }
  0x87   :  { %12591 = vmatpush3.bf16.msra.mxu0 %v15172_v52  ;;  %v15176_v52 = vld [vmem:[#allocation6 + $0x88] sm:$0xff]  }
  0x88   :  { %12656 = vmatprep.subr.bf16.mxu0 %v15741_v53 }
  0x8a   :  { %12529 = vmatmul.mubr.bf16.gmra.mrb[16].mxu0 %v15678_v22 }
  0x8b   :  { %12532 = vmatprep.mubr.bf16.mxu0 %v15682_v24 }
  0x92   :  { %12533 = vmatmul.mubr.bf16.gmra.mrb[20].mxu0 %v15684_v25 }
  0x93   :  { %12536 = vmatprep.mubr.bf16.mxu0 %v15687_v26 }
  0x9a   :  { %12537 = vmatmul.mubr.bf16.gmra.mrb[24].mxu0 %v15690_v27 }
  0x9b   :  { %12540 = vmatprep.mubr.bf16.mxu0 %v15694_v29 }
  0xa2   :  { %12541 = vmatmul.mubr.bf16.gmra.mrb[28].mxu0 %v15696_v30  ;;  %v737_v30 = vshrl.u32 %v479_v19, 16 }
  0xa3   :  { %12544 = vmatprep.mubr.bf16.mxu0 %v15531_v0  ;;  %v743_v0 = vrot.slane %v741_v3, 7 }
  0xa4   :  { %v739_v42 = vrot.slane %v737_v30, 7 }
  0xaa   :  { %12545 = vmatmul.mubr.bf16.gmra.mrb[32].mxu0 %v15699_v31 }
  0xab   :  { %12548 = vmatprep.mubr.bf16.mxu0 %v15703_v33  ;;  %v423_v33 = vld [vmem:[#allocation2 + $0x60] sm:$0x80] }
  0xac   :  { %v483_v44 = vsel %vm473_vm7, %v423_v33, 0 }
  0xad   :  { %v761_v50 = vshrl.u32 %v483_v44, 16  ;;  %v15180_v44 = vld [vmem:[#allocation6 + $0xa8] sm:$0xff]  }
  0xaf   :  { %v763_v3 = vrot.slane %v761_v50, 7 }
  0xb2   :  { %12549 = vmatmul.mubr.bf16.gmra.mrb[36].mxu0 %v15705_v34  ;;  %v734_v34 = vor.u32 %v732_v9, %v731_v10  ;;  %v791_v10 = vrot.slane %v789_v2, 7 }
  0xb3   :  { %12552 = vmatprep.mubr.bf16.mxu0 %v15708_v35  ;;  %v481_v35 = vsel %vm473_vm7, %v422_v15, 0 }
  0xba   :  { %12553 = vmatmul.mubr.bf16.gmra.mrb[40].mxu0 %v15712_v36  ;;  %v756_v36 = vshll.u32 %v482_v4, 16 }
  0xbb   :  { %12556 = vmatprep.mubr.bf16.mxu0 %v15163_v38  ;;  %v727_v38 = vrot.slane %v725_v28, 7 }
  0xc2   :  { %12557 = vmatmul.mubr.bf16.gmra.mrb[44].mxu0 %v15717_v39  ;;  %v755_v39 = vrot.slane %v753_v13, 7  ;;  %v801_v13 = vshrl.u32 %v490_v8, 16 }
  0xc3   :  { %12560 = vmatprep.mubr.bf16.mxu0 %v15719_v40  ;;  %v767_v40 = vrot.slane %v765_v23, 7  ;;  %v428_v23 = vld [vmem:[#allocation2 + $0xd8] sm:$0x80] }
  0xc4   :  { %v758_v56 = vor.u32 %v756_v36, %v755_v39  ;;  %v803_v33 = vrot.slane %v801_v13, 7  ;;  %v15179_v36 = vld [vmem:[#allocation6 + $0xa0] sm:$0xff]  }
  0xca   :  { %12561 = vmatmul.mubr.bf16.gmra.mrb[48].mxu0 %v15722_v41  ;;  %v768_v41 = vshll.u32 %v484_v7, 16  ;;  %v489_v7 = vsel %vm473_vm7, %v426_v60, 0 }
  0xcb   :  { %12564 = vmatprep.mubr.bf16.mxu0 %v15168_v43  ;;  %v746_v43 = vor.u32 %v744_v12, %v743_v0  ;;  %v492_v0 = vsel %vm474_vm6, %v15675_v21, 0  ;;  %v797_v30 = vshrl.u32 %v489_v7, 16  ;;  %v494_v21 = vsel %vm474_vm6, %v15678_v22, 0 }
  0xcc   :  { %v770_v4 = vor.u32 %v768_v41, %v767_v40  ;;  %v813_v19 = vshrl.u32 %v492_v0, 16  ;;  %v825_v40 = vshrl.u32 %v494_v21, 16 }
  0xcd   :  { %v15809_v51 = vsel %vm711_vm8, %v739_v42, %v746_v43  ;;  %v429_v42 = vld [vmem:[#allocation2 + $0xf0] sm:$0x80]  ;;  %v496_v43 = vsel %vm474_vm6, %v15682_v24, 0 }
  0xce   :  { %v15831_v12 = vsel %vm711_vm8, %v763_v3, %v770_v4  ;;  %v815_v39 = vrot.slane %v813_v19, 7  ;;  %v495_v50 = vsel %vm473_vm7, %v429_v42, 0  ;;  %v827_v54 = vrot.slane %v825_v40, 7  ;;  %v15181_v24 = vld [vmem:[#allocation6 + $0xb0] sm:$0xff]  }
  0xcf   :  { %v833_v60 = vshrl.u32 %v495_v50, 16  ;;  %v500_v4 = vsel %vm474_vm6, %v15687_v26, 0  ;;  %v15873_v26 = vld [vmem:[#allocation6 + $0xc0] sm:$0xff]   ;;  %v502_v19 = vsel %vm474_vm6, %v15690_v27, 0  ;;  %v504_v27 = vsel %vm474_vm6, %v15694_v29, 0 }
  0xd2   :  { %12565 = vmatmul.mubr.bf16.gmra.mrb[52].mxu0 %v15169_v45  ;;  %v424_v45 = vld [vmem:[#allocation2 + $0x78] sm:$0x80] }
  0xd3   :  { %12568 = vmatprep.mubr.bf16.mxu0 %v15170_v46  ;;  %v749_v46 = vshrl.u32 %v481_v35, 16  ;;  %v485_v16 = vsel %vm473_vm7, %v424_v45, 0  ;;  %v799_v45 = vrot.slane %v797_v30, 7 }
  0xd4   :  { %v773_v62 = vshrl.u32 %v485_v16, 16  ;;  %v837_v16 = vshrl.u32 %v496_v43, 16 }
  0xd5   :  { %v751_v61 = vrot.slane %v749_v46, 7 }
  0xd6   :  { %v775_v20 = vrot.slane %v773_v62, 7 }
  0xd7   :  { %v15825_v9 = vsel %vm711_vm8, %v751_v61, %v758_v56  ;;  %v828_v56 = vshll.u32 %v494_v21, 16  ;;  %v498_v61 = vsel %vm474_vm6, %v15684_v25, 0 }
  0xd8   :  { %v849_v25 = vshrl.u32 %v498_v61, 16 }
  0xd9   :  { %v830_v7 = vor.u32 %v828_v56, %v827_v54 }
  0xda   :  { %12569 = vmatmul.mubr.bf16.gmra.mrb[56].mxu0 %v15728_v47  ;;  %v777_v47 = vshrl.u32 %v486_v37, 16  ;;  %v816_v37 = vshll.u32 %v492_v0, 16 }
  0xdb   :  { %12572 = vmatprep.mubr.bf16.mxu0 %v15731_v48  ;;  %v425_v48 = vld [vmem:[#allocation2 + $0x90] sm:$0x80] }
  0xdc   :  { %v487_v55 = vsel %vm473_vm7, %v425_v48, 0  ;;  %v779_v58 = vrot.slane %v777_v47, 7 }
  0xdd   :  { %v785_v18 = vshrl.u32 %v487_v55, 16  ;;  %v430_v55 = vld [vmem:[#allocation2 + $0x108] sm:$0x80] }
  0xde   :  { %v782_v15 = vor.u32 %v780_v63, %v779_v58  ;;  %v840_v58 = vshll.u32 %v496_v43, 16  ;;  %v839_v63 = vrot.slane %v837_v16, 7  ;;  %v497_v2 = vsel %vm473_vm7, %v430_v55, 0  ;;  %v437_v55 = vld [vmem:[#allocation2 + $0x1b0] sm:$0x80] }
  0xdf   :  { %v787_v28 = vrot.slane %v785_v18, 7  ;;  %v15182_v18 = vld [vmem:[#allocation6 + $0xb8] sm:$0xff]   ;;  %v885_v43 = vshrl.u32 %v504_v27, 16 }
  0xe0   :  { %v15843_v41 = vsel %vm711_vm8, %v775_v20, %v782_v15  ;;  %v842_v0 = vor.u32 %v840_v58, %v839_v63  ;;  %v851_v20 = vrot.slane %v849_v25, 7  ;;  %v438_v25 = vld [vmem:[#allocation2 + $0x1c8] sm:$0x80] }
  0xe1   :  { %v887_v54 = vrot.slane %v885_v43, 7  ;;  %v15316_v43 = vld [vmem:[#allocation2 + $0x218] sm:$0xff] }
  0xe2   :  { %12573 = vmatmul.mubr.bf16.gmra.mrb[60].mxu0 %v15733_v49  ;;  %v15804_v49 = vsel %vm711_vm8, %v727_v38, %v734_v34  ;;  %v804_v34 = vshll.u32 %v490_v8, 16  ;;  %v493_v38 = vsel %vm473_vm7, %v428_v23, 0  ;;  %v845_v8 = vshrl.u32 %v497_v2, 16 }
  0xe3   :  { %12592 = vmatprep.mubr.bf16.mxu0 %v723_v32  ;;  %v794_v32 = vor.u32 %v792_v5, %v791_v10  ;;  %v821_v48 = vshrl.u32 %v493_v38, 16  ;;  %v431_v5 = vld [vmem:[#allocation2 + $0x120] sm:$0x80]  ;;  %v835_v10 = vrot.slane %v833_v60, 7 }
  0xe4   :  { %v806_v46 = vor.u32 %v804_v34, %v803_v33  ;;  %v499_v13 = vsel %vm473_vm7, %v431_v5, 0  ;;  %v873_v33 = vshrl.u32 %v502_v19, 16  ;;  %v15893_v34 = vsel %vm474_vm6, %v15699_v31, 0 }
  0xe5   :  { %v15846_v22 = vsel %vm711_vm8, %v787_v28, %v794_v32  ;;  %v857_v15 = vshrl.u32 %v499_v13, 16  ;;  %v864_v28 = vshll.u32 %v500_v4, 16  ;;  %v15882_v30 = vsel %vm711_vm8, %v835_v10, %v842_v0  ;;  %v439_v0 = vld [vmem:[#allocation2 + $0x1e0] sm:$0x80] }
  0xe6   :  { %v15859_v62 = vsel %vm711_vm8, %v799_v45, %v806_v46  ;;  %v875_v45 = vrot.slane %v873_v33, 7  ;;  %v434_v46 = vld [vmem:[#allocation2 + $0x168] sm:$0x80]  ;;  %v921_v56 = vshrl.u32 %v15893_v34, 16  ;;  %v513_v13 = vsel %vm473_vm7, %v438_v25, 0 }
  0xe7   :  { %v859_v40 = vrot.slane %v857_v15, 7  ;;  %v15318_v25 = vld [vmem:[#allocation2 + $0x248] sm:$0xff] }
  0xea   :  { %12593 = vmatmul.mubr.bf16.vlgmr.msra.gmra.mrb[0].mxu0 %v15804_v49 }
  0xeb   :  { %12657 = vmatpush3.bf16.msra.mxu0 %v15741_v53  ;;  %12596 = vmatprep.mubr.bf16.mxu0 %v15809_v51  ;;  %v427_v53 = vld [vmem:[#allocation2 + $0xc0] sm:$0x80] }
  0xec   :  { %12658 = vmatprep.subr.bf16.mxu0 %v15176_v52  ;;  %v491_v14 = vsel %vm473_vm7, %v427_v53, 0  ;;  %v852_v53 = vshll.u32 %v498_v61, 16 }
  0xed   :  { %v809_v35 = vshrl.u32 %v491_v14, 16  ;;  %v432_v14 = vld [vmem:[#allocation2 + $0x138] sm:$0x80] }
  0xee   :  { %v501_v32 = vsel %vm473_vm7, %v432_v14, 0 }
  0xef   :  { %12659 = vmatpush3.bf16.msra.mxu0 %v15176_v52  ;;  %v811_v47 = vrot.slane %v809_v35, 7  ;;  %v818_v52 = vor.u32 %v816_v37, %v815_v39  ;;  %v433_v35 = vld [vmem:[#allocation2 + $0x150] sm:$0x80]  ;;  %v854_v37 = vor.u32 %v852_v53, %v851_v20  ;;  %v869_v38 = vshrl.u32 %v501_v32, 16  ;;  %v15315_v20 = vld [vmem:[#allocation2 + $0x200] sm:$0xff] }
  0xf0   :  { %12660 = vmatprep.subr.bf16.mxu0 %v15177_v6  ;;  %v876_v39 = vshll.u32 %v502_v19, 16  ;;  %v503_v31 = vsel %vm473_vm7, %v433_v35, 0  ;;  %v518_v19 = vsel %vm474_vm6, %v15315_v20, 0  ;;  %v515_v32 = vsel %vm473_vm7, %v439_v0, 0  ;;  %v440_v35 = vld [vmem:[#allocation2 + $0x1f8] sm:$0x80] }
  0xf1   :  { %v15864_v3 = vsel %vm711_vm8, %v811_v47, %v818_v52  ;;  %v881_v52 = vshrl.u32 %v503_v31, 16  ;;  %v871_v58 = vrot.slane %v869_v38, 7  ;;  %v929_v38 = vshrl.u32 %v515_v32, 16  ;;  %v15319_v32 = vld [vmem:[#allocation2 + $0x260] sm:$0xff] }
  0xf2   :  { %12597 = vmatmul.mubr.bf16.gmra.mrb[4].mxu0 %v15825_v9  ;;  %v878_v60 = vor.u32 %v876_v39, %v875_v45 }
  0xf3   :  { %12600 = vmatprep.mubr.bf16.mxu0 %v15831_v12  ;;  %12661 = vmatpush3.bf16.msra.mxu0 %v15177_v6  ;;  %v823_v6 = vrot.slane %v821_v48, 7  ;;  %v888_v48 = vshll.u32 %v504_v27, 16  ;;  %v883_v61 = vrot.slane %v881_v52, 7  ;;  %v917_v27 = vshrl.u32 %v513_v13, 16 }
  0xf4   :  { %12662 = vmatprep.subr.bf16.mxu0 %v15178_v17 }
  0xf5   :  { %v15879_v23 = vsel %vm711_vm8, %v823_v6, %v830_v7  ;;  %v890_v63 = vor.u32 %v888_v48, %v887_v54  ;;  %v15915_v6 = vsel %vm711_vm8, %v871_v58, %v878_v60  ;;  %v919_v45 = vrot.slane %v917_v27, 7  ;;  %v15317_v54 = vld [vmem:[#allocation2 + $0x230] sm:$0xff]  ;;  %v444_v27 = vld [vmem:[#allocation2 + $0x258] sm:$0x80] }
  0xf7   :  { %12663 = vmatpush3.bf16.msra.mxu0 %v15178_v17  ;;  %v861_v17 = vshrl.u32 %v500_v4, 16  ;;  %v511_v4 = vsel %vm473_vm7, %v437_v55, 0  ;;  %v15920_v10 = vsel %vm711_vm8, %v883_v61, %v890_v63  ;;  %v522_v55 = vsel %vm474_vm6, %v15317_v54, 0 }
  0xf8   :  { %12664 = vmatprep.subr.bf16.mxu0 %v15179_v36  ;;  %v905_v7 = vshrl.u32 %v511_v4, 16  ;;  %v969_v61 = vshrl.u32 %v522_v55, 16 }
  0xf9   :  { %v863_v21 = vrot.slane %v861_v17, 7 }
  0xfa   :  { %12601 = vmatmul.mubr.bf16.gmra.mrb[8].mxu0 %v15843_v41  ;;  %v907_v33 = vrot.slane %v905_v7, 7  ;;  %v524_v7 = vsel %vm474_vm6, %v15318_v25, 0 }
  0xfb   :  { %12604 = vmatprep.mubr.bf16.mxu0 %v15846_v22  ;;  %12665 = vmatpush3.bf16.msra.mxu0 %v15179_v36  ;;  %v847_v36 = vrot.slane %v845_v8, 7  ;;  %v866_v42 = vor.u32 %v864_v28, %v863_v21  ;;  %v15314_v8 = vld [vmem:[#allocation2 + $0x1e8] sm:$0xff]  ;;  %v923_v28 = vrot.slane %v921_v56, 7  ;;  %v924_v21 = vshll.u32 %v15893_v34, 16 }
  0xfc   :  { %12666 = vmatprep.subr.bf16.mxu0 %v15180_v44  ;;  %v516_v53 = vsel %vm474_vm6, %v15314_v8, 0  ;;  %v520_v34 = vsel %vm474_vm6, %v15316_v43, 0  ;;  %v443_v8 = vld [vmem:[#allocation2 + $0x240] sm:$0x80]  ;;  %v525_v43 = vsel %vm473_vm7, %v444_v27, 0 }
  0xfd   :  { %v15902_v47 = vsel %vm711_vm8, %v847_v36, %v854_v37  ;;  %v15905_v16 = vsel %vm711_vm8, %v859_v40, %v866_v42  ;;  %v933_v14 = vshrl.u32 %v516_v53, 16  ;;  %v936_v36 = vshll.u32 %v516_v53, 16 }
  0xfe   :  { %v945_v37 = vshrl.u32 %v518_v19, 16  ;;  %v517_v42 = vsel %vm473_vm7, %v440_v35, 0  ;;  %v926_v31 = vor.u32 %v924_v21, %v923_v28  ;;  %v957_v52 = vshrl.u32 %v520_v34, 16 }
  0xff   :  { %12667 = vmatpush3.bf16.msra.mxu0 %v15180_v44  ;;  %v15313_v44 = vld [vmem:[#allocation2 + $0x170] sm:$0xff]  ;;  %v935_v39 = vrot.slane %v933_v14, 7  ;;  %v941_v48 = vshrl.u32 %v517_v42, 16  ;;  %v960_v60 = vshll.u32 %v520_v34, 16  ;;  %v981_v14 = vshrl.u32 %v524_v7, 16 }
 0x100   :  { %12668 = vmatprep.subr.bf16.mxu0 %v15181_v24  ;;  %v506_v29 = vsel %vm474_vm6, %v15313_v44, 0  ;;  %v915_v44 = vsel %vm711_vm8, %v907_v33, %v15779_v1  ;;  %v442_v1 = vld [vmem:[#allocation2 + $0x228] sm:$0x80]  ;;  %v15946_v63 = vsel %vm711_vm8, %v919_v45, %v926_v31  ;;  %v959_v4 = vrot.slane %v957_v52, 7 }
 0x101   :  { %v897_v50 = vshrl.u32 %v506_v29, 16  ;;  %v900_v2 = vshll.u32 %v506_v29, 16  ;;  %v441_v29 = vld [vmem:[#allocation2 + $0x210] sm:$0x80]  ;;  %v938_v56 = vor.u32 %v936_v36, %v935_v39  ;;  %v943_v53 = vrot.slane %v941_v48, 7  ;;  %v15320_v39 = vld [vmem:[#allocation2 + $0x278] sm:$0xff] }
 0x102   :  { %12605 = vmatmul.mubr.bf16.gmra.mrb[12].mxu0 %v15859_v62  ;;  %v519_v58 = vsel %vm473_vm7, %v441_v29, 0  ;;  %v523_v28 = vsel %vm473_vm7, %v443_v8, 0  ;;  %v984_v21 = vshll.u32 %v524_v7, 16  ;;  %v526_v33 = vsel %vm474_vm6, %v15319_v32, 0  ;;  %v447_v7 = vld [vmem:[#allocation2 + $0x2a0] sm:$0x80] }
 0x103   :  { %12608 = vmatprep.mubr.bf16.mxu0 %v15864_v3  ;;  %12669 = vmatpush3.bf16.msra.mxu0 %v15181_v24  ;;  %v505_v24 = vsel %vm473_vm7, %v434_v46, 0  ;;  %v899_v5 = vrot.slane %v897_v50, 7  ;;  %v948_v46 = vshll.u32 %v518_v19, 16  ;;  %v947_v50 = vrot.slane %v945_v37, 7 }
 0x104   :  { %12670 = vmatprep.subr.bf16.mxu0 %v15182_v18  ;;  %v962_v19 = vor.u32 %v960_v60, %v959_v4  ;;  %v977_v36 = vshrl.u32 %v523_v28, 16  ;;  %v983_v37 = vrot.slane %v981_v14, 7  ;;  %v528_v42 = vsel %vm474_vm6, %v15320_v39, 0  ;;  %v446_v60 = vld [vmem:[#allocation2 + $0x288] sm:$0x80] }
 0x105   :  { %v902_v15 = vor.u32 %v900_v2, %v899_v5  ;;  %v953_v2 = vshrl.u32 %v519_v58, 16  ;;  %v521_v5 = vsel %vm473_vm7, %v442_v1, 0  ;;  %v950_v0 = vor.u32 %v948_v46, %v947_v50 }
 0x106   :  { %v965_v13 = vshrl.u32 %v521_v5, 16  ;;  %v993_v34 = vshrl.u32 %v526_v33, 16  ;;  %v979_v31 = vrot.slane %v977_v36, 7  ;;  %v986_v46 = vor.u32 %v984_v21, %v983_v37  ;;  %v15322_v5 = vld [vmem:[#allocation2 + $0x2a8] sm:$0xff]  ;;  %v15323_v37 = vld [vmem:[#allocation2 + $0x2c0] sm:$0xff] }
 0x107   :  { %12671 = vmatpush3.bf16.msra.mxu0 %v15182_v18  ;;  %v893_v18 = vshrl.u32 %v505_v24, 16  ;;  %v931_v24 = vrot.slane %v929_v38, 7  ;;  %v955_v20 = vrot.slane %v953_v2, 7  ;;  %v15962_v35 = vsel %vm711_vm8, %v943_v53, %v950_v0 }
 0x108   :  { %12736 = vmatprep.subr.bf16.mxu0 %v15873_v26  ;;  %v967_v29 = vrot.slane %v965_v13, 7  ;;  %v996_v48 = vshll.u32 %v526_v33, 16  ;;  %v1005_v50 = vshrl.u32 %v528_v42, 16  ;;  %v989_v52 = vshrl.u32 %v525_v43, 16  ;;  %v448_v43 = vld [vmem:[#allocation2 + $0x2b8] sm:$0x80] }
 0x109   :  { %v895_v17 = vrot.slane %v893_v18, 7  ;;  %v15949_v18 = vsel %vm711_vm8, %v931_v24, %v938_v56  ;;  %v15965_v38 = vsel %vm711_vm8, %v955_v20, %v962_v19  ;;  %v15321_v24 = vld [vmem:[#allocation2 + $0x290] sm:$0xff]  ;;  %v15981_v1 = vsel %vm711_vm8, %v979_v31, %v986_v46 }
 0x10a   :  { %12609 = vmatmul.mubr.bf16.gmra.mrb[16].mxu0 %v15879_v23  ;;  %v530_v56 = vsel %vm474_vm6, %v15321_v24, 0  ;;  %v1007_v2 = vrot.slane %v1005_v50, 7  ;;  %v1008_v4 = vshll.u32 %v528_v42, 16  ;;  %v532_v25 = vsel %vm474_vm6, %v15322_v5, 0  ;;  %v449_v46 = vld [vmem:[#allocation2 + $0x2d0] sm:$0x80] }
 0x10b   :  { %12612 = vmatprep.mubr.bf16.mxu0 %v15882_v30  ;;  %v15932_v40 = vsel %vm711_vm8, %v895_v17, %v902_v15  ;;  %v972_v17 = vshll.u32 %v522_v55, 16  ;;  %v971_v15 = vrot.slane %v969_v61, 7  ;;  %v995_v55 = vrot.slane %v993_v34, 7 }
 0x10c   :  { %v991_v8 = vrot.slane %v989_v52, 7  ;;  %v1017_v0 = vshrl.u32 %v530_v56, 16  ;;  %v529_v13 = vsel %vm473_vm7, %v446_v60, 0  ;;  %v1010_v20 = vor.u32 %v1008_v4, %v1007_v2 }
 0x10d   :  { %v974_v45 = vor.u32 %v972_v17, %v971_v15  ;;  %v998_v53 = vor.u32 %v996_v48, %v995_v55  ;;  %v1029_v17 = vshrl.u32 %v532_v25, 16  ;;  %v531_v19 = vsel %vm473_vm7, %v447_v7, 0  ;;  %v15325_v7 = vld [vmem:[#allocation2 + $0x2f0] sm:$0xff] }
 0x10e   :  { %v1013_v28 = vshrl.u32 %v529_v13, 16  ;;  %v1019_v21 = vrot.slane %v1017_v0, 7  ;;  %v1020_v32 = vshll.u32 %v530_v56, 16  ;;  %v1025_v33 = vshrl.u32 %v531_v19, 16  ;;  %v451_v19 = vld [vmem:[#allocation2 + $0x300] sm:$0x80] }
 0x10f   :  { %v15978_v58 = vsel %vm711_vm8, %v967_v29, %v974_v45  ;;  %v15992_v15 = vsel %vm711_vm8, %v991_v8, %v998_v53  ;;  %v1031_v27 = vrot.slane %v1029_v17, 7  ;;  %v1032_v36 = vshll.u32 %v532_v25, 16  ;;  %v15326_v17 = vld [vmem:[#allocation2 + $0x308] sm:$0xff] }
 0x110   :  { %v534_v39 = vsel %vm474_vm6, %v15323_v37, 0  ;;  %v631_v34 = vshrl.u32 %v15655_v11, 16  ;;  %v1015_v45 = vrot.slane %v1013_v28, 7  ;;  %v1022_v48 = vor.u32 %v1020_v32, %v1019_v21 }
 0x111   :  { %v1041_v31 = vshrl.u32 %v534_v39, 16  ;;  %v1027_v50 = vrot.slane %v1025_v33, 7  ;;  %v1034_v52 = vor.u32 %v1032_v36, %v1031_v27  ;;  %v634_v56 = vshll.u32 %v15655_v11, 16  ;;  %v450_v11 = vld [vmem:[#allocation2 + $0x2e8] sm:$0x80] }
 0x112   :  { %12613 = vmatmul.mubr.bf16.gmra.mrb[20].mxu0 %v15902_v47  ;;  %v16006_v24 = vrot.slane %v631_v34, 7  ;;  %v535_v60 = vsel %vm473_vm7, %v449_v46, 0  ;;  %v1044_v4 = vshll.u32 %v534_v39, 16  ;;  %v16012_v5 = vsel %vm711_vm8, %v1015_v45, %v1022_v48  ;;  %v15327_v48 = vld [vmem:[#allocation2 + $0x320] sm:$0xff] }
 0x113   :  { %12616 = vmatprep.mubr.bf16.mxu0 %v15905_v16  ;;  %v1043_v2 = vrot.slane %v1041_v31, 7  ;;  %v16015_v25 = vsel %vm711_vm8, %v1027_v50, %v1034_v52  ;;  %v538_v8 = vsel %vm474_vm6, %v15325_v7, 0  ;;  %v1049_v53 = vshrl.u32 %v535_v60, 16 }
 0x114   :  { %17998 = vst [vmem:[#allocation16_spill] sm:$0xff] %v16006_v24  ;;  %v1065_v32 = vshrl.u32 %v538_v8, 16  ;;  %v537_v33 = vsel %vm473_vm7, %v450_v11, 0  ;;  %v539_v39 = vsel %vm473_vm7, %v451_v19, 0  ;;  %v542_v50 = vsel %vm474_vm6, %v15327_v48, 0 }
 0x115   :  { %v1046_v21 = vor.u32 %v1044_v4, %v1043_v2  ;;  %v1051_v36 = vrot.slane %v1049_v53, 7  ;;  %v1061_v34 = vshrl.u32 %v537_v33, 16  ;;  %v1073_v45 = vshrl.u32 %v539_v39, 16  ;;  %v548_v2 = vld [vmem:[#allocation2 + $0x10] sm:$0x1] }
 0x116   :  { %vm638_vm10 = vcmp.ne.s16.totalorder %v16006_v24, 0  ;;  %v550_v39 = vld [vmem:[#allocation2 + $0x28] sm:$0x1] }
 0x117   :  { %v1063_v60 = vrot.slane %v1061_v34, 7  ;;  %v1075_v7 = vrot.slane %v1073_v45, 7  ;;  %v640_v11 = vsel %vm638_vm10, %v548_v2, 0 }
 0x11a   :  { %12617 = vmatmul.mubr.bf16.gmra.mrb[24].mxu0 %v15915_v6 }
 0x11b   :  { %12620 = vmatprep.mubr.bf16.mxu0 %v15920_v10 }
 0x122   :  { %12621 = vmatmul.mubr.bf16.gmra.mrb[28].mxu0 %v15932_v40 }
 0x123   :  { %12624 = vmatprep.mubr.bf16.mxu0 %v915_v44  ;;  %v445_v44 = vld [vmem:[#allocation2 + $0x270] sm:$0x80] }
 0x124   :  { %v527_v54 = vsel %vm473_vm7, %v445_v44, 0  ;;  %v15324_v44 = vld [vmem:[#allocation2 + $0x2d8] sm:$0xff] }
 0x125   :  { %v1001_v61 = vshrl.u32 %v527_v54, 16  ;;  %v536_v29 = vsel %vm474_vm6, %v15324_v44, 0  ;;  %v533_v54 = vsel %vm473_vm7, %v448_v43, 0  ;;  %v1067_v44 = vrot.slane %v1065_v32, 7 }
 0x126   :  { %v1053_v55 = vshrl.u32 %v536_v29, 16  ;;  %v1056_v13 = vshll.u32 %v536_v29, 16  ;;  %v1068_v29 = vshll.u32 %v538_v8, 16 }
 0x127   :  { %v1003_v14 = vrot.slane %v1001_v61, 7  ;;  %v1037_v61 = vshrl.u32 %v533_v54, 16  ;;  %v452_v54 = vld [vmem:[#allocation2 + $0x318] sm:$0x80] }
 0x128   :  { %v1055_v0 = vrot.slane %v1053_v55, 7  ;;  %v15328_v55 = vld [vmem:[#allocation2 + $0x8] sm:$0xff]  ;;  %v1070_v4 = vor.u32 %v1068_v29, %v1067_v44  ;;  %v541_v53 = vsel %vm473_vm7, %v452_v54, 0  ;;  %v552_v44 = vld [vmem:[#allocation2 + $0x40] sm:$0x1] }
 0x129   :  { %v15997_v42 = vsel %vm711_vm8, %v1003_v14, %v1010_v20  ;;  %v540_v14 = vsel %vm474_vm6, %v15326_v17, 0  ;;  %v16022_v20 = vor.u32 %v634_v56, %v16006_v24  ;;  %v1039_v28 = vrot.slane %v1037_v61, 7  ;;  %v551_v17 = vld [vmem:[#allocation2 + $0x38] sm:$0xff] }
 0x12a   :  { %12625 = vmatmul.mubr.bf16.gmra.mrb[32].mxu0 %v15946_v63  ;;  %v1077_v27 = vshrl.u32 %v540_v14, 16  ;;  %v1058_v37 = vor.u32 %v1056_v13, %v1055_v0  ;;  %v1080_v46 = vshll.u32 %v540_v14, 16  ;;  %v1089_v61 = vshrl.u32 %v542_v50, 16  ;;  %v549_v13 = vld [vmem:[#allocation2 + $0x20] sm:$0xff] }
 0x12b   :  { %12628 = vmatprep.mubr.bf16.mxu0 %v15949_v18  ;;  %17999 = vst [vmem:[#allocation17_spill] sm:$0xff] %v16022_v20  ;;  %vm637_vm9 = vcmp.ne.s16.totalorder %v16022_v20, 0  ;;  %v16032_v43 = vsel %vm711_vm8, %v1039_v28, %v1046_v21  ;;  %v1085_v14 = vshrl.u32 %v541_v53, 16  ;;  %v1092_v28 = vshll.u32 %v542_v50, 16 }
 0x12c   :  { %v1079_v31 = vrot.slane %v1077_v27, 7  ;;  %v16037_v52 = vsel %vm711_vm8, %v1051_v36, %v1058_v37  ;;  %v639_v56 = vsel %vm637_vm9, %v15328_v55, 0  ;;  %v1091_v19 = vrot.slane %v1089_v61, 7 }
 0x12d   :  { %v1839_v0 = vshll.u32 %v639_v56, 16  ;;  %v16049_v21 = vsel %vm711_vm8, %v1063_v60, %v1070_v4  ;;  %v641_v33 = vsel %vm637_vm9, %v549_v13, 0  ;;  %v1837_v27 = vshrl.u32 %v639_v56, 16  ;;  %v553_v56 = vld [vmem:[#allocation2 + $0x50] sm:$0xff] }
 0x12e   :  { %v1082_v8 = vor.u32 %v1080_v46, %v1079_v31  ;;  %v1844_v37 = vshll.u32 %v640_v11, 16  ;;  %v643_v34 = vsel %vm637_vm9, %v551_v17, 0  ;;  %v1087_v29 = vrot.slane %v1085_v14, 7  ;;  %v554_v17 = vld [vmem:[#allocation2 + $0x58] sm:$0x1] }
 0x12f   :  { %v1841_v36 = vrot.slane %v1839_v0, 1  ;;  %v1094_v45 = vor.u32 %v1092_v28, %v1091_v19  ;;  %v1851_v31 = vshll.u32 %v641_v33, 16  ;;  %v642_v46 = vsel %vm638_vm10, %v550_v39, 0 }
 0x130   :  { %v16052_v32 = vsel %vm711_vm8, %v1075_v7, %v1082_v8  ;;  %v1863_v48 = vshll.u32 %v643_v34, 16  ;;  %v1846_v54 = vrot.slane %v1844_v37, 1  ;;  %v644_v55 = vsel %vm638_vm10, %v552_v44, 0  ;;  %v555_v7 = vld [vmem:[#allocation2 + $0x68] sm:$0xff] }
 0x131   :  { %v16062_v50 = vor.u32 %v1841_v36, %v1837_v27  ;;  %v16067_v60 = vsel %vm711_vm8, %v1087_v29, %v1094_v45  ;;  %v1849_v61 = vshrl.u32 %v641_v33, 16  ;;  %v1853_v2 = vrot.slane %v1851_v31, 1  ;;  %v556_v33 = vld [vmem:[#allocation2 + $0x70] sm:$0x1]  ;;  %v557_v29 = vld [vmem:[#allocation2 + $0x80] sm:$0xff] }
 0x132   :  { %12629 = vmatmul.mubr.bf16.gmra.mrb[36].mxu0 %v15962_v35  ;;  %v1856_v4 = vshll.u32 %v642_v46, 16  ;;  %v1861_v8 = vshrl.u32 %v643_v34, 16  ;;  %v1865_v53 = vrot.slane %v1863_v48, 1  ;;  %v1868_v0 = vshll.u32 %v644_v55, 16  ;;  %v559_v48 = vld [vmem:[#allocation2 + $0x98] sm:$0xff] }
 0x133   :  { %12632 = vmatprep.mubr.bf16.mxu0 %v15965_v38  ;;  %v645_v13 = vsel %vm637_vm9, %v553_v56, 0  ;;  %v1847_v11 = vsel %vm1835_vm11, %v16062_v50, %v1846_v54  ;;  %v647_v14 = vsel %vm637_vm9, %v555_v7, 0  ;;  %v1854_v27 = vor.u32 %v1853_v2, %v1849_v61  ;;  %v15184_v7 = vld [vmem:[#allocation6 + $0xc8] sm:$0xff]  }
 0x134   :  { %v1858_v19 = vrot.slane %v1856_v4, 1  ;;  %v1875_v28 = vshll.u32 %v645_v13, 16  ;;  %v1866_v36 = vor.u32 %v1865_v53, %v1861_v8  ;;  %v1870_v37 = vrot.slane %v1868_v0, 1  ;;  %v558_v8 = vld [vmem:[#allocation2 + $0x88] sm:$0x1] }
 0x135   :  { %v646_v39 = vsel %vm638_vm10, %v554_v17, 0  ;;  %v1887_v34 = vshll.u32 %v647_v14, 16  ;;  %v648_v44 = vsel %vm638_vm10, %v556_v33, 0  ;;  %v1873_v45 = vshrl.u32 %v645_v13, 16 }
 0x136   :  { %v1877_v31 = vrot.slane %v1875_v28, 1  ;;  %v1880_v46 = vshll.u32 %v646_v39, 16  ;;  %v16081_v54 = vsel %vm1835_vm11, %v1854_v27, %v1858_v19  ;;  %v16084_v55 = vsel %vm1835_vm11, %v1866_v36, %v1870_v37  ;;  %v561_v27 = vld [vmem:[#allocation2 + $0xb0] sm:$0xff] }
 0x137   :  { %18000 = vst [vmem:[#allocation18_spill] sm:$0xff] %v16084_v55  ;;  %v1885_v56 = vshrl.u32 %v647_v14, 16  ;;  %v1889_v61 = vrot.slane %v1887_v34, 1  ;;  %v1892_v2 = vshll.u32 %v648_v44, 16  ;;  %v649_v4 = vsel %vm637_vm9, %v557_v29, 0  ;;  %v15185_v36 = vld [vmem:[#allocation6 + $0xd0] sm:$0xff]  }
 0x138   :  { %v651_v53 = vsel %vm637_vm9, %v559_v48, 0  ;;  %v1878_v0 = vor.u32 %v1877_v31, %v1873_v45  ;;  %v1882_v13 = vrot.slane %v1880_v46, 1  ;;  %v1899_v17 = vshll.u32 %v649_v4, 16  ;;  %v563_v34 = vld [vmem:[#allocation2 + $0xc8] sm:$0xff] }
 0x139   :  { %v1890_v14 = vor.u32 %v1889_v61, %v1885_v56  ;;  %v1894_v19 = vrot.slane %v1892_v2, 1  ;;  %v650_v28 = vsel %vm638_vm10, %v558_v8, 0  ;;  %v1911_v33 = vshll.u32 %v651_v53, 16  ;;  %v562_v61 = vld [vmem:[#allocation2 + $0xb8] sm:$0x1] }
 0x13a   :  { %12633 = vmatmul.mubr.bf16.gmra.mrb[40].mxu0 %v15978_v58  ;;  %v16098_v39 = vsel %vm1835_vm11, %v1878_v0, %v1882_v13  ;;  %v1901_v44 = vrot.slane %v1899_v17, 1  ;;  %v1904_v29 = vshll.u32 %v650_v28, 16  ;;  %v653_v45 = vsel %vm637_vm9, %v561_v27, 0  ;;  %v15186_v2 = vld [vmem:[#allocation6 + $0xd8] sm:$0xff]   ;;  %v564_v0 = vld [vmem:[#allocation2 + $0xd0] sm:$0x1] }
 0x13b   :  { %12636 = vmatprep.mubr.bf16.mxu0 %v15981_v1  ;;  %18001 = vst [vmem:[#allocation19_spill] sm:$0xff] %v16098_v39  ;;  %v16103_v31 = vsel %vm1835_vm11, %v1890_v14, %v1894_v19  ;;  %v1909_v46 = vshrl.u32 %v651_v53, 16  ;;  %v1913_v48 = vrot.slane %v1911_v33, 1  ;;  %v655_v8 = vsel %vm637_vm9, %v563_v34, 0  ;;  %v565_v19 = vld [vmem:[#allocation2 + $0xe0] sm:$0xff]  ;;  %v567_v27 = vld [vmem:[#allocation2 + $0xf8] sm:$0xff] }
 0x13c   :  { %18002 = vst [vmem:[#allocation20_spill] sm:$0xff] %v16103_v31  ;;  %v1906_v13 = vrot.slane %v1904_v29, 1  ;;  %v1935_v14 = vshll.u32 %v655_v8, 16  ;;  %v15187_v28 = vld [vmem:[#allocation6 + $0xe0] sm:$0xff]   ;;  %v656_v33 = vsel %vm638_vm10, %v564_v0, 0 }
 0x13d   :  { %v1914_v53 = vor.u32 %v1913_v48, %v1909_v46  ;;  %v1940_v48 = vshll.u32 %v656_v33, 16 }
 0x13e   :  { %v1937_v46 = vrot.slane %v1935_v14, 1  ;;  %v569_v14 = vld [vmem:[#allocation2 + $0x110] sm:$0xff] }
 0x142   :  { %12637 = vmatmul.mubr.bf16.gmra.mrb[44].mxu0 %v15992_v15 }
 0x143   :  { %12640 = vmatprep.mubr.bf16.mxu0 %v15997_v42 }
 0x14a   :  { %12641 = vmatmul.mubr.bf16.gmra.mrb[48].mxu0 %v16012_v5 }
 0x14b   :  { %12644 = vmatprep.mubr.bf16.mxu0 %v16015_v25 }
 0x152   :  { %12645 = vmatmul.mubr.bf16.gmra.mrb[52].mxu0 %v16032_v43 }
 0x153   :  { %12648 = vmatprep.mubr.bf16.mxu0 %v16037_v52 }
 0x15a   :  { %12649 = vmatmul.mubr.bf16.gmra.mrb[56].mxu0 %v16049_v21 }
 0x15b   :  { %12652 = vmatprep.mubr.bf16.mxu0 %v16052_v32 }
 0x162   :  { %12653 = vmatmul.mubr.bf16.gmra.mrb[60].mxu0 %v16067_v60 }
 0x163   :  { %12672 = vmatprep.mubr.bf16.mxu0 %v1847_v11  ;;  %v560_v11 = vld [vmem:[#allocation2 + $0xa0] sm:$0x1] }
 0x164   :  { %v652_v37 = vsel %vm638_vm10, %v560_v11, 0  ;;  %v654_v11 = vsel %vm638_vm10, %v562_v61, 0  ;;  %v659_v61 = vsel %vm637_vm9, %v567_v27, 0 }
 0x165   :  { %v1916_v56 = vshll.u32 %v652_v37, 16  ;;  %v1921_v37 = vshrl.u32 %v653_v45, 16 }
 0x167   :  { %v1918_v17 = vrot.slane %v1916_v56, 1  ;;  %v566_v56 = vld [vmem:[#allocation2 + $0xe8] sm:$0x1] }
 0x169   :  { %v16119_v29 = vsel %vm1835_vm11, %v1914_v53, %v1918_v17  ;;  %v1942_v53 = vrot.slane %v1940_v48, 1  ;;  %v15190_v48 = vld [vmem:[#allocation6 + $0xf8] sm:$0xff]  }
 0x16a   :  { %12673 = vmatmul.mubr.bf16.vlgmr.msra.gmra.mrb[0].mxu0 %v16081_v54  ;;  %18004 = vst [vmem:[#allocation22_spill] sm:$0xff] %v16119_v29 }
 0x16b   :  { %12737 = vmatpush3.bf16.msra.mxu0 %v15873_v26  ;;  %12676 = vmatprep.mubr.bf16.mxu0 %v16084_v55  ;;  %v1897_v26 = vshrl.u32 %v649_v4, 16  ;;  %v1923_v4 = vshll.u32 %v653_v45, 16  ;;  %v15188_v45 = vld [vmem:[#allocation6 + $0xe8] sm:$0xff]  }
 0x16c   :  { %12738 = vmatprep.subr.bf16.mxu0 %v15184_v7 }
 0x16d   :  { %v1925_v34 = vrot.slane %v1923_v4, 1  ;;  %v568_v4 = vld [vmem:[#allocation2 + $0x100] sm:$0x1] }
 0x16e   :  { %v660_v17 = vsel %vm638_vm10, %v568_v4, 0 }
 0x16f   :  { %12739 = vmatpush3.bf16.msra.mxu0 %v15184_v7  ;;  %v1902_v7 = vor.u32 %v1901_v44, %v1897_v26  ;;  %v1933_v44 = vshrl.u32 %v655_v8, 16  ;;  %v1926_v0 = vor.u32 %v1925_v34, %v1921_v37  ;;  %v571_v34 = vld [vmem:[#allocation2 + $0x128] sm:$0xff] }
 0x170   :  { %12740 = vmatprep.subr.bf16.mxu0 %v15185_v36  ;;  %v663_v4 = vsel %vm637_vm9, %v571_v34, 0  ;;  %v575_v34 = vld [vmem:[#allocation2 + $0x158] sm:$0xff] }
 0x171   :  { %v16114_v26 = vsel %vm1835_vm11, %v1902_v7, %v1906_v13  ;;  %v1959_v13 = vshll.u32 %v659_v61, 16 }
 0x172   :  { %12677 = vmatmul.mubr.bf16.gmra.mrb[4].mxu0 %v16098_v39  ;;  %v1928_v39 = vshll.u32 %v654_v11, 16  ;;  %18003 = vst [vmem:[#allocation21_spill] sm:$0xff] %v16114_v26  ;;  %v1938_v11 = vor.u32 %v1937_v46, %v1933_v44  ;;  %v570_v46 = vld [vmem:[#allocation2 + $0x118] sm:$0x1] }
 0x173   :  { %12680 = vmatprep.mubr.bf16.mxu0 %v16103_v31  ;;  %12741 = vmatpush3.bf16.msra.mxu0 %v15185_v36  ;;  %v657_v36 = vsel %vm637_vm9, %v565_v19, 0  ;;  %v15189_v19 = vld [vmem:[#allocation6 + $0xf0] sm:$0xff]  }
 0x174   :  { %12742 = vmatprep.subr.bf16.mxu0 %v15186_v2  ;;  %v1930_v8 = vrot.slane %v1928_v39, 1  ;;  %v1947_v7 = vshll.u32 %v657_v36, 16  ;;  %v1945_v39 = vshrl.u32 %v657_v36, 16  ;;  %v16135_v44 = vsel %vm1835_vm11, %v1938_v11, %v1942_v53  ;;  %v16143_v11 = vld [vmem:[#allocation6 + $0x100] sm:$0xff]  }
 0x175   :  { %18006 = vst [vmem:[#allocation24_spill] sm:$0xff] %v16135_v44 }
 0x176   :  { %v16130_v33 = vsel %vm1835_vm11, %v1926_v0, %v1930_v8  ;;  %v1949_v27 = vrot.slane %v1947_v7, 1 }
 0x177   :  { %12743 = vmatpush3.bf16.msra.mxu0 %v15186_v2  ;;  %v658_v2 = vsel %vm638_vm10, %v566_v56, 0  ;;  %18005 = vst [vmem:[#allocation23_spill] sm:$0xff] %v16130_v33  ;;  %v1964_v56 = vshll.u32 %v660_v17, 16  ;;  %v573_v17 = vld [vmem:[#allocation2 + $0x140] sm:$0xff] }
 0x178   :  { %12744 = vmatprep.subr.bf16.mxu0 %v15187_v28  ;;  %v1952_v37 = vshll.u32 %v658_v2, 16  ;;  %v1950_v36 = vor.u32 %v1949_v27, %v1945_v39 }
 0x179   :  { %v1966_v2 = vrot.slane %v1964_v56, 1 }
 0x17a   :  { %12681 = vmatmul.mubr.bf16.gmra.mrb[8].mxu0 %v16114_v26  ;;  %v1961_v26 = vrot.slane %v1959_v13, 1  ;;  %v1954_v8 = vrot.slane %v1952_v37, 1  ;;  %v1983_v13 = vshll.u32 %v663_v4, 16 }
 0x17b   :  { %12684 = vmatprep.mubr.bf16.mxu0 %v16119_v29  ;;  %12745 = vmatpush3.bf16.msra.mxu0 %v15187_v28  ;;  %v1957_v29 = vshrl.u32 %v659_v61, 16  ;;  %v661_v28 = vsel %vm637_vm9, %v569_v14, 0  ;;  %v572_v61 = vld [vmem:[#allocation2 + $0x130] sm:$0x1] }
 0x17c   :  { %12746 = vmatprep.subr.bf16.mxu0 %v15188_v45  ;;  %v1971_v0 = vshll.u32 %v661_v28, 16  ;;  %v664_v53 = vsel %vm638_vm10, %v572_v61, 0  ;;  %v1969_v14 = vshrl.u32 %v661_v28, 16  ;;  %v16148_v37 = vsel %vm1835_vm11, %v1950_v36, %v1954_v8  ;;  %v574_v61 = vld [vmem:[#allocation2 + $0x148] sm:$0x1] }
 0x17d   :  { %v1962_v7 = vor.u32 %v1961_v26, %v1957_v29  ;;  %18007 = vst [vmem:[#allocation25_spill] sm:$0xff] %v16148_v37  ;;  %v1981_v29 = vshrl.u32 %v663_v4, 16  ;;  %v1988_v56 = vshll.u32 %v664_v53, 16  ;;  %v667_v28 = vsel %vm637_vm9, %v575_v34, 0  ;;  %v576_v8 = vld [vmem:[#allocation2 + $0x160] sm:$0x1] }
 0x17e   :  { %v1973_v39 = vrot.slane %v1971_v0, 1  ;;  %v668_v53 = vsel %vm638_vm10, %v576_v8, 0 }
 0x17f   :  { %12747 = vmatpush3.bf16.msra.mxu0 %v15188_v45  ;;  %v662_v45 = vsel %vm638_vm10, %v570_v46, 0  ;;  %v16151_v26 = vsel %vm1835_vm11, %v1962_v7, %v1966_v2  ;;  %v665_v46 = vsel %vm637_vm9, %v573_v17, 0  ;;  %v1990_v7 = vrot.slane %v1988_v56, 1 }
 0x180   :  { %12748 = vmatprep.subr.bf16.mxu0 %v15189_v19  ;;  %v1976_v27 = vshll.u32 %v662_v45, 16  ;;  %18008 = vst [vmem:[#allocation26_spill] sm:$0xff] %v16151_v26  ;;  %v1974_v36 = vor.u32 %v1973_v39, %v1969_v14  ;;  %v666_v2 = vsel %vm638_vm10, %v574_v61, 0  ;;  %v2007_v45 = vshll.u32 %v667_v28, 16 }
 0x181   :  { %v1993_v34 = vshrl.u32 %v665_v46, 16  ;;  %v2000_v39 = vshll.u32 %v666_v2, 16  ;;  %v2012_v61 = vshll.u32 %v668_v53, 16  ;;  %v587_v53 = vld [vmem:[#allocation2 + $0x1e8] sm:$0xff] }
 0x182   :  { %12685 = vmatmul.mubr.bf16.gmra.mrb[12].mxu0 %v16130_v33  ;;  %v1978_v0 = vrot.slane %v1976_v27, 1  ;;  %v2009_v56 = vrot.slane %v2007_v45, 1 }
 0x183   :  { %12688 = vmatprep.mubr.bf16.mxu0 %v16135_v44  ;;  %12749 = vmatpush3.bf16.msra.mxu0 %v15189_v19  ;;  %v1985_v19 = vrot.slane %v1983_v13, 1  ;;  %v577_v13 = vld [vmem:[#allocation2 + $0x170] sm:$0xff]  ;;  %v2014_v2 = vrot.slane %v2012_v61, 1 }
 0x184   :  { %12750 = vmatprep.subr.bf16.mxu0 %v15190_v48  ;;  %v16165_v17 = vsel %vm1835_vm11, %v1974_v36, %v1978_v0  ;;  %v669_v27 = vsel %vm637_vm9, %v577_v13, 0 }
 0x185   :  { %v1986_v4 = vor.u32 %v1985_v19, %v1981_v29  ;;  %18009 = vst [vmem:[#allocation27_spill] sm:$0xff] %v16165_v17  ;;  %v2005_v19 = vshrl.u32 %v667_v28, 16  ;;  %v2019_v8 = vshll.u32 %v669_v27, 16  ;;  %v585_v28 = vld [vmem:[#allocation2 + $0x1d0] sm:$0xff] }
 0x187   :  { %12751 = vmatpush3.bf16.msra.mxu0 %v15190_v48  ;;  %v1995_v48 = vshll.u32 %v665_v46, 16  ;;  %v16170_v29 = vsel %vm1835_vm11, %v1986_v4, %v1990_v7  ;;  %v2002_v46 = vrot.slane %v2000_v39, 1  ;;  %v2017_v7 = vshrl.u32 %v669_v27, 16 }
 0x188   :  { %12816 = vmatprep.subr.bf16.mxu0 %v16143_v11  ;;  %18010 = vst [vmem:[#allocation28_spill] sm:$0xff] %v16170_v29  ;;  %v2021_v45 = vrot.slane %v2019_v8, 1  ;;  %v679_v39 = vsel %vm637_vm9, %v587_v53, 0 }
 0x189   :  { %v1997_v14 = vrot.slane %v1995_v48, 1  ;;  %v2010_v48 = vor.u32 %v2009_v56, %v2005_v19  ;;  %v588_v19 = vld [vmem:[#allocation2 + $0x1f0] sm:$0x1] }
 0x18a   :  { %12689 = vmatmul.mubr.bf16.gmra.mrb[16].mxu0 %v16148_v37  ;;  %v584_v37 = vld [vmem:[#allocation2 + $0x1c0] sm:$0x1] }
 0x18b   :  { %12692 = vmatprep.mubr.bf16.mxu0 %v16151_v26  ;;  %v578_v26 = vld [vmem:[#allocation2 + $0x178] sm:$0x1]  ;;  %v1998_v36 = vor.u32 %v1997_v14, %v1993_v34  ;;  %v676_v4 = vsel %vm638_vm10, %v584_v37, 0  ;;  %v16182_v34 = vsel %vm1835_vm11, %v2010_v48, %v2014_v2  ;;  %v2022_v37 = vor.u32 %v2021_v45, %v2017_v7 }
 0x18c   :  { %v670_v0 = vsel %vm638_vm10, %v578_v26, 0  ;;  %v2036_v44 = vshll.u32 %v676_v4, 16  ;;  %18012 = vst [vmem:[#allocation30_spill] sm:$0xff] %v16182_v34  ;;  %v677_v26 = vsel %vm637_vm9, %v585_v28, 0  ;;  %v586_v14 = vld [vmem:[#allocation2 + $0x1d8] sm:$0x1] }
 0x18d   :  { %v2024_v13 = vshll.u32 %v670_v0, 16  ;;  %v2043_v61 = vshll.u32 %v677_v26, 16  ;;  %v678_v8 = vsel %vm638_vm10, %v586_v14, 0  ;;  %v680_v0 = vsel %vm638_vm10, %v588_v19, 0  ;;  %v591_v48 = vld [vmem:[#allocation2 + $0x218] sm:$0xff] }
 0x18e   :  { %v2038_v56 = vrot.slane %v2036_v44, 1  ;;  %v2041_v4 = vshrl.u32 %v677_v26, 16  ;;  %v2048_v45 = vshll.u32 %v678_v8, 16  ;;  %v2060_v14 = vshll.u32 %v680_v0, 16 }
 0x18f   :  { %v2026_v27 = vrot.slane %v2024_v13, 1  ;;  %v2045_v7 = vrot.slane %v2043_v61, 1  ;;  %v2053_v13 = vshrl.u32 %v679_v39, 16  ;;  %v683_v19 = vsel %vm637_vm9, %v591_v48, 0 }
 0x190   :  { %v2039_v28 = vsel %vm1835_vm11, %v16062_v50, %v2038_v56  ;;  %v2079_v56 = vshll.u32 %v683_v19, 16  ;;  %v2062_v8 = vrot.slane %v2060_v14, 1  ;;  %v596_v14 = vld [vmem:[#allocation2 + $0x250] sm:$0x1] }
 0x191   :  { %v16195_v2 = vsel %vm1835_vm11, %v2022_v37, %v2026_v27  ;;  %v2046_v26 = vor.u32 %v2045_v7, %v2041_v4  ;;  %v2050_v27 = vrot.slane %v2048_v45, 1 }
 0x192   :  { %12693 = vmatmul.mubr.bf16.gmra.mrb[20].mxu0 %v16165_v17  ;;  %v16179_v17 = vsel %vm1835_vm11, %v1998_v36, %v2002_v46  ;;  %v2055_v36 = vshll.u32 %v679_v39, 16  ;;  %v589_v46 = vld [vmem:[#allocation2 + $0x200] sm:$0xff]  ;;  %18013 = vst [vmem:[#allocation31_spill] sm:$0xff] %v16195_v2  ;;  %v2081_v4 = vrot.slane %v2079_v56, 1 }
 0x193   :  { %12696 = vmatprep.mubr.bf16.mxu0 %v16170_v29  ;;  %18011 = vst [vmem:[#allocation29_spill] sm:$0xff] %v16179_v17  ;;  %v681_v44 = vsel %vm637_vm9, %v589_v46, 0  ;;  %v595_v29 = vld [vmem:[#allocation2 + $0x248] sm:$0xff]  ;;  %v597_v56 = vld [vmem:[#allocation2 + $0x260] sm:$0xff] }
 0x194   :  { %v2057_v53 = vrot.slane %v2055_v36, 1  ;;  %v2067_v37 = vshll.u32 %v681_v44, 16  ;;  %v593_v36 = vld [vmem:[#allocation2 + $0x230] sm:$0xff]  ;;  %v2065_v46 = vshrl.u32 %v681_v44, 16 }
 0x196   :  { %v2058_v61 = vor.u32 %v2057_v53, %v2053_v13  ;;  %v2069_v0 = vrot.slane %v2067_v37, 1  ;;  %v594_v13 = vld [vmem:[#allocation2 + $0x238] sm:$0x1] }
 0x198   :  { %v16212_v45 = vsel %vm1835_vm11, %v2058_v61, %v2062_v8  ;;  %v2070_v44 = vor.u32 %v2069_v0, %v2065_v46  ;;  %v688_v61 = vsel %vm638_vm10, %v596_v14, 0  ;;  %v599_v8 = vld [vmem:[#allocation2 + $0x278] sm:$0xff] }
 0x199   :  { %18015 = vst [vmem:[#allocation33_spill] sm:$0xff] %v16212_v45  ;;  %v691_v14 = vsel %vm637_vm9, %v599_v8, 0 }
 0x19a   :  { %12697 = vmatmul.mubr.bf16.gmra.mrb[24].mxu0 %v16179_v17  ;;  %v592_v17 = vld [vmem:[#allocation2 + $0x220] sm:$0x1] }
 0x19b   :  { %12700 = vmatprep.mubr.bf16.mxu0 %v16182_v34  ;;  %v590_v34 = vld [vmem:[#allocation2 + $0x208] sm:$0x1]  ;;  %v684_v39 = vsel %vm638_vm10, %v592_v17, 0  ;;  %v687_v17 = vsel %vm637_vm9, %v595_v29, 0 }
 0x19c   :  { %v682_v50 = vsel %vm638_vm10, %v590_v34, 0  ;;  %v2084_v7 = vshll.u32 %v684_v39, 16  ;;  %v685_v34 = vsel %vm637_vm9, %v593_v36, 0 }
 0x19d   :  { %v2072_v48 = vshll.u32 %v682_v50, 16  ;;  %v2103_v50 = vshll.u32 %v687_v17, 16  ;;  %v2089_v39 = vshrl.u32 %v685_v34, 16 }
 0x19e   :  { %v2086_v37 = vrot.slane %v2084_v7, 1  ;;  %v2108_v7 = vshll.u32 %v688_v61, 16 }
 0x19f   :  { %v2074_v53 = vrot.slane %v2072_v48, 1  ;;  %v689_v48 = vsel %vm637_vm9, %v597_v56, 0 }
 0x1a0   :  { %v2113_v56 = vshrl.u32 %v689_v48, 16 }
 0x1a1   :  { %v16225_v29 = vsel %vm1835_vm11, %v2070_v44, %v2074_v53  ;;  %v2115_v44 = vshll.u32 %v689_v48, 16 }
 0x1a2   :  { %12701 = vmatmul.mubr.bf16.gmra.mrb[28].mxu0 %v16195_v2  ;;  %v16209_v2 = vsel %vm1835_vm11, %v2046_v26, %v2050_v27  ;;  %v2091_v26 = vshll.u32 %v685_v34, 16  ;;  %v686_v27 = vsel %vm638_vm10, %v594_v13, 0  ;;  %18016 = vst [vmem:[#allocation34_spill] sm:$0xff] %v16225_v29  ;;  %v598_v13 = vld [vmem:[#allocation2 + $0x268] sm:$0x1] }
 0x1a3   :  { %12704 = vmatprep.mubr.bf16.mxu0 %v2039_v28  ;;  %18014 = vst [vmem:[#allocation32_spill] sm:$0xff] %v16209_v2  ;;  %v2077_v28 = vshrl.u32 %v683_v19, 16  ;;  %v2096_v0 = vshll.u32 %v686_v27, 16  ;;  %v2117_v61 = vrot.slane %v2115_v44, 1 }
 0x1a4   :  { %v2093_v46 = vrot.slane %v2091_v26, 1 }
 0x1a5   :  { %v2082_v19 = vor.u32 %v2081_v4, %v2077_v28  ;;  %v2101_v28 = vshrl.u32 %v687_v17, 16  ;;  %v2105_v4 = vrot.slane %v2103_v50, 1  ;;  %v2098_v53 = vrot.slane %v2096_v0, 1  ;;  %v601_v50 = vld [vmem:[#allocation2 + $0x290] sm:$0xff] }
 0x1a6   :  { %v2094_v34 = vor.u32 %v2093_v46, %v2089_v39  ;;  %v2110_v17 = vrot.slane %v2108_v7, 1  ;;  %v2118_v48 = vor.u32 %v2117_v61, %v2113_v56 }
 0x1a7   :  { %v16228_v36 = vsel %vm1835_vm11, %v2082_v19, %v2086_v37  ;;  %v690_v19 = vsel %vm638_vm10, %v598_v13, 0  ;;  %v2127_v37 = vshll.u32 %v691_v14, 16  ;;  %v2106_v26 = vor.u32 %v2105_v4, %v2101_v28  ;;  %v602_v4 = vld [vmem:[#allocation2 + $0x298] sm:$0x1]  ;;  %v604_v13 = vld [vmem:[#allocation2 + $0x2b0] sm:$0x1] }
 0x1a8   :  { %18017 = vst [vmem:[#allocation35_spill] sm:$0xff] %v16228_v36  ;;  %v2120_v8 = vshll.u32 %v690_v19, 16  ;;  %v693_v28 = vsel %vm637_vm9, %v601_v50, 0 }
 0x1a9   :  { %v2129_v39 = vrot.slane %v2127_v37, 1  ;;  %v16244_v0 = vsel %vm1835_vm11, %v2106_v26, %v2110_v17  ;;  %v605_v37 = vld [vmem:[#allocation2 + $0x2c0] sm:$0xff]  ;;  %v696_v26 = vsel %vm638_vm10, %v604_v13, 0  ;;  %v607_v17 = vld [vmem:[#allocation2 + $0x2d8] sm:$0xff] }
 0x1aa   :  { %12705 = vmatmul.mubr.bf16.gmra.mrb[32].mxu0 %v16209_v2  ;;  %v603_v2 = vld [vmem:[#allocation2 + $0x2a8] sm:$0xff]  ;;  %18019 = vst [vmem:[#allocation37_spill] sm:$0xff] %v16244_v0  ;;  %v2122_v7 = vrot.slane %v2120_v8, 1  ;;  %v697_v61 = vsel %vm637_vm9, %v605_v37, 0  ;;  %v699_v13 = vsel %vm637_vm9, %v607_v17, 0 }
 0x1ab   :  { %12708 = vmatprep.mubr.bf16.mxu0 %v16212_v45  ;;  %v600_v45 = vld [vmem:[#allocation2 + $0x280] sm:$0x1]  ;;  %v2161_v37 = vshrl.u32 %v697_v61, 16 }
 0x1ac   :  { %v692_v27 = vsel %vm638_vm10, %v600_v45, 0  ;;  %v695_v45 = vsel %vm637_vm9, %v603_v2, 0  ;;  %v16257_v2 = vsel %vm1835_vm11, %v2118_v48, %v2122_v7  ;;  %v2163_v48 = vshll.u32 %v697_v61, 16 }
 0x1ad   :  { %v2132_v46 = vshll.u32 %v692_v27, 16  ;;  %v2151_v19 = vshll.u32 %v695_v45, 16  ;;  %18020 = vst [vmem:[#allocation38_spill] sm:$0xff] %v16257_v2  ;;  %v2137_v27 = vshrl.u32 %v693_v28, 16  ;;  %v2149_v8 = vshrl.u32 %v695_v45, 16 }
 0x1af   :  { %v2134_v44 = vrot.slane %v2132_v46, 1  ;;  %v2156_v46 = vshll.u32 %v696_v26, 16  ;;  %v2165_v26 = vrot.slane %v2163_v48, 1 }
 0x1b1   :  { %v2158_v45 = vrot.slane %v2156_v46, 1  ;;  %v2166_v61 = vor.u32 %v2165_v26, %v2161_v37 }
 0x1b2   :  { %12709 = vmatmul.mubr.bf16.gmra.mrb[36].mxu0 %v16225_v29  ;;  %v16241_v29 = vsel %vm1835_vm11, %v2094_v34, %v2098_v53  ;;  %v2139_v34 = vshll.u32 %v693_v28, 16  ;;  %v694_v53 = vsel %vm638_vm10, %v602_v4, 0  ;;  %v606_v4 = vld [vmem:[#allocation2 + $0x2c8] sm:$0x1] }
 0x1b3   :  { %12712 = vmatprep.mubr.bf16.mxu0 %v16228_v36  ;;  %18018 = vst [vmem:[#allocation36_spill] sm:$0xff] %v16241_v29  ;;  %v2125_v36 = vshrl.u32 %v691_v14, 16 }
 0x1b4   :  { %v2141_v56 = vrot.slane %v2139_v34, 1 }
 0x1b5   :  { %v2130_v14 = vor.u32 %v2129_v39, %v2125_v36  ;;  %v2144_v36 = vshll.u32 %v694_v53, 16  ;;  %v2153_v39 = vrot.slane %v2151_v19, 1  ;;  %v609_v19 = vld [vmem:[#allocation2 + $0x2f0] sm:$0xff] }
 0x1b6   :  { %v2142_v28 = vor.u32 %v2141_v56, %v2137_v27 }
 0x1b7   :  { %v16260_v50 = vsel %vm1835_vm11, %v2130_v14, %v2134_v44  ;;  %v2146_v7 = vrot.slane %v2144_v36, 1  ;;  %v698_v14 = vsel %vm638_vm10, %v606_v4, 0  ;;  %v2175_v44 = vshll.u32 %v699_v13, 16  ;;  %v612_v4 = vld [vmem:[#allocation2 + $0x310] sm:$0x1] }
 0x1b8   :  { %18021 = vst [vmem:[#allocation39_spill] sm:$0xff] %v16260_v50  ;;  %v2154_v34 = vor.u32 %v2153_v39, %v2149_v8  ;;  %v2168_v17 = vshll.u32 %v698_v14, 16  ;;  %v701_v8 = vsel %vm637_vm9, %v609_v19, 0  ;;  %v610_v39 = vld [vmem:[#allocation2 + $0x2f8] sm:$0x1] }
 0x1b9   :  { %v2177_v27 = vrot.slane %v2175_v44, 1  ;;  %v704_v44 = vsel %vm638_vm10, %v612_v4, 0 }
 0x1ba   :  { %12713 = vmatmul.mubr.bf16.gmra.mrb[40].mxu0 %v16241_v29  ;;  %v611_v29 = vld [vmem:[#allocation2 + $0x308] sm:$0xff]  ;;  %v16276_v36 = vsel %vm1835_vm11, %v2154_v34, %v2158_v45  ;;  %v2170_v46 = vrot.slane %v2168_v17, 1  ;;  %v613_v34 = vld [vmem:[#allocation2 + $0x320] sm:$0xff]  ;;  %v2204_v17 = vshll.u32 %v704_v44, 16 }
 0x1bb   :  { %12716 = vmatprep.mubr.bf16.mxu0 %v16244_v0  ;;  %v608_v0 = vld [vmem:[#allocation2 + $0x2e0] sm:$0x1]  ;;  %18023 = vst [vmem:[#allocation41_spill] sm:$0xff] %v16276_v36 }
 0x1bc   :  { %v700_v53 = vsel %vm638_vm10, %v608_v0, 0  ;;  %v703_v0 = vsel %vm637_vm9, %v611_v29, 0  ;;  %v16289_v29 = vsel %vm1835_vm11, %v2166_v61, %v2170_v46 }
 0x1bd   :  { %v2180_v56 = vshll.u32 %v700_v53, 16  ;;  %v2199_v14 = vshll.u32 %v703_v0, 16  ;;  %18024 = vst [vmem:[#allocation42_spill] sm:$0xff] %v16289_v29  ;;  %v2185_v53 = vshrl.u32 %v701_v8, 16 }
 0x1bf   :  { %v2182_v48 = vrot.slane %v2180_v56, 1  ;;  %v2201_v26 = vrot.slane %v2199_v14, 1  ;;  %v614_v56 = vld [vmem:[#allocation2 + $0x328] sm:$0x1] }
 0x1c2   :  { %12717 = vmatmul.mubr.bf16.gmra.mrb[44].mxu0 %v16257_v2  ;;  %v16273_v2 = vsel %vm1835_vm11, %v2142_v28, %v2146_v7  ;;  %v2187_v28 = vshll.u32 %v701_v8, 16  ;;  %v702_v7 = vsel %vm638_vm10, %v610_v39, 0  ;;  %v706_v8 = vsel %vm638_vm10, %v614_v56, 0  ;;  %v16324_v56 = vld [vmem:[#allocation3 + $0x78] sm:$0xff]  }
 0x1c3   :  { %12720 = vmatprep.mubr.bf16.mxu0 %v16260_v50  ;;  %18022 = vst [vmem:[#allocation40_spill] sm:$0xff] %v16273_v2  ;;  %v2173_v50 = vshrl.u32 %v699_v13, 16  ;;  %v2192_v37 = vshll.u32 %v702_v7, 16  ;;  %v2216_v7 = vshll.u32 %v706_v8, 16  ;;  %18026 = vst [vmem:[#allocation44_spill] sm:$0xff] %v16324_v56 }
 0x1c4   :  { %v2189_v19 = vrot.slane %v2187_v28, 1 }
 0x1c5   :  { %v2178_v13 = vor.u32 %v2177_v27, %v2173_v50  ;;  %v2197_v50 = vshrl.u32 %v703_v0, 16  ;;  %v705_v27 = vsel %vm637_vm9, %v613_v34, 0  ;;  %v2194_v61 = vrot.slane %v2192_v37, 1  ;;  %v15193_v37 = vld [vmem:[#allocation6 + $0x110] sm:$0xff]  }
 0x1c6   :  { %v2190_v39 = vor.u32 %v2189_v19, %v2185_v53  ;;  %v2211_v46 = vshll.u32 %v705_v27, 16  ;;  %v2218_v34 = vrot.slane %v2216_v7, 1  ;;  %v15192_v19 = vld [vmem:[#allocation6 + $0x108] sm:$0xff]  }
 0x1c7   :  { %v16292_v45 = vsel %vm1835_vm11, %v2178_v13, %v2182_v48  ;;  %v2202_v4 = vor.u32 %v2201_v26, %v2197_v50  ;;  %v2206_v13 = vrot.slane %v2204_v17, 1  ;;  %v2209_v48 = vshrl.u32 %v705_v27, 16  ;;  %v15194_v50 = vld [vmem:[#allocation6 + $0x118] sm:$0xff]   ;;  %v15196_v26 = vld [vmem:[#allocation6 + $0x120] sm:$0xff]  }
 0x1c8   :  { %v16301_v0 = vsel %vm1835_vm11, %v2190_v39, %v2194_v61  ;;  %v2213_v28 = vrot.slane %v2211_v46, 1  ;;  %v15199_v17 = vld [vmem:[#allocation6 + $0x138] sm:$0xff]   ;;  %v15201_v27 = vld [vmem:[#allocation6 + $0x140] sm:$0xff]   ;;  %v508_v39 = vsel %vm474_vm6, %v16324_v56, 0 }
 0x1c9   :  { %18025 = vst [vmem:[#allocation43_spill] sm:$0xff] %v16301_v0  ;;  %v16304_v14 = vsel %vm1835_vm11, %v2202_v4, %v2206_v13  ;;  %v435_v61 = vld [vmem:[#allocation2 + $0x180] sm:$0x80]  ;;  %v2675_v46 = vshrl.u32 %v508_v39, 16 }
 0x1ca   :  { %12721 = vmatmul.mubr.bf16.gmra.mrb[48].mxu0 %v16273_v2  ;;  %v2214_v44 = vor.u32 %v2213_v28, %v2209_v48  ;;  %v507_v4 = vsel %vm473_vm7, %v435_v61, 0  ;;  %v2678_v48 = vshll.u32 %v508_v39, 16 }
 0x1cb   :  { %12724 = vmatprep.mubr.bf16.mxu0 %v16276_v36  ;;  %v2671_v13 = vshrl.u32 %v507_v4, 16  ;;  %v2677_v8 = vrot.slane %v2675_v46, 7  ;;  %v16365_v46 = vld [vmem:[#allocation2 + $0x20] sm:$0xff]  ;;  %v15202_v4 = vld [vmem:[#allocation6 + $0x148] sm:$0xff]  }
 0x1cc   :  { %v16309_v53 = vsel %vm1835_vm11, %v2214_v44, %v2218_v34  ;;  %18027 = vst [vmem:[#allocation45_spill] sm:$0xff] %v16365_v46 }
 0x1cd   :  { %v2673_v28 = vrot.slane %v2671_v13, 7  ;;  %v2680_v7 = vor.u32 %v2678_v48, %v2677_v8  ;;  %v16368_v13 = vld [vmem:[#allocation2 + $0x38] sm:$0xff]  ;;  %v16371_v8 = vld [vmem:[#allocation2 + $0x50] sm:$0xff] }
 0x1ce   :  { %v15203_v48 = vld [vmem:[#allocation6 + $0x150] sm:$0xff]  }
 0x1cf   :  { %v16336_v44 = vsel %vm711_vm8, %v2673_v28, %v2680_v7  ;;  %v15204_v28 = vld [vmem:[#allocation6 + $0x158] sm:$0xff]   ;;  %v16374_v7 = vld [vmem:[#allocation2 + $0x68] sm:$0xff] }
 0x1d2   :  { %12725 = vmatmul.mubr.bf16.gmra.mrb[52].mxu0 %v16289_v29 }
 0x1d3   :  { %12728 = vmatprep.mubr.bf16.mxu0 %v16292_v45 }
 0x1da   :  { %12729 = vmatmul.mubr.bf16.gmra.mrb[56].mxu0 %v16301_v0 }
 0x1db   :  { %12732 = vmatprep.mubr.bf16.mxu0 %v16304_v14 }
 0x1e2   :  { %12733 = vmatmul.mubr.bf16.gmra.mrb[60].mxu0 %v16309_v53 }
 0x1e3   :  { %12752 = vmatprep.mubr.bf16.mxu0 %v15804_v49  ;;  %v15197_v49 = vld [vmem:[#allocation6 + $0x128] sm:$0xff]  }
 0x1ea   :  { %12753 = vmatmul.mubr.bf16.vlgmr.msra.gmra.mrb[0].mxu0 %v15809_v51 }
 0x1eb   :  { %12817 = vmatpush3.bf16.msra.mxu0 %v16143_v11  ;;  %12756 = vmatprep.mubr.bf16.mxu0 %v15825_v9  ;;  %v15198_v11 = vld [vmem:[#allocation6 + $0x130] sm:$0xff]  }
 0x1ec   :  { %12818 = vmatprep.subr.bf16.mxu0 %v15192_v19 }
 0x1ef   :  { %12819 = vmatpush3.bf16.msra.mxu0 %v15192_v19  ;;  %v453_v19 = vld [vmem:[#allocation2 + $0x330] sm:$0x80] }
 0x1f0   :  { %12820 = vmatprep.subr.bf16.mxu0 %v15193_v37 }
 0x1f2   :  { %12757 = vmatmul.mubr.bf16.gmra.mrb[4].mxu0 %v15831_v12 }
 0x1f3   :  { %12760 = vmatprep.mubr.bf16.mxu0 %v15843_v41  ;;  %12821 = vmatpush3.bf16.msra.mxu0 %v15193_v37 }
 0x1f4   :  { %12822 = vmatprep.subr.bf16.mxu0 %v15194_v50 }
 0x1f7   :  { %12823 = vmatpush3.bf16.msra.mxu0 %v15194_v50  ;;  %v543_v50 = vsel %vm473_vm7, %v453_v19, 0  ;;  %v15206_v19 = vld [vmem:[#allocation6 + $0x168] sm:$0xff]  }
 0x1f8   :  { %12824 = vmatprep.subr.bf16.mxu0 %v15196_v26 }
 0x1fa   :  { %12761 = vmatmul.mubr.bf16.gmra.mrb[8].mxu0 %v15846_v22 }
 0x1fb   :  { %12764 = vmatprep.mubr.bf16.mxu0 %v15859_v62  ;;  %12825 = vmatpush3.bf16.msra.mxu0 %v15196_v26  ;;  %v2683_v26 = vshrl.u32 %v543_v50, 16  ;;  %v16383_v50 = vld [vmem:[#allocation2 + $0xb0] sm:$0xff] }
 0x1fc   :  { %12826 = vmatprep.subr.bf16.mxu0 %v15197_v49 }
 0x1ff   :  { %12827 = vmatpush3.bf16.msra.mxu0 %v15197_v49 }
 0x200   :  { %12828 = vmatprep.subr.bf16.mxu0 %v15198_v11 }
 0x202   :  { %12765 = vmatmul.mubr.bf16.gmra.mrb[12].mxu0 %v15864_v3 }
 0x203   :  { %12768 = vmatprep.mubr.bf16.mxu0 %v15879_v23  ;;  %12829 = vmatpush3.bf16.msra.mxu0 %v15198_v11 }
 0x204   :  { %12830 = vmatprep.subr.bf16.mxu0 %v15199_v17 }
 0x207   :  { %12831 = vmatpush3.bf16.msra.mxu0 %v15199_v17  ;;  %v2685_v17 = vrot.slane %v2683_v26, 7  ;;  %v15207_v26 = vld [vmem:[#allocation6 + $0x170] sm:$0xff]  }
 0x208   :  { %12896 = vmatprep.subr.bf16.mxu0 %v15201_v27 }
 0x20a   :  { %12769 = vmatmul.mubr.bf16.gmra.mrb[16].mxu0 %v15882_v30 }
 0x20b   :  { %12772 = vmatprep.mubr.bf16.mxu0 %v15902_v47 }
 0x212   :  { %12773 = vmatmul.mubr.bf16.gmra.mrb[20].mxu0 %v15905_v16 }
 0x213   :  { %12776 = vmatprep.mubr.bf16.mxu0 %v15915_v6 }
 0x21a   :  { %12777 = vmatmul.mubr.bf16.gmra.mrb[24].mxu0 %v15920_v10 }
 0x21b   :  { %12780 = vmatprep.mubr.bf16.mxu0 %v15932_v40 }
 0x222   :  { %12781 = vmatmul.mubr.bf16.gmra.mrb[28].mxu0 %v16336_v44 }
 0x223   :  { %12784 = vmatprep.mubr.bf16.mxu0 %v15946_v63  ;;  %v16350_v63 = vld [vmem:[#allocation3 + $0xf8] sm:$0xff]  }
 0x224   :  { %v544_v34 = vsel %vm474_vm6, %v16350_v63, 0 }
 0x225   :  { %v2687_v37 = vshrl.u32 %v544_v34, 16  ;;  %v2690_v11 = vshll.u32 %v544_v34, 16  ;;  %v16377_v34 = vld [vmem:[#allocation2 + $0x80] sm:$0xff] }
 0x227   :  { %v2689_v49 = vrot.slane %v2687_v37, 7  ;;  %v16380_v37 = vld [vmem:[#allocation2 + $0x98] sm:$0xff] }
 0x229   :  { %v2692_v39 = vor.u32 %v2690_v11, %v2689_v49  ;;  %v15208_v49 = vld [vmem:[#allocation6 + $0x178] sm:$0xff]   ;;  %v16386_v11 = vld [vmem:[#allocation2 + $0xc8] sm:$0xff] }
 0x22a   :  { %12785 = vmatmul.mubr.bf16.gmra.mrb[32].mxu0 %v15949_v18  ;;  %18028 = vst [vmem:[#allocation46_spill] sm:$0xff] %v16386_v11 }
 0x22b   :  { %12788 = vmatprep.mubr.bf16.mxu0 %v15962_v35  ;;  %v16362_v61 = vsel %vm711_vm8, %v2685_v17, %v2692_v39  ;;  %v16389_v17 = vld [vmem:[#allocation2 + $0xe0] sm:$0xff] }
 0x22c   :  { %18029 = vst [vmem:[#allocation47_spill] sm:$0xff] %v16389_v17  ;;  %v15209_v39 = vld [vmem:[#allocation6 + $0x180] sm:$0xff]  }
 0x232   :  { %12789 = vmatmul.mubr.bf16.gmra.mrb[36].mxu0 %v15965_v38 }
 0x233   :  { %12792 = vmatprep.mubr.bf16.mxu0 %v15978_v58 }
 0x23a   :  { %12793 = vmatmul.mubr.bf16.gmra.mrb[40].mxu0 %v15981_v1 }
 0x23b   :  { %12796 = vmatprep.mubr.bf16.mxu0 %v15992_v15 }
 0x242   :  { %12797 = vmatmul.mubr.bf16.gmra.mrb[44].mxu0 %v15997_v42 }
 0x243   :  { %12800 = vmatprep.mubr.bf16.mxu0 %v16012_v5 }
 0x24a   :  { %12801 = vmatmul.mubr.bf16.gmra.mrb[48].mxu0 %v16015_v25 }
 0x24b   :  { %12804 = vmatprep.mubr.bf16.mxu0 %v16032_v43 }
 0x252   :  { %12805 = vmatmul.mubr.bf16.gmra.mrb[52].mxu0 %v16037_v52 }
 0x253   :  { %12808 = vmatprep.mubr.bf16.mxu0 %v16049_v21 }
 0x25a   :  { %12809 = vmatmul.mubr.bf16.gmra.mrb[56].mxu0 %v16052_v32 }
 0x25b   :  { %12812 = vmatprep.mubr.bf16.mxu0 %v16067_v60 }
 0x262   :  { %12813 = vmatmul.mubr.bf16.gmra.mrb[60].mxu0 %v16362_v61 }
 0x263   :  { %12832 = vmatprep.mubr.bf16.mxu0 %v16365_v46  ;;  %v16414_v46 = vld [vmem:[#allocation2 + $0x1e8] sm:$0xff] }
 0x264   :  { %18037 = vst [vmem:[#allocation55_spill] sm:$0xff] %v16414_v46 }
 0x26a   :  { %12833 = vmatmul.mubr.bf16.vlgmr.msra.gmra.mrb[0].mxu0 %v16368_v13 }
 0x26b   :  { %12897 = vmatpush3.bf16.msra.mxu0 %v15201_v27  ;;  %12836 = vmatprep.mubr.bf16.mxu0 %v16371_v8  ;;  %v15205_v27 = vld [vmem:[#allocation6 + $0x160] sm:$0xff]  }
 0x26c   :  { %12898 = vmatprep.subr.bf16.mxu0 %v15202_v4 }
 0x26f   :  { %12899 = vmatpush3.bf16.msra.mxu0 %v15202_v4  ;;  %v16392_v4 = vld [vmem:[#allocation2 + $0xf8] sm:$0xff] }
 0x270   :  { %12900 = vmatprep.subr.bf16.mxu0 %v15203_v48  ;;  %18030 = vst [vmem:[#allocation48_spill] sm:$0xff] %v16392_v4 }
 0x272   :  { %12837 = vmatmul.mubr.bf16.gmra.mrb[4].mxu0 %v16374_v7 }
 0x273   :  { %12840 = vmatprep.mubr.bf16.mxu0 %v16377_v34  ;;  %12901 = vmatpush3.bf16.msra.mxu0 %v15203_v48  ;;  %v16395_v48 = vld [vmem:[#allocation2 + $0x110] sm:$0xff] }
 0x274   :  { %12902 = vmatprep.subr.bf16.mxu0 %v15204_v28  ;;  %18031 = vst [vmem:[#allocation49_spill] sm:$0xff] %v16395_v48 }
 0x277   :  { %12903 = vmatpush3.bf16.msra.mxu0 %v15204_v28  ;;  %v16398_v28 = vld [vmem:[#allocation2 + $0x128] sm:$0xff] }
 0x278   :  { %12904 = vmatprep.subr.bf16.mxu0 %v15205_v27  ;;  %18032 = vst [vmem:[#allocation50_spill] sm:$0xff] %v16398_v28 }
 0x27a   :  { %12841 = vmatmul.mubr.bf16.gmra.mrb[8].mxu0 %v16380_v37 }
 0x27b   :  { %12844 = vmatprep.mubr.bf16.mxu0 %v16383_v50  ;;  %12905 = vmatpush3.bf16.msra.mxu0 %v15205_v27  ;;  %v16401_v27 = vld [vmem:[#allocation2 + $0x140] sm:$0xff] }
 0x27c   :  { %12906 = vmatprep.subr.bf16.mxu0 %v15206_v19  ;;  %18033 = vst [vmem:[#allocation51_spill] sm:$0xff] %v16401_v27 }
 0x27f   :  { %12907 = vmatpush3.bf16.msra.mxu0 %v15206_v19  ;;  %v16404_v19 = vld [vmem:[#allocation2 + $0x158] sm:$0xff] }
 0x280   :  { %12908 = vmatprep.subr.bf16.mxu0 %v15207_v26  ;;  %18034 = vst [vmem:[#allocation52_spill] sm:$0xff] %v16404_v19 }
 0x282   :  { %12845 = vmatmul.mubr.bf16.gmra.mrb[12].mxu0 %v16386_v11  ;;  %v18064_v11 = vld [vmem:[#allocation34_spill] sm:$0xff] }
 0x283   :  { %12848 = vmatprep.mubr.bf16.mxu0 %v16389_v17  ;;  %12909 = vmatpush3.bf16.msra.mxu0 %v15207_v26  ;;  %v16407_v26 = vld [vmem:[#allocation2 + $0x170] sm:$0xff] }
 0x284   :  { %12910 = vmatprep.subr.bf16.mxu0 %v15208_v49  ;;  %18035 = vst [vmem:[#allocation53_spill] sm:$0xff] %v16407_v26 }
 0x287   :  { %12911 = vmatpush3.bf16.msra.mxu0 %v15208_v49  ;;  %v16411_v49 = vld [vmem:[#allocation2 + $0x1d0] sm:$0xff] }
 0x288   :  { %12976 = vmatprep.subr.bf16.mxu0 %v15209_v39  ;;  %18036 = vst [vmem:[#allocation54_spill] sm:$0xff] %v16411_v49 }
 0x28a   :  { %12849 = vmatmul.mubr.bf16.gmra.mrb[16].mxu0 %v16392_v4  ;;  %v18060_v4 = vld [vmem:[#allocation30_spill] sm:$0xff] }
 0x28b   :  { %12852 = vmatprep.mubr.bf16.mxu0 %v16395_v48  ;;  %v18053_v48 = vld [vmem:[#allocation22_spill] sm:$0xff] }
 0x292   :  { %12853 = vmatmul.mubr.bf16.gmra.mrb[20].mxu0 %v16398_v28  ;;  %v16417_v28 = vld [vmem:[#allocation2 + $0x200] sm:$0xff] }
 0x293   :  { %12856 = vmatprep.mubr.bf16.mxu0 %v16401_v27  ;;  %18038 = vst [vmem:[#allocation56_spill] sm:$0xff] %v16417_v28  ;;  %v16420_v27 = vld [vmem:[#allocation2 + $0x218] sm:$0xff] }
 0x294   :  { %18039 = vst [vmem:[#allocation57_spill] sm:$0xff] %v16420_v27 }
 0x29a   :  { %12857 = vmatmul.mubr.bf16.gmra.mrb[24].mxu0 %v16404_v19  ;;  %v16423_v19 = vld [vmem:[#allocation2 + $0x230] sm:$0xff] }
 0x29b   :  { %12860 = vmatprep.mubr.bf16.mxu0 %v16407_v26  ;;  %18040 = vst [vmem:[#allocation58_spill] sm:$0xff] %v16423_v19  ;;  %v16426_v26 = vld [vmem:[#allocation2 + $0x248] sm:$0xff] }
 0x29c   :  { %18041 = vst [vmem:[#allocation59_spill] sm:$0xff] %v16426_v26 }
 0x2a2   :  { %12861 = vmatmul.mubr.bf16.gmra.mrb[28].mxu0 %v16324_v56 }
 0x2a3   :  { %12864 = vmatprep.mubr.bf16.mxu0 %v16411_v49  ;;  %v16429_v49 = vld [vmem:[#allocation2 + $0x260] sm:$0xff] }
 0x2a4   :  { %18042 = vst [vmem:[#allocation60_spill] sm:$0xff] %v16429_v49 }
 0x2aa   :  { %12865 = vmatmul.mubr.bf16.gmra.mrb[32].mxu0 %v16414_v46  ;;  %v16432_v46 = vld [vmem:[#allocation2 + $0x278] sm:$0xff] }
 0x2ab   :  { %12868 = vmatprep.mubr.bf16.mxu0 %v16417_v28  ;;  %18043 = vst [vmem:[#allocation61_spill] sm:$0xff] %v16432_v46  ;;  %v16435_v28 = vld [vmem:[#allocation2 + $0x290] sm:$0xff] }
 0x2ac   :  { %18044 = vst [vmem:[#allocation62_spill] sm:$0xff] %v16435_v28 }
 0x2b2   :  { %12869 = vmatmul.mubr.bf16.gmra.mrb[36].mxu0 %v16420_v27  ;;  %v16438_v27 = vld [vmem:[#allocation2 + $0x2a8] sm:$0xff] }
 0x2b3   :  { %12872 = vmatprep.mubr.bf16.mxu0 %v16423_v19  ;;  %18045 = vst [vmem:[#allocation63_spill] sm:$0xff] %v16438_v27  ;;  %v16441_v19 = vld [vmem:[#allocation2 + $0x2c0] sm:$0xff] }
 0x2b4   :  { %18046 = vst [vmem:[#allocation64_spill] sm:$0xff] %v16441_v19 }
 0x2ba   :  { %12873 = vmatmul.mubr.bf16.gmra.mrb[40].mxu0 %v16426_v26  ;;  %v16444_v26 = vld [vmem:[#allocation2 + $0x2d8] sm:$0xff] }
 0x2bb   :  { %12876 = vmatprep.mubr.bf16.mxu0 %v16429_v49  ;;  %18047 = vst [vmem:[#allocation65_spill] sm:$0xff] %v16444_v26  ;;  %v16447_v49 = vld [vmem:[#allocation2 + $0x2f0] sm:$0xff] }
 0x2bc   :  { %18048 = vst [vmem:[#allocation66_spill] sm:$0xff] %v16447_v49 }
 0x2c2   :  { %12877 = vmatmul.mubr.bf16.gmra.mrb[44].mxu0 %v16432_v46  ;;  %v16450_v46 = vld [vmem:[#allocation2 + $0x308] sm:$0xff] }
 0x2c3   :  { %12880 = vmatprep.mubr.bf16.mxu0 %v16435_v28  ;;  %18049 = vst [vmem:[#allocation67_spill] sm:$0xff] %v16450_v46  ;;  %v16453_v28 = vld [vmem:[#allocation2 + $0x320] sm:$0xff] }
 0x2c4   :  { %18050 = vst [vmem:[#allocation68_spill] sm:$0xff] %v16453_v28 }
 0x2ca   :  { %12881 = vmatmul.mubr.bf16.gmra.mrb[48].mxu0 %v16438_v27  ;;  %v15212_v27 = vld [vmem:[#allocation6 + $0x198] sm:$0xff]  }
 0x2cb   :  { %12884 = vmatprep.mubr.bf16.mxu0 %v16441_v19  ;;  %v15210_v19 = vld [vmem:[#allocation6 + $0x188] sm:$0xff]  }
 0x2d2   :  { %12885 = vmatmul.mubr.bf16.gmra.mrb[52].mxu0 %v16444_v26  ;;  %v18051_v26 = vld [vmem:[#allocation19_spill] sm:$0xff] }
 0x2d3   :  { %12888 = vmatprep.mubr.bf16.mxu0 %v16447_v49  ;;  %v15211_v49 = vld [vmem:[#allocation6 + $0x190] sm:$0xff]  }
 0x2da   :  { %12889 = vmatmul.mubr.bf16.gmra.mrb[56].mxu0 %v16450_v46  ;;  %v18052_v46 = vld [vmem:[#allocation21_spill] sm:$0xff] }
 0x2db   :  { %12892 = vmatprep.mubr.bf16.mxu0 %v16453_v28  ;;  %v15213_v28 = vld [vmem:[#allocation6 + $0x1a0] sm:$0xff]  }
 0x2e2   :  { %12893 = vmatmul.mubr.bf16.gmra.mrb[60].mxu0 %v16350_v63 }
 0x2e3   :  { %12912 = vmatprep.mubr.bf16.mxu0 %v16081_v54  ;;  %v15214_v54 = vld [vmem:[#allocation6 + $0x1a8] sm:$0xff]  }
 0x2ea   :  { %12913 = vmatmul.mubr.bf16.vlgmr.msra.gmra.mrb[0].mxu0 %v16084_v55 }
 0x2eb   :  { %12977 = vmatpush3.bf16.msra.mxu0 %v15209_v39  ;;  %12916 = vmatprep.mubr.bf16.mxu0 %v18051_v26  ;;  %v15215_v39 = vld [vmem:[#allocation6 + $0x1b0] sm:$0xff]   ;;  %v18054_v26 = vld [vmem:[#allocation24_spill] sm:$0xff] }
 0x2ec   :  { %12978 = vmatprep.subr.bf16.mxu0 %v15210_v19 }
 0x2ef   :  { %12979 = vmatpush3.bf16.msra.mxu0 %v15210_v19  ;;  %v15216_v19 = vld [vmem:[#allocation6 + $0x1b8] sm:$0xff]  }
 0x2f0   :  { %12980 = vmatprep.subr.bf16.mxu0 %v15211_v49 }
 0x2f2   :  { %12917 = vmatmul.mubr.bf16.gmra.mrb[4].mxu0 %v16103_v31  ;;  %v18055_v31 = vld [vmem:[#allocation25_spill] sm:$0xff] }
 0x2f3   :  { %12920 = vmatprep.mubr.bf16.mxu0 %v18052_v46  ;;  %12981 = vmatpush3.bf16.msra.mxu0 %v15211_v49  ;;  %v15217_v49 = vld [vmem:[#allocation6 + $0x1c0] sm:$0xff]   ;;  %v18059_v46 = vld [vmem:[#allocation29_spill] sm:$0xff] }
 0x2f4   :  { %12982 = vmatprep.subr.bf16.mxu0 %v15212_v27 }
 0x2f7   :  { %12983 = vmatpush3.bf16.msra.mxu0 %v15212_v27  ;;  %v18056_v27 = vld [vmem:[#allocation26_spill] sm:$0xff] }
 0x2f8   :  { %12984 = vmatprep.subr.bf16.mxu0 %v15213_v28 }
 0x2fa   :  { %12921 = vmatmul.mubr.bf16.gmra.mrb[8].mxu0 %v18053_v48  ;;  %v18057_v48 = vld [vmem:[#allocation27_spill] sm:$0xff] }
 0x2fb   :  { %12924 = vmatprep.mubr.bf16.mxu0 %v16130_v33  ;;  %12985 = vmatpush3.bf16.msra.mxu0 %v15213_v28  ;;  %v671_v28 = vsel %vm637_vm9, %v16324_v56, 0  ;;  %v18058_v33 = vld [vmem:[#allocation28_spill] sm:$0xff] }
 0x2fc   :  { %12986 = vmatprep.subr.bf16.mxu0 %v15214_v54 }
 0x2ff   :  { %12987 = vmatpush3.bf16.msra.mxu0 %v15214_v54  ;;  %v580_v54 = vld [vmem:[#allocation2 + $0x190] sm:$0x1] }
 0x300   :  { %12988 = vmatprep.subr.bf16.mxu0 %v15215_v39 }
 0x302   :  { %12925 = vmatmul.mubr.bf16.gmra.mrb[12].mxu0 %v18054_v26  ;;  %v3535_v26 = vshll.u32 %v671_v28, 16 }
 0x303   :  { %12928 = vmatprep.mubr.bf16.mxu0 %v18055_v31  ;;  %12989 = vmatpush3.bf16.msra.mxu0 %v15215_v39  ;;  %v672_v39 = vsel %vm638_vm10, %v580_v54, 0  ;;  %v3533_v31 = vshrl.u32 %v671_v28, 16  ;;  %v18065_v28 = vld [vmem:[#allocation35_spill] sm:$0xff]  ;;  %v18067_v54 = vld [vmem:[#allocation37_spill] sm:$0xff] }
 0x304   :  { %12990 = vmatprep.subr.bf16.mxu0 %v15216_v19  ;;  %v3540_v55 = vshll.u32 %v672_v39, 16  ;;  %v18068_v39 = vld [vmem:[#allocation38_spill] sm:$0xff] }
 0x306   :  { %v3542_v17 = vrot.slane %v3540_v55, 1  ;;  %v18069_v55 = vld [vmem:[#allocation39_spill] sm:$0xff] }
 0x307   :  { %12991 = vmatpush3.bf16.msra.mxu0 %v15216_v19  ;;  %v3537_v19 = vrot.slane %v3535_v26, 1  ;;  %v18066_v26 = vld [vmem:[#allocation36_spill] sm:$0xff] }
 0x308   :  { %13056 = vmatprep.subr.bf16.mxu0 %v15217_v49 }
 0x30a   :  { %12929 = vmatmul.mubr.bf16.gmra.mrb[16].mxu0 %v18056_v27  ;;  %v18061_v27 = vld [vmem:[#allocation31_spill] sm:$0xff] }
 0x30b   :  { %12932 = vmatprep.mubr.bf16.mxu0 %v18057_v48  ;;  %v3538_v48 = vor.u32 %v3537_v19, %v3533_v31  ;;  %v707_v31 = vsel %vm637_vm9, %v16350_v63, 0 }
 0x30c   :  { %v3545_v19 = vshrl.u32 %v707_v31, 16 }
 0x30d   :  { %v16478_v56 = vsel %vm1835_vm11, %v3538_v48, %v3542_v17  ;;  %v3547_v17 = vshll.u32 %v707_v31, 16  ;;  %v15219_v31 = vld [vmem:[#allocation6 + $0x1d0] sm:$0xff]  }
 0x312   :  { %12933 = vmatmul.mubr.bf16.gmra.mrb[20].mxu0 %v18058_v33  ;;  %v18062_v33 = vld [vmem:[#allocation32_spill] sm:$0xff] }
 0x313   :  { %12936 = vmatprep.mubr.bf16.mxu0 %v18059_v46  ;;  %v18063_v46 = vld [vmem:[#allocation33_spill] sm:$0xff] }
 0x31a   :  { %12937 = vmatmul.mubr.bf16.gmra.mrb[24].mxu0 %v18060_v4 }
 0x31b   :  { %12940 = vmatprep.mubr.bf16.mxu0 %v18061_v27 }
 0x322   :  { %12941 = vmatmul.mubr.bf16.gmra.mrb[28].mxu0 %v16478_v56 }
 0x323   :  { %12944 = vmatprep.mubr.bf16.mxu0 %v18062_v33  ;;  %v616_v33 = vld [vmem:[#allocation2 + $0x340] sm:$0x1] }
 0x324   :  { %v708_v48 = vsel %vm638_vm10, %v616_v33, 0  ;;  %v15220_v33 = vld [vmem:[#allocation6 + $0x1d8] sm:$0xff]  }
 0x32a   :  { %12945 = vmatmul.mubr.bf16.gmra.mrb[32].mxu0 %v18063_v46 }
 0x32b   :  { %12948 = vmatprep.mubr.bf16.mxu0 %v18064_v11 }
 0x332   :  { %12949 = vmatmul.mubr.bf16.gmra.mrb[36].mxu0 %v18065_v28 }
 0x333   :  { %12952 = vmatprep.mubr.bf16.mxu0 %v18066_v26 }
 0x33a   :  { %12953 = vmatmul.mubr.bf16.gmra.mrb[40].mxu0 %v18067_v54 }
 0x33b   :  { %12956 = vmatprep.mubr.bf16.mxu0 %v18068_v39 }
 0x342   :  { %12957 = vmatmul.mubr.bf16.gmra.mrb[44].mxu0 %v18069_v55  ;;  %v3549_v55 = vrot.slane %v3547_v17, 1  ;;  %v18078_v17 = vld [vmem:[#allocation44_spill] sm:$0xff] }
 0x343   :  { %12960 = vmatprep.mubr.bf16.mxu0 %v16273_v2  ;;  %v3552_v2 = vshll.u32 %v708_v48, 16  ;;  %v18079_v48 = vld [vmem:[#allocation55_spill] sm:$0xff] }
 0x34a   :  { %12961 = vmatmul.mubr.bf16.gmra.mrb[48].mxu0 %v16276_v36  ;;  %v3554_v36 = vrot.slane %v3552_v2, 1  ;;  %v15221_v2 = vld [vmem:[#allocation6 + $0x1e0] sm:$0xff]  }
 0x34b   :  { %12964 = vmatprep.mubr.bf16.mxu0 %v16289_v29  ;;  %v3550_v29 = vor.u32 %v3549_v55, %v3545_v19  ;;  %v18077_v55 = vld [vmem:[#allocation53_spill] sm:$0xff]  ;;  %v18080_v19 = vld [vmem:[#allocation56_spill] sm:$0xff] }
 0x34d   :  { %v16502_v39 = vsel %vm1835_vm11, %v3550_v29, %v3554_v36 }
 0x352   :  { %12965 = vmatmul.mubr.bf16.gmra.mrb[52].mxu0 %v16292_v45 }
 0x353   :  { %12968 = vmatprep.mubr.bf16.mxu0 %v16301_v0  ;;  %v15218_v0 = vld [vmem:[#allocation6 + $0x1c8] sm:$0xff]  }
 0x35a   :  { %12969 = vmatmul.mubr.bf16.gmra.mrb[56].mxu0 %v16304_v14 }
 0x35b   :  { %12972 = vmatprep.mubr.bf16.mxu0 %v16309_v53 }
 0x362   :  { %12973 = vmatmul.mubr.bf16.gmra.mrb[60].mxu0 %v16502_v39 }
 0x363   :  { %12992 = vmatprep.mubr.bf16.mxu0 %v15809_v51  ;;  %v15222_v51 = vld [vmem:[#allocation6 + $0x1e8] sm:$0xff]  }
 0x36a   :  { %12993 = vmatmul.mubr.bf16.vlgmr.msra.gmra.mrb[0].mxu0 %v15825_v9  ;;  %v15223_v9 = vld [vmem:[#allocation6 + $0x1f0] sm:$0xff]  }
 0x36b   :  { %13057 = vmatpush3.bf16.msra.mxu0 %v15217_v49  ;;  %12996 = vmatprep.mubr.bf16.mxu0 %v15831_v12  ;;  %v15224_v12 = vld [vmem:[#allocation6 + $0x1f8] sm:$0xff]  }
 0x36c   :  { %13058 = vmatprep.subr.bf16.mxu0 %v15218_v0 }
 0x36f   :  { %13059 = vmatpush3.bf16.msra.mxu0 %v15218_v0 }
 0x370   :  { %13060 = vmatprep.subr.bf16.mxu0 %v15219_v31 }
 0x372   :  { %12997 = vmatmul.mubr.bf16.gmra.mrb[4].mxu0 %v15843_v41  ;;  %v15225_v41 = vld [vmem:[#allocation6 + $0x200] sm:$0xff]  }
 0x373   :  { %13000 = vmatprep.mubr.bf16.mxu0 %v15846_v22  ;;  %13061 = vmatpush3.bf16.msra.mxu0 %v15219_v31  ;;  %v16516_v22 = vld [vmem:[#allocation2 + $0x8] sm:$0xff] }
 0x374   :  { %13062 = vmatprep.subr.bf16.mxu0 %v15220_v33  ;;  %v18081_v31 = vld [vmem:[#allocation57_spill] sm:$0xff] }
 0x377   :  { %13063 = vmatpush3.bf16.msra.mxu0 %v15220_v33  ;;  %v18082_v33 = vld [vmem:[#allocation58_spill] sm:$0xff] }
 0x378   :  { %13064 = vmatprep.subr.bf16.mxu0 %v15221_v2 }
 0x37a   :  { %13001 = vmatmul.mubr.bf16.gmra.mrb[8].mxu0 %v15859_v62  ;;  %v510_v62 = vsel %vm474_vm6, %v16516_v22, 0 }
 0x37b   :  { %13004 = vmatprep.mubr.bf16.mxu0 %v15864_v3  ;;  %13065 = vmatpush3.bf16.msra.mxu0 %v15221_v2  ;;  %v436_v3 = vld [vmem:[#allocation2 + $0x198] sm:$0x80] }
 0x37c   :  { %13066 = vmatprep.subr.bf16.mxu0 %v15222_v51  ;;  %v18083_v2 = vld [vmem:[#allocation59_spill] sm:$0xff] }
 0x37f   :  { %13067 = vmatpush3.bf16.msra.mxu0 %v15222_v51  ;;  %v18084_v51 = vld [vmem:[#allocation60_spill] sm:$0xff] }
 0x380   :  { %13068 = vmatprep.subr.bf16.mxu0 %v15223_v9 }
 0x382   :  { %13005 = vmatmul.mubr.bf16.gmra.mrb[12].mxu0 %v15879_v23  ;;  %v3981_v23 = vshrl.u32 %v510_v62, 16 }
 0x383   :  { %13008 = vmatprep.mubr.bf16.mxu0 %v15882_v30  ;;  %13069 = vmatpush3.bf16.msra.mxu0 %v15223_v9  ;;  %v509_v30 = vsel %vm473_vm7, %v436_v3, 0  ;;  %v18085_v9 = vld [vmem:[#allocation61_spill] sm:$0xff] }
 0x384   :  { %13070 = vmatprep.subr.bf16.mxu0 %v15224_v12  ;;  %v3977_v36 = vshrl.u32 %v509_v30, 16  ;;  %v3983_v29 = vrot.slane %v3981_v23, 7  ;;  %v18089_v3 = vld [vmem:[#allocation65_spill] sm:$0xff]  ;;  %v18090_v23 = vld [vmem:[#allocation66_spill] sm:$0xff]  ;;  %v18091_v30 = vld [vmem:[#allocation67_spill] sm:$0xff] }
 0x387   :  { %13071 = vmatpush3.bf16.msra.mxu0 %v15224_v12  ;;  %v18086_v12 = vld [vmem:[#allocation62_spill] sm:$0xff] }
 0x388   :  { %13136 = vmatprep.subr.bf16.mxu0 %v15225_v41 }
 0x38a   :  { %13009 = vmatmul.mubr.bf16.gmra.mrb[16].mxu0 %v15902_v47  ;;  %v3984_v47 = vshll.u32 %v510_v62, 16  ;;  %v18088_v62 = vld [vmem:[#allocation64_spill] sm:$0xff] }
 0x38b   :  { %13012 = vmatprep.mubr.bf16.mxu0 %v15905_v16  ;;  %v3979_v16 = vrot.slane %v3977_v36, 7  ;;  %v18092_v36 = vld [vmem:[#allocation68_spill] sm:$0xff] }
 0x38c   :  { %v16527_v0 = vor.u32 %v3984_v47, %v3983_v29  ;;  %v15233_v29 = vld [vmem:[#allocation8] sm:$0xff]   ;;  %v18093_v47 = vld [vmem:[#allocation18_spill] sm:$0xff] }
 0x38d   :  { %14016 = vmatprep.subr.bf16.mxu1 %v15233_v29 }
 0x38e   :  { %v3987_v49 = vsel %vm711_vm8, %v3979_v16, %v16527_v0  ;;  %v15234_v16 = vld [vmem:[#allocation8 + $0x8] sm:$0xff]   ;;  %14024 = vmatpush3.bf16.msra.mxu1 %v15233_v29 }
 0x38f   :  { %14017 = vmatprep.subr.bf16.mxu1 %v15234_v16 }
 0x392   :  { %13013 = vmatmul.mubr.bf16.gmra.mrb[20].mxu0 %v15915_v6  ;;  %v454_v6 = vld [vmem:[#allocation2 + $0x348] sm:$0x80]  ;;  %14025 = vmatpush3.bf16.msra.mxu1 %v15234_v16 }
 0x393   :  { %13016 = vmatprep.mubr.bf16.mxu0 %v15920_v10  ;;  %v545_v10 = vsel %vm473_vm7, %v454_v6, 0  ;;  %v18095_v6 = vld [vmem:[#allocation20_spill] sm:$0xff] }
 0x39a   :  { %13017 = vmatmul.mubr.bf16.gmra.mrb[24].mxu0 %v15932_v40  ;;  %v3989_v40 = vshrl.u32 %v545_v10, 16  ;;  %v18096_v10 = vld [vmem:[#allocation21_spill] sm:$0xff] }
 0x39b   :  { %13020 = vmatprep.mubr.bf16.mxu0 %v16336_v44  ;;  %v18075_v44 = vld [vmem:[#allocation51_spill] sm:$0xff] }
 0x3a2   :  { %13021 = vmatmul.mubr.bf16.gmra.mrb[28].mxu0 %v3987_v49  ;;  %v18094_v49 = vld [vmem:[#allocation19_spill] sm:$0xff] }
 0x3a3   :  { %13024 = vmatprep.mubr.bf16.mxu0 %v15949_v18  ;;  %v3991_v18 = vrot.slane %v3989_v40, 7  ;;  %v18098_v40 = vld [vmem:[#allocation23_spill] sm:$0xff] }
 0x3aa   :  { %13025 = vmatmul.mubr.bf16.gmra.mrb[32].mxu0 %v15962_v35  ;;  %v3999_v35 = vsel %vm711_vm8, %v3991_v18, %v16527_v0  ;;  %v18099_v18 = vld [vmem:[#allocation24_spill] sm:$0xff] }
 0x3ab   :  { %13028 = vmatprep.mubr.bf16.mxu0 %v15965_v38  ;;  %v15226_v38 = vld [vmem:[#allocation6 + $0x208] sm:$0xff]  }
 0x3b2   :  { %13029 = vmatmul.mubr.bf16.gmra.mrb[36].mxu0 %v15978_v58  ;;  %v15227_v58 = vld [vmem:[#allocation6 + $0x210] sm:$0xff]  }
 0x3b3   :  { %13032 = vmatprep.mubr.bf16.mxu0 %v15981_v1  ;;  %v15228_v1 = vld [vmem:[#allocation6 + $0x218] sm:$0xff]  }
 0x3ba   :  { %13033 = vmatmul.mubr.bf16.gmra.mrb[40].mxu0 %v15992_v15  ;;  %v15229_v15 = vld [vmem:[#allocation6 + $0x220] sm:$0xff]  }
 0x3bb   :  { %13036 = vmatprep.mubr.bf16.mxu0 %v15997_v42  ;;  %v15230_v42 = vld [vmem:[#allocation6 + $0x228] sm:$0xff]  }
 0x3c2   :  { %13037 = vmatmul.mubr.bf16.gmra.mrb[44].mxu0 %v16012_v5  ;;  %v18070_v5 = vld [vmem:[#allocation46_spill] sm:$0xff] }
 0x3c3   :  { %13040 = vmatprep.mubr.bf16.mxu0 %v16015_v25  ;;  %v15231_v25 = vld [vmem:[#allocation6 + $0x230] sm:$0xff]  }
 0x3ca   :  { %13041 = vmatmul.mubr.bf16.gmra.mrb[48].mxu0 %v16032_v43  ;;  %v15232_v43 = vld [vmem:[#allocation6 + $0x238] sm:$0xff]  }
 0x3cb   :  { %13044 = vmatprep.mubr.bf16.mxu0 %v16037_v52  ;;  %v18071_v52 = vld [vmem:[#allocation47_spill] sm:$0xff] }
 0x3d2   :  { %13045 = vmatmul.mubr.bf16.gmra.mrb[52].mxu0 %v16049_v21  ;;  %v18072_v21 = vld [vmem:[#allocation48_spill] sm:$0xff] }
 0x3d3   :  { %13048 = vmatprep.mubr.bf16.mxu0 %v16052_v32  ;;  %v18073_v32 = vld [vmem:[#allocation49_spill] sm:$0xff] }
 0x3da   :  { %13049 = vmatmul.mubr.bf16.gmra.mrb[56].mxu0 %v16067_v60  ;;  %v18074_v60 = vld [vmem:[#allocation50_spill] sm:$0xff] }
 0x3db   :  { %13052 = vmatprep.mubr.bf16.mxu0 %v16362_v61  ;;  %v18076_v61 = vld [vmem:[#allocation52_spill] sm:$0xff] }
 0x3e2   :  { %13053 = vmatmul.mubr.bf16.gmra.mrb[60].mxu0 %v3999_v35  ;;  %v18100_v35 = vld [vmem:[#allocation25_spill] sm:$0xff] }
 0x3e3   :  { %13072 = vmatprep.mubr.bf16.mxu0 %v16368_v13 }
 0x3ea   :  { %13073 = vmatmul.mubr.bf16.vlgmr.msra.gmra.mrb[0].mxu0 %v16371_v8 }
 0x3eb   :  { %13137 = vmatpush3.bf16.msra.mxu0 %v15225_v41  ;;  %13076 = vmatprep.mubr.bf16.mxu0 %v16374_v7  ;;  %v18087_v41 = vld [vmem:[#allocation63_spill] sm:$0xff] }
 0x3ec   :  { %13138 = vmatprep.subr.bf16.mxu0 %v15226_v38 }
 0x3ef   :  { %13139 = vmatpush3.bf16.msra.mxu0 %v15226_v38  ;;  %v18101_v38 = vld [vmem:[#allocation26_spill] sm:$0xff] }
 0x3f0   :  { %13140 = vmatprep.subr.bf16.mxu0 %v15227_v58 }
 0x3f2   :  { %13077 = vmatmul.mubr.bf16.gmra.mrb[4].mxu0 %v16377_v34 }
 0x3f3   :  { %13080 = vmatprep.mubr.bf16.mxu0 %v16380_v37  ;;  %13141 = vmatpush3.bf16.msra.mxu0 %v15227_v58  ;;  %v18102_v58 = vld [vmem:[#allocation27_spill] sm:$0xff] }
 0x3f4   :  { %13142 = vmatprep.subr.bf16.mxu0 %v15228_v1 }
 0x3f7   :  { %13143 = vmatpush3.bf16.msra.mxu0 %v15228_v1  ;;  %v18103_v1 = vld [vmem:[#allocation28_spill] sm:$0xff] }
 0x3f8   :  { %13144 = vmatprep.subr.bf16.mxu0 %v15229_v15 }
 0x3fa   :  { %13081 = vmatmul.mubr.bf16.gmra.mrb[8].mxu0 %v16383_v50 }
 0x3fb   :  { %13084 = vmatprep.mubr.bf16.mxu0 %v18070_v5  ;;  %13145 = vmatpush3.bf16.msra.mxu0 %v15229_v15  ;;  %v673_v15 = vsel %vm637_vm9, %v16516_v22, 0 }
 0x3fc   :  { %13146 = vmatprep.subr.bf16.mxu0 %v15230_v42 }
 0x3ff   :  { %13147 = vmatpush3.bf16.msra.mxu0 %v15230_v42  ;;  %v582_v42 = vld [vmem:[#allocation2 + $0x1a8] sm:$0x1] }
 0x400   :  { %13148 = vmatprep.subr.bf16.mxu0 %v15231_v25 }
 0x402   :  { %13085 = vmatmul.mubr.bf16.gmra.mrb[12].mxu0 %v18071_v52 }
 0x403   :  { %13088 = vmatprep.mubr.bf16.mxu0 %v18072_v21  ;;  %13149 = vmatpush3.bf16.msra.mxu0 %v15231_v25  ;;  %v18104_v25 = vld [vmem:[#allocation29_spill] sm:$0xff] }
 0x404   :  { %13150 = vmatprep.subr.bf16.mxu0 %v15232_v43 }
 0x407   :  { %13151 = vmatpush3.bf16.msra.mxu0 %v15232_v43  ;;  %v4841_v43 = vshll.u32 %v673_v15, 16 }
 0x408   :  { %13216 = vmatprep.subr.bf16.mxu0 %v15233_v29 }
 0x40a   :  { %13089 = vmatmul.mubr.bf16.gmra.mrb[16].mxu0 %v18073_v32 }
 0x40b   :  { %13092 = vmatprep.mubr.bf16.mxu0 %v18074_v60 }
 0x412   :  { %13093 = vmatmul.mubr.bf16.gmra.mrb[20].mxu0 %v18075_v44 }
 0x413   :  { %13096 = vmatprep.mubr.bf16.mxu0 %v18076_v61 }
 0x41a   :  { %13097 = vmatmul.mubr.bf16.gmra.mrb[24].mxu0 %v18077_v55 }
 0x41b   :  { %13100 = vmatprep.mubr.bf16.mxu0 %v18078_v17  ;;  %v674_v17 = vsel %vm638_vm10, %v582_v42, 0 }
 0x422   :  { %13101 = vmatmul.mubr.bf16.gmra.mrb[28].mxu0 %v16516_v22 }
 0x423   :  { %13104 = vmatprep.mubr.bf16.mxu0 %v18079_v48 }
 0x42a   :  { %13105 = vmatmul.mubr.bf16.gmra.mrb[32].mxu0 %v18080_v19 }
 0x42b   :  { %13108 = vmatprep.mubr.bf16.mxu0 %v18081_v31 }
 0x432   :  { %13109 = vmatmul.mubr.bf16.gmra.mrb[36].mxu0 %v18082_v33 }
 0x433   :  { %13112 = vmatprep.mubr.bf16.mxu0 %v18083_v2 }
 0x43a   :  { %13113 = vmatmul.mubr.bf16.gmra.mrb[40].mxu0 %v18084_v51 }
 0x43b   :  { %13116 = vmatprep.mubr.bf16.mxu0 %v18085_v9 }
 0x442   :  { %13117 = vmatmul.mubr.bf16.gmra.mrb[44].mxu0 %v18086_v12 }
 0x443   :  { %13120 = vmatprep.mubr.bf16.mxu0 %v18087_v41 }
 0x44a   :  { %13121 = vmatmul.mubr.bf16.gmra.mrb[48].mxu0 %v18088_v62 }
 0x44b   :  { %13124 = vmatprep.mubr.bf16.mxu0 %v18089_v3 }
 0x452   :  { %13125 = vmatmul.mubr.bf16.gmra.mrb[52].mxu0 %v18090_v23 }
 0x453   :  { %13128 = vmatprep.mubr.bf16.mxu0 %v18091_v30 }
 0x45a   :  { %13129 = vmatmul.mubr.bf16.gmra.mrb[56].mxu0 %v18092_v36 }
 0x45b   :  { %13132 = vmatprep.mubr.bf16.mxu0 %v16350_v63  ;;  %v18097_v63 = vld [vmem:[#allocation22_spill] sm:$0xff] }
 0x462   :  { %13133 = vmatmul.mubr.bf16.gmra.mrb[60].mxu0 %v16516_v22 }
 0x463   :  { %13152 = vmatprep.mubr.bf16.mxu0 %v18093_v47  ;;  %v4843_v47 = vrot.slane %v4841_v43, 1 }
 0x46a   :  { %13153 = vmatmul.mubr.bf16.vlgmr.msra.gmra.mrb[0].mxu0 %v18094_v49 }
 0x46b   :  { %13156 = vmatprep.mubr.bf16.mxu0 %v18095_v6  ;;  %13217 = vmatpush3.bf16.msra.mxu0 %v15233_v29  ;;  %v4839_v29 = vshrl.u32 %v673_v15, 16 }
 0x46c   :  { %13218 = vmatprep.subr.bf16.mxu0 %v15234_v16 }
 0x46d   :  { %v4844_v49 = vor.u32 %v4843_v47, %v4839_v29 }
 0x46f   :  { %13219 = vmatpush3.bf16.msra.mxu0 %v15234_v16  ;;  %v4846_v16 = vshll.u32 %v674_v17, 16 }
 0x471   :  { %v4848_v6 = vrot.slane %v4846_v16, 1 }
 0x472   :  { %13157 = vmatmul.mubr.bf16.gmra.mrb[4].mxu0 %v18096_v10  ;;  %v18106_v10 = vld [vmem:[#allocation39_spill] sm:$0xff] }
 0x473   :  { %13160 = vmatprep.mubr.bf16.mxu0 %v18097_v63  ;;  %v4849_v22 = vsel %vm1835_vm11, %v4844_v49, %v4848_v6  ;;  %v15240_v63 = vld [vmem:[#allocation8 + $0x38] sm:$0xff]  }
 0x47a   :  { %13161 = vmatmul.mubr.bf16.gmra.mrb[8].mxu0 %v18098_v40  ;;  %v18109_v40 = vld [vmem:[#allocation42_spill] sm:$0xff] }
 0x47b   :  { %13164 = vmatprep.mubr.bf16.mxu0 %v18099_v18  ;;  %v618_v18 = vld [vmem:[#allocation2 + $0x358] sm:$0x1] }
 0x482   :  { %13165 = vmatmul.mubr.bf16.gmra.mrb[12].mxu0 %v18100_v35  ;;  %v18110_v35 = vld [vmem:[#allocation43_spill] sm:$0xff] }
 0x483   :  { %13168 = vmatprep.mubr.bf16.mxu0 %v18101_v38  ;;  %v5533_v38 = vld [vmem:[#allocation2] sm:$0x80] }
 0x48a   :  { %13169 = vmatmul.mubr.bf16.gmra.mrb[16].mxu0 %v18102_v58  ;;  %v710_v58 = vsel %vm638_vm10, %v618_v18, 0 }
 0x48b   :  { %13172 = vmatprep.mubr.bf16.mxu0 %v18103_v1  ;;  %v5569_v1 = vsel %vm473_vm7, %v5533_v38, 0  ;;  %v4858_v15 = vshll.u32 %v710_v58, 16 }
 0x48c   :  { %v5786_v42 = vshrl.u32 %v5569_v1, 16 }
 0x492   :  { %13173 = vmatmul.mubr.bf16.gmra.mrb[20].mxu0 %v18104_v25  ;;  %v5788_v25 = vrot.slane %v5786_v42, 7  ;;  %v5537_v42 = vld [vmem:[#allocation2 + $0x60] sm:$0x80] }
 0x493   :  { %13176 = vmatprep.mubr.bf16.mxu0 %v18060_v4  ;;  %v15235_v4 = vld [vmem:[#allocation8 + $0x10] sm:$0xff]  }
 0x494   :  { %13220 = vmatprep.subr.bf16.mxu0 %v15235_v4  ;;  %14018 = vmatprep.subr.bf16.mxu1 %v15235_v4  ;;  %v5796_v17 = vsel %vm711_vm8, %v5788_v25, %v16527_v0 }
 0x495   :  { %13221 = vmatpush3.bf16.msra.mxu0 %v15235_v4  ;;  %14026 = vmatpush3.bf16.msra.mxu1 %v15235_v4 }
 0x49a   :  { %13177 = vmatmul.mubr.bf16.gmra.mrb[24].mxu0 %v18061_v27  ;;  %v18105_v27 = vld [vmem:[#allocation38_spill] sm:$0xff] }
 0x49b   :  { %13180 = vmatprep.mubr.bf16.mxu0 %v16478_v56  ;;  %v15236_v56 = vld [vmem:[#allocation8 + $0x18] sm:$0xff]  }
 0x49c   :  { %13222 = vmatprep.subr.bf16.mxu0 %v15236_v56  ;;  %14019 = vmatprep.subr.bf16.mxu1 %v15236_v56 }
 0x49d   :  { %13223 = vmatpush3.bf16.msra.mxu0 %v15236_v56  ;;  %14027 = vmatpush3.bf16.msra.mxu1 %v15236_v56  ;;  %v5534_v56 = vld [vmem:[#allocation2 + $0x18] sm:$0x80] }
 0x4a2   :  { %13181 = vmatmul.mubr.bf16.gmra.mrb[28].mxu0 %v4849_v22 }
 0x4a3   :  { %13184 = vmatprep.mubr.bf16.mxu0 %v18063_v46  ;;  %v15237_v46 = vld [vmem:[#allocation8 + $0x20] sm:$0xff]  }
 0x4a4   :  { %13224 = vmatprep.subr.bf16.mxu0 %v15237_v46  ;;  %14020 = vmatprep.subr.bf16.mxu1 %v15237_v46 }
 0x4a5   :  { %13225 = vmatpush3.bf16.msra.mxu0 %v15237_v46  ;;  %14028 = vmatpush3.bf16.msra.mxu1 %v15237_v46 }
 0x4aa   :  { %13185 = vmatmul.mubr.bf16.gmra.mrb[32].mxu0 %v18064_v11  ;;  %v15238_v11 = vld [vmem:[#allocation8 + $0x28] sm:$0xff]  }
 0x4ab   :  { %13188 = vmatprep.mubr.bf16.mxu0 %v18065_v28  ;;  %v18107_v28 = vld [vmem:[#allocation40_spill] sm:$0xff]  ;;  %13226 = vmatprep.subr.bf16.mxu0 %v15238_v11 }
 0x4ac   :  { %13227 = vmatpush3.bf16.msra.mxu0 %v15238_v11  ;;  %14021 = vmatprep.subr.bf16.mxu1 %v15238_v11 }
 0x4ad   :  { %14029 = vmatpush3.bf16.msra.mxu1 %v15238_v11 }
 0x4b2   :  { %13189 = vmatmul.mubr.bf16.gmra.mrb[36].mxu0 %v18066_v26  ;;  %v18108_v26 = vld [vmem:[#allocation41_spill] sm:$0xff] }
 0x4b3   :  { %13192 = vmatprep.mubr.bf16.mxu0 %v18067_v54  ;;  %v15239_v54 = vld [vmem:[#allocation8 + $0x30] sm:$0xff]  }
 0x4b4   :  { %13228 = vmatprep.subr.bf16.mxu0 %v15239_v54  ;;  %14022 = vmatprep.subr.bf16.mxu1 %v15239_v54 }
 0x4b5   :  { %13229 = vmatpush3.bf16.msra.mxu0 %v15239_v54  ;;  %14030 = vmatpush3.bf16.msra.mxu1 %v15239_v54 }
 0x4b6   :  { %13230 = vmatprep.subr.bf16.mxu0 %v15240_v63  ;;  %14023 = vmatprep.subr.bf16.mxu1 %v15240_v63 }
 0x4b9   :  { %13231 = vmatpush3.bf16.msra.mxu0 %v15240_v63  ;;  %14031 = vmatpush3.bf16.msra.mxu1 %v15240_v63 }
 0x4ba   :  { %13193 = vmatmul.mubr.bf16.gmra.mrb[40].mxu0 %v18105_v27 }
 0x4bb   :  { %13196 = vmatprep.mubr.bf16.mxu0 %v18106_v10 }
 0x4c2   :  { %13197 = vmatmul.mubr.bf16.gmra.mrb[44].mxu0 %v18107_v28  ;;  %v5571_v28 = vsel %vm473_vm7, %v5534_v56, 0 }
 0x4c3   :  { %13200 = vmatprep.mubr.bf16.mxu0 %v18108_v26  ;;  %v5535_v26 = vld [vmem:[#allocation2 + $0x30] sm:$0x80]  ;;  %v5798_v38 = vshrl.u32 %v5571_v28, 16 }
 0x4c4   :  { %v5573_v58 = vsel %vm473_vm7, %v5535_v26, 0 }
 0x4ca   :  { %13201 = vmatmul.mubr.bf16.gmra.mrb[48].mxu0 %v18109_v40 }
 0x4cb   :  { %13204 = vmatprep.mubr.bf16.mxu0 %v16292_v45  ;;  %v4860_v45 = vrot.slane %v4858_v15, 1 }
 0x4cd   :  { %v4861_v43 = vsel %vm1835_vm11, %v4844_v49, %v4860_v45  ;;  %v16635_v49 = vld [vmem:[%s17806_s2] ss:$0 sm:$0xff] }
 0x4d2   :  { %13205 = vmatmul.mubr.bf16.gmra.mrb[52].mxu0 %v18110_v35 }
 0x4d3   :  { %13208 = vmatprep.mubr.bf16.mxu0 %v16304_v14  ;;  %v5551_v14 = vld [vmem:[#allocation2 + $0x1b0] sm:$0x80] }
 0x4d4   :  { %v5605_v29 = vsel %vm473_vm7, %v5551_v14, 0 }
 0x4d5   :  { %v5978_v47 = vshrl.u32 %v5605_v29, 16 }
 0x4d7   :  { %v5980_v16 = vrot.slane %v5978_v47, 7 }
 0x4da   :  { %13209 = vmatmul.mubr.bf16.gmra.mrb[56].mxu0 %v16309_v53  ;;  %v5988_v53 = vsel %vm711_vm8, %v5980_v16, %v16527_v0  ;;  %v5810_v16 = vshrl.u32 %v5573_v58, 16 }
 0x4db   :  { %13212 = vmatprep.mubr.bf16.mxu0 %v16502_v39  ;;  %13264 = vmatprep.mubr.bf16.mxu1 %v5988_v53  ;;  %v16629_v39 = vld [vmem:[#allocation9] sm:$0xff]  }
 0x4dc   :  { %13296 = vmatprep.subr.bf16.mxu1 %v16629_v39 }
 0x4e2   :  { %13213 = vmatmul.mubr.bf16.gmra.mrb[60].mxu0 %v4861_v43 }
 0x4e3   :  { %13232 = vmatprep.mubr.bf16.mxu0 %v5796_v17  ;;  %v5536_v17 = vld [vmem:[#allocation2 + $0x48] sm:$0x80] }
 0x53d   :  { %v13154_v6 = vpop.f32.mrb[0].mxu0 }
 0x53e   :  { %v5291_v22 = vadd.f32 %v13154_v6, %v16635_v49  ;;  %v4963_v4 = vpop.f32.mrb[1].mxu0 }
 0x53f   :  { %v5289_v27 = vadd.f32 %v16635_v49, %v4963_v4  ;;  %v13155_v10 = vpop.f32.mrb[2].mxu0  ;;  %v5800_v4 = vrot.slane %v5798_v38, 7 }
 0x540   :  { %v5292_v0 = vadd.f32 %v13155_v10, %v16635_v49  ;;  %v4966_v46 = vpop.f32.mrb[3].mxu0  ;;  %v5355_v54 = vmax.f32 %v5291_v22, 0.0 }
 0x541   :  { %v5290_v11 = vadd.f32 %v16635_v49, %v4966_v46  ;;  %v5353_v40 = vmax.f32 %v5289_v27, 0.0  ;;  %v5577_v27 = vsel %vm473_vm7, %v5537_v42, 0 }
 0x542   :  { %v5356_v63 = vmax.f32 %v5292_v0, 0.0 }
 0x543   :  { %v5354_v18 = vmax.f32 %v5290_v11, 0.0  ;;  %v5575_v11 = vsel %vm473_vm7, %v5536_v17, 0 }
 0x544   :  { %v5418_v35 = vpack.c.bf16 %v5356_v63, %v5355_v54 }
 0x545   :  { %v5417_v1 = vpack.c.bf16 %v5354_v18, %v5353_v40  ;;  %v13158_v15 = vpop.f32.mrb[4].mxu0 }
 0x546   :  { %5450 = vst [vmem:[#allocation2 + $0x38] sm:$0xff] %v5418_v35  ;;  %v5295_v45 = vadd.f32 %v13158_v15, %v16635_v49  ;;  %v4979_v25 = vpop.f32.mrb[5].mxu0  ;;  %v5574_v43 = vsel %vm474_vm6, %v5418_v35, 0  ;;  %v5812_v35 = vrot.slane %v5810_v16, 7  ;;  %v5822_v15 = vshrl.u32 %v5575_v11, 16 }
 0x547   :  { %5449 = vst [vmem:[#allocation2 + $0x20] sm:$0xff] %v5417_v1  ;;  %v5293_v14 = vadd.f32 %v16635_v49, %v4979_v25  ;;  %v13159_v29 = vpop.f32.mrb[6].mxu0  ;;  %v5572_v47 = vsel %vm474_vm6, %v5417_v1, 0  ;;  %v5814_v53 = vshrl.u32 %v5574_v43, 16  ;;  %v5817_v46 = vshll.u32 %v5574_v43, 16 }
 0x548   :  { %v5296_v6 = vadd.f32 %v13159_v29, %v16635_v49  ;;  %v4982_v22 = vpop.f32.mrb[7].mxu0  ;;  %v5802_v56 = vshrl.u32 %v5572_v47, 16  ;;  %v5359_v28 = vmax.f32 %v5295_v45, 0.0  ;;  %v5805_v63 = vshll.u32 %v5572_v47, 16  ;;  %v5539_v11 = vld [vmem:[#allocation2 + $0x90] sm:$0x80] }
 0x549   :  { %v5294_v10 = vadd.f32 %v16635_v49, %v4982_v22  ;;  %v5816_v0 = vrot.slane %v5814_v53, 7  ;;  %v5357_v40 = vmax.f32 %v5293_v14, 0.0  ;;  %v5834_v25 = vshrl.u32 %v5577_v27, 16  ;;  %v5538_v14 = vld [vmem:[#allocation2 + $0x78] sm:$0x80] }
 0x54a   :  { %v5360_v26 = vmax.f32 %v5296_v6, 0.0  ;;  %v5804_v54 = vrot.slane %v5802_v56, 7 }
 0x54b   :  { %v5358_v18 = vmax.f32 %v5294_v10, 0.0  ;;  %v5819_v58 = vor.u32 %v5817_v46, %v5816_v0  ;;  %v5824_v10 = vrot.slane %v5822_v15, 7  ;;  %v5836_v46 = vrot.slane %v5834_v25, 7 }
 0x54c   :  { %v5420_v38 = vpack.c.bf16 %v5360_v26, %v5359_v28  ;;  %v5807_v1 = vor.u32 %v5805_v63, %v5804_v54  ;;  %v5579_v63 = vsel %vm473_vm7, %v5538_v14, 0  ;;  %v5581_v15 = vsel %vm473_vm7, %v5539_v11, 0 }
 0x54d   :  { %v5419_v42 = vpack.c.bf16 %v5358_v18, %v5357_v40  ;;  %v13162_v29 = vpop.f32.mrb[8].mxu0  ;;  %v16666_v6 = vsel %vm711_vm8, %v5812_v35, %v5819_v58 }
 0x54e   :  { %5452 = vst [vmem:[#allocation2 + $0x68] sm:$0xff] %v5420_v38  ;;  %v5299_v43 = vadd.f32 %v13162_v29, %v16635_v49  ;;  %v4995_v53 = vpop.f32.mrb[9].mxu0  ;;  %v16659_v17 = vsel %vm711_vm8, %v5800_v4, %v5807_v1  ;;  %v5578_v45 = vsel %vm474_vm6, %v5420_v38, 0  ;;  %18112 = vst [vmem:[#allocation31_spill] sm:$0xff] %v16666_v6 }
 0x54f   :  { %18111 = vst [vmem:[#allocation30_spill] sm:$0xff] %v16659_v17  ;;  %5451 = vst [vmem:[#allocation2 + $0x50] sm:$0xff] %v5419_v42  ;;  %v5297_v47 = vadd.f32 %v16635_v49, %v4995_v53  ;;  %v13163_v16 = vpop.f32.mrb[10].mxu0  ;;  %13233 = vmatmul.mubr.bf16.vlgmr.msra.gmra.mrb[64].mxu0 %v16659_v17  ;;  %v5576_v22 = vsel %vm474_vm6, %v5419_v42, 0  ;;  %v5838_v56 = vshrl.u32 %v5578_v45, 16  ;;  %v5841_v54 = vshll.u32 %v5578_v45, 16 }
 0x550   :  { %v5300_v4 = vadd.f32 %v13163_v16, %v16635_v49  ;;  %v4998_v27 = vpop.f32.mrb[11].mxu0  ;;  %13236 = vmatprep.mubr.bf16.mxu0 %v16666_v6  ;;  %v5826_v0 = vshrl.u32 %v5576_v22, 16  ;;  %v5363_v40 = vmax.f32 %v5299_v43, 0.0  ;;  %v5829_v58 = vshll.u32 %v5576_v22, 16 }
 0x551   :  { %v5298_v28 = vadd.f32 %v16635_v49, %v4998_v27  ;;  %v5840_v26 = vrot.slane %v5838_v56, 7  ;;  %v5361_v38 = vmax.f32 %v5297_v47, 0.0  ;;  %v5846_v53 = vshrl.u32 %v5579_v63, 16  ;;  %v5541_v56 = vld [vmem:[#allocation2 + $0xc0] sm:$0x80] }
 0x552   :  { %v5364_v18 = vmax.f32 %v5300_v4, 0.0  ;;  %v5828_v35 = vrot.slane %v5826_v0, 7  ;;  %v5858_v22 = vshrl.u32 %v5581_v15, 16  ;;  %v5540_v4 = vld [vmem:[#allocation2 + $0xa8] sm:$0x80] }
 0x553   :  { %v5362_v1 = vmax.f32 %v5298_v28, 0.0  ;;  %v5843_v42 = vor.u32 %v5841_v54, %v5840_v26 }
 0x554   :  { %v5422_v29 = vpack.c.bf16 %v5364_v18, %v5363_v40  ;;  %v5831_v25 = vor.u32 %v5829_v58, %v5828_v35  ;;  %v5848_v40 = vrot.slane %v5846_v53, 7  ;;  %v5585_v35 = vsel %vm473_vm7, %v5541_v56, 0 }
 0x555   :  { %v5421_v16 = vpack.c.bf16 %v5362_v1, %v5361_v38  ;;  %v13166_v27 = vpop.f32.mrb[12].mxu0  ;;  %v16686_v28 = vsel %vm711_vm8, %v5836_v46, %v5843_v42  ;;  %v5583_v46 = vsel %vm473_vm7, %v5540_v4, 0  ;;  %v5882_v6 = vshrl.u32 %v5585_v35, 16 }
 0x556   :  { %5454 = vst [vmem:[#allocation2 + $0x98] sm:$0xff] %v5422_v29  ;;  %v5303_v45 = vadd.f32 %v13166_v27, %v16635_v49  ;;  %v5011_v14 = vpop.f32.mrb[13].mxu0  ;;  %v16679_v43 = vsel %vm711_vm8, %v5824_v10, %v5831_v25  ;;  %v5582_v47 = vsel %vm474_vm6, %v5422_v29, 0  ;;  %18114 = vst [vmem:[#allocation33_spill] sm:$0xff] %v16686_v28 }
 0x557   :  { %18113 = vst [vmem:[#allocation32_spill] sm:$0xff] %v16679_v43  ;;  %5453 = vst [vmem:[#allocation2 + $0x80] sm:$0xff] %v5421_v16  ;;  %v5301_v0 = vadd.f32 %v16635_v49, %v5011_v14  ;;  %v13167_v11 = vpop.f32.mrb[14].mxu0  ;;  %13237 = vmatmul.mubr.bf16.gmra.mrb[68].mxu0 %v16679_v43  ;;  %v5580_v26 = vsel %vm474_vm6, %v5421_v16, 0  ;;  %v5862_v54 = vshrl.u32 %v5582_v47, 16  ;;  %v5865_v1 = vshll.u32 %v5582_v47, 16 }
 0x558   :  { %v5304_v10 = vadd.f32 %v13167_v11, %v16635_v49  ;;  %v5014_v63 = vpop.f32.mrb[15].mxu0  ;;  %13240 = vmatprep.mubr.bf16.mxu0 %v16686_v28  ;;  %v5850_v18 = vshrl.u32 %v5580_v26, 16  ;;  %v5367_v42 = vmax.f32 %v5303_v45, 0.0  ;;  %v5853_v25 = vshll.u32 %v5580_v26, 16 }
 0x559   :  { %v5302_v58 = vadd.f32 %v16635_v49, %v5014_v63  ;;  %v5864_v38 = vrot.slane %v5862_v54, 7  ;;  %v5365_v16 = vmax.f32 %v5301_v0, 0.0  ;;  %v5860_v14 = vrot.slane %v5858_v22, 7  ;;  %v5542_v0 = vld [vmem:[#allocation2 + $0xd8] sm:$0x80] }
 0x55a   :  { %v5368_v15 = vmax.f32 %v5304_v10, 0.0  ;;  %v5852_v29 = vrot.slane %v5850_v18, 7  ;;  %v5870_v43 = vshrl.u32 %v5583_v46, 16 }
 0x55b   :  { %v5366_v27 = vmax.f32 %v5302_v58, 0.0  ;;  %v5867_v11 = vor.u32 %v5865_v1, %v5864_v38  ;;  %v5884_v58 = vrot.slane %v5882_v6, 7  ;;  %v5543_v38 = vld [vmem:[#allocation2 + $0xf0] sm:$0x80] }
 0x55c   :  { %v5424_v53 = vpack.c.bf16 %v5368_v15, %v5367_v42  ;;  %v5855_v28 = vor.u32 %v5853_v25, %v5852_v29  ;;  %v5872_v18 = vrot.slane %v5870_v43, 7  ;;  %v5587_v15 = vsel %vm473_vm7, %v5542_v0, 0 }
 0x55d   :  { %v5423_v56 = vpack.c.bf16 %v5366_v27, %v5365_v16  ;;  %v13170_v17 = vpop.f32.mrb[16].mxu0  ;;  %v16706_v10 = vsel %vm711_vm8, %v5860_v14, %v5867_v11  ;;  %v5589_v43 = vsel %vm473_vm7, %v5543_v38, 0 }
 0x55e   :  { %5456 = vst [vmem:[#allocation2 + $0xc8] sm:$0xff] %v5424_v53  ;;  %v5307_v47 = vadd.f32 %v13170_v17, %v16635_v49  ;;  %v5027_v54 = vpop.f32.mrb[17].mxu0  ;;  %v16699_v4 = vsel %vm711_vm8, %v5848_v40, %v5855_v28  ;;  %v5586_v45 = vsel %vm474_vm6, %v5424_v53, 0  ;;  %18116 = vst [vmem:[#allocation35_spill] sm:$0xff] %v16706_v10 }
 0x55f   :  { %18115 = vst [vmem:[#allocation34_spill] sm:$0xff] %v16699_v4  ;;  %5455 = vst [vmem:[#allocation2 + $0xb0] sm:$0xff] %v5423_v56  ;;  %v5305_v22 = vadd.f32 %v16635_v49, %v5027_v54  ;;  %v13171_v26 = vpop.f32.mrb[18].mxu0  ;;  %13241 = vmatmul.mubr.bf16.gmra.mrb[72].mxu0 %v16699_v4  ;;  %v5584_v17 = vsel %vm474_vm6, %v5423_v56, 0  ;;  %v5886_v63 = vshrl.u32 %v5586_v45, 16  ;;  %v5889_v42 = vshll.u32 %v5586_v45, 16 }
 0x560   :  { %v5308_v28 = vadd.f32 %v13171_v26, %v16635_v49  ;;  %v5030_v40 = vpop.f32.mrb[19].mxu0  ;;  %13244 = vmatprep.mubr.bf16.mxu0 %v16706_v10  ;;  %v5874_v35 = vshrl.u32 %v5584_v17, 16  ;;  %v5371_v29 = vmax.f32 %v5307_v47, 0.0  ;;  %v5877_v27 = vshll.u32 %v5584_v17, 16 }
 0x561   :  { %v5306_v1 = vadd.f32 %v16635_v49, %v5030_v40  ;;  %v5888_v46 = vrot.slane %v5886_v63, 7  ;;  %v5369_v14 = vmax.f32 %v5305_v22, 0.0  ;;  %v5894_v54 = vshrl.u32 %v5587_v15, 16  ;;  %v5545_v63 = vld [vmem:[#allocation2 + $0x120] sm:$0x80] }
 0x562   :  { %v5372_v25 = vmax.f32 %v5308_v28, 0.0  ;;  %v5876_v16 = vrot.slane %v5874_v35, 7  ;;  %v5906_v17 = vshrl.u32 %v5589_v43, 16  ;;  %v5544_v28 = vld [vmem:[#allocation2 + $0x108] sm:$0x80] }
 0x563   :  { %v5370_v11 = vmax.f32 %v5306_v1, 0.0  ;;  %v5891_v53 = vor.u32 %v5889_v42, %v5888_v46 }
 0x564   :  { %v5426_v56 = vpack.c.bf16 %v5372_v25, %v5371_v29  ;;  %v5879_v6 = vor.u32 %v5877_v27, %v5876_v16  ;;  %v5896_v29 = vrot.slane %v5894_v54, 7  ;;  %v5593_v16 = vsel %vm473_vm7, %v5545_v63, 0 }
 0x565   :  { %v5425_v26 = vpack.c.bf16 %v5370_v11, %v5369_v14  ;;  %v13174_v40 = vpop.f32.mrb[20].mxu0  ;;  %v16726_v1 = vsel %vm711_vm8, %v5884_v58, %v5891_v53  ;;  %v5591_v58 = vsel %vm473_vm7, %v5544_v28, 0  ;;  %v5930_v10 = vshrl.u32 %v5593_v16, 16 }
 0x566   :  { %5458 = vst [vmem:[#allocation2 + $0xf8] sm:$0xff] %v5426_v56  ;;  %v5311_v45 = vadd.f32 %v13174_v40, %v16635_v49  ;;  %v5043_v0 = vpop.f32.mrb[21].mxu0  ;;  %v16719_v47 = vsel %vm711_vm8, %v5872_v18, %v5879_v6  ;;  %v5590_v22 = vsel %vm474_vm6, %v5426_v56, 0  ;;  %18118 = vst [vmem:[#allocation37_spill] sm:$0xff] %v16726_v1 }
 0x567   :  { %18117 = vst [vmem:[#allocation36_spill] sm:$0xff] %v16719_v47  ;;  %5457 = vst [vmem:[#allocation2 + $0xe0] sm:$0xff] %v5425_v26  ;;  %v5309_v35 = vadd.f32 %v16635_v49, %v5043_v0  ;;  %v13175_v38 = vpop.f32.mrb[22].mxu0  ;;  %13245 = vmatmul.mubr.bf16.gmra.mrb[76].mxu0 %v16719_v47  ;;  %v5588_v46 = vsel %vm474_vm6, %v5425_v26, 0  ;;  %v5910_v42 = vshrl.u32 %v5590_v22, 16  ;;  %v5913_v11 = vshll.u32 %v5590_v22, 16 }
 0x568   :  { %v5312_v18 = vadd.f32 %v13175_v38, %v16635_v49  ;;  %v5046_v15 = vpop.f32.mrb[23].mxu0  ;;  %13248 = vmatprep.mubr.bf16.mxu0 %v16726_v1  ;;  %v5898_v25 = vshrl.u32 %v5588_v46, 16  ;;  %v5375_v53 = vmax.f32 %v5311_v45, 0.0  ;;  %v5901_v6 = vshll.u32 %v5588_v46, 16 }
 0x569   :  { %v5310_v27 = vadd.f32 %v16635_v49, %v5046_v15  ;;  %v5912_v14 = vrot.slane %v5910_v42, 7  ;;  %v5373_v26 = vmax.f32 %v5309_v35, 0.0  ;;  %v5908_v0 = vrot.slane %v5906_v17, 7  ;;  %v5546_v35 = vld [vmem:[#allocation2 + $0x138] sm:$0x80] }
 0x56a   :  { %v5376_v43 = vmax.f32 %v5312_v18, 0.0  ;;  %v5900_v56 = vrot.slane %v5898_v25, 7  ;;  %v5918_v47 = vshrl.u32 %v5591_v58, 16 }
 0x56b   :  { %v5374_v40 = vmax.f32 %v5310_v27, 0.0  ;;  %v5915_v38 = vor.u32 %v5913_v11, %v5912_v14  ;;  %v5932_v27 = vrot.slane %v5930_v10, 7  ;;  %v5547_v14 = vld [vmem:[#allocation2 + $0x150] sm:$0x80] }
 0x56c   :  { %v5428_v54 = vpack.c.bf16 %v5376_v43, %v5375_v53  ;;  %v5903_v1 = vor.u32 %v5901_v6, %v5900_v56  ;;  %v5920_v25 = vrot.slane %v5918_v47, 7  ;;  %v5595_v43 = vsel %vm473_vm7, %v5546_v35, 0 }
 0x56d   :  { %v5427_v63 = vpack.c.bf16 %v5374_v40, %v5373_v26  ;;  %v13178_v4 = vpop.f32.mrb[24].mxu0  ;;  %v16746_v18 = vsel %vm711_vm8, %v5908_v0, %v5915_v38  ;;  %v5597_v47 = vsel %vm473_vm7, %v5547_v14, 0 }
 0x56e   :  { %5460 = vst [vmem:[#allocation2 + $0x128] sm:$0xff] %v5428_v54  ;;  %v5315_v22 = vadd.f32 %v13178_v4, %v16635_v49  ;;  %v5059_v42 = vpop.f32.mrb[25].mxu0  ;;  %v16739_v28 = vsel %vm711_vm8, %v5896_v29, %v5903_v1  ;;  %v5594_v45 = vsel %vm474_vm6, %v5428_v54, 0  ;;  %18120 = vst [vmem:[#allocation47_spill] sm:$0xff] %v16746_v18 }
 0x56f   :  { %18119 = vst [vmem:[#allocation46_spill] sm:$0xff] %v16739_v28  ;;  %5459 = vst [vmem:[#allocation2 + $0x110] sm:$0xff] %v5427_v63  ;;  %v5313_v17 = vadd.f32 %v16635_v49, %v5059_v42  ;;  %v13179_v46 = vpop.f32.mrb[26].mxu0  ;;  %13249 = vmatmul.mubr.bf16.gmra.mrb[80].mxu0 %v16739_v28  ;;  %v5592_v4 = vsel %vm474_vm6, %v5427_v63, 0  ;;  %v5934_v15 = vshrl.u32 %v5594_v45, 16  ;;  %v5937_v53 = vshll.u32 %v5594_v45, 16 }
 0x570   :  { %v5316_v1 = vadd.f32 %v13179_v46, %v16635_v49  ;;  %v5062_v29 = vpop.f32.mrb[27].mxu0  ;;  %13252 = vmatprep.mubr.bf16.mxu0 %v16746_v18  ;;  %v5922_v16 = vshrl.u32 %v5592_v4, 16  ;;  %v5379_v56 = vmax.f32 %v5315_v22, 0.0  ;;  %v5925_v40 = vshll.u32 %v5592_v4, 16 }
 0x571   :  { %v5314_v11 = vadd.f32 %v16635_v49, %v5062_v29  ;;  %v5936_v58 = vrot.slane %v5934_v15, 7  ;;  %v5377_v0 = vmax.f32 %v5313_v17, 0.0  ;;  %v5942_v42 = vshrl.u32 %v5595_v43, 16 }
 0x572   :  { %v5380_v6 = vmax.f32 %v5316_v1, 0.0  ;;  %v5924_v26 = vrot.slane %v5922_v16, 7  ;;  %v5954_v15 = vshrl.u32 %v5597_v47, 16  ;;  %v5548_v1 = vld [vmem:[#allocation2 + $0x168] sm:$0x80] }
 0x573   :  { %v5378_v38 = vmax.f32 %v5314_v11, 0.0  ;;  %v5939_v54 = vor.u32 %v5937_v53, %v5936_v58  ;;  %v5944_v43 = vrot.slane %v5942_v42, 7 }
 0x574   :  { %v16757_v63 = vpack.c.bf16 %v5380_v6, %v5379_v56  ;;  %v5927_v10 = vor.u32 %v5925_v40, %v5924_v26 }
 0x575   :  { %v16759_v46 = vpack.c.bf16 %v5378_v38, %v5377_v0  ;;  %v13182_v45 = vpop.f32.mrb[28].mxu0  ;;  %v16773_v14 = vsel %vm711_vm8, %v5932_v27, %v5939_v54  ;;  %v5599_v27 = vsel %vm473_vm7, %v5548_v1, 0 }
 0x576   :  { %5462 = vst [vmem:[#allocation2 + $0x158] sm:$0xff] %v16757_v63  ;;  %v5319_v22 = vadd.f32 %v13182_v45, %v16635_v49  ;;  %v5075_v35 = vpop.f32.mrb[29].mxu0  ;;  %v16764_v4 = vsel %vm711_vm8, %v5920_v25, %v5927_v10  ;;  %v5598_v17 = vsel %vm474_vm6, %v16757_v63, 0  ;;  %18122 = vst [vmem:[#allocation49_spill] sm:$0xff] %v16773_v14  ;;  %v5966_v28 = vshrl.u32 %v5599_v27, 16 }
 0x577   :  { %18121 = vst [vmem:[#allocation48_spill] sm:$0xff] %v16764_v4  ;;  %5461 = vst [vmem:[#allocation2 + $0x140] sm:$0xff] %v16759_v46  ;;  %v5317_v29 = vadd.f32 %v16635_v49, %v5075_v35  ;;  %v13183_v16 = vpop.f32.mrb[30].mxu0  ;;  %13253 = vmatmul.mubr.bf16.gmra.mrb[84].mxu0 %v16764_v4  ;;  %v5596_v25 = vsel %vm474_vm6, %v16759_v46, 0  ;;  %v5958_v11 = vshrl.u32 %v5598_v17, 16  ;;  %v5961_v40 = vshll.u32 %v5598_v17, 16 }
 0x578   :  { %v5320_v58 = vadd.f32 %v13183_v16, %v16635_v49  ;;  %v5078_v53 = vpop.f32.mrb[31].mxu0  ;;  %13256 = vmatprep.mubr.bf16.mxu0 %v16773_v14  ;;  %v5946_v56 = vshrl.u32 %v5596_v25, 16  ;;  %v5383_v0 = vmax.f32 %v5319_v22, 0.0  ;;  %v5949_v47 = vshll.u32 %v5596_v25, 16  ;;  %v5552_v22 = vld [vmem:[#allocation2 + $0x1c8] sm:$0x80] }
 0x579   :  { %v5318_v6 = vadd.f32 %v16635_v49, %v5078_v53  ;;  %v5960_v26 = vrot.slane %v5958_v11, 7  ;;  %v5381_v10 = vmax.f32 %v5317_v29, 0.0  ;;  %v5956_v35 = vrot.slane %v5954_v15, 7 }
 0x57a   :  { %v5384_v38 = vmax.f32 %v5320_v58, 0.0  ;;  %v5948_v54 = vrot.slane %v5946_v56, 7  ;;  %v5553_v58 = vld [vmem:[#allocation2 + $0x1e0] sm:$0x80] }
 0x57b   :  { %v5382_v45 = vmax.f32 %v5318_v6, 0.0  ;;  %v5963_v16 = vor.u32 %v5961_v40, %v5960_v26  ;;  %v5968_v6 = vrot.slane %v5966_v28, 7  ;;  %v5607_v26 = vsel %vm473_vm7, %v5552_v22, 0 }
 0x57c   :  { %v5432_v4 = vpack.c.bf16 %v5384_v38, %v5383_v0  ;;  %v5951_v18 = vor.u32 %v5949_v47, %v5948_v54  ;;  %v5609_v40 = vsel %vm473_vm7, %v5553_v58, 0 }
 0x57d   :  { %v16783_v14 = vpack.c.bf16 %v5382_v45, %v5381_v10  ;;  %v13186_v42 = vpop.f32.mrb[32].mxu0  ;;  %v16793_v25 = vsel %vm711_vm8, %v5956_v35, %v5963_v16  ;;  %v5990_v16 = vshrl.u32 %v5607_v26, 16 }
 0x57e   :  { %5464 = vst [vmem:[#allocation2 + $0x188] sm:$0xff] %v5432_v4  ;;  %v5323_v17 = vadd.f32 %v13186_v42, %v16635_v49  ;;  %v5091_v11 = vpop.f32.mrb[33].mxu0  ;;  %v16787_v1 = vsel %vm711_vm8, %v5944_v43, %v5951_v18  ;;  %18124 = vst [vmem:[#allocation51_spill] sm:$0xff] %v16793_v25  ;;  %v6002_v42 = vshrl.u32 %v5609_v40, 16 }
 0x57f   :  { %18123 = vst [vmem:[#allocation50_spill] sm:$0xff] %v16787_v1  ;;  %5463 = vst [vmem:[#allocation2 + $0x170] sm:$0xff] %v16783_v14  ;;  %v5321_v15 = vadd.f32 %v16635_v49, %v5091_v11  ;;  %v13187_v29 = vpop.f32.mrb[34].mxu0  ;;  %13257 = vmatmul.mubr.bf16.gmra.mrb[88].mxu0 %v16787_v1  ;;  %v5600_v4 = vsel %vm474_vm6, %v16783_v14, 0  ;;  %v5992_v26 = vrot.slane %v5990_v16, 7 }
 0x580   :  { %v5324_v53 = vadd.f32 %v13187_v29, %v16635_v49  ;;  %v5094_v18 = vpop.f32.mrb[35].mxu0  ;;  %13260 = vmatprep.mubr.bf16.mxu0 %v16793_v25  ;;  %v5970_v43 = vshrl.u32 %v5600_v4, 16  ;;  %v5387_v27 = vmax.f32 %v5323_v17, 0.0  ;;  %v5973_v54 = vshll.u32 %v5600_v4, 16 }
 0x581   :  { %v5322_v56 = vadd.f32 %v16635_v49, %v5094_v18  ;;  %v5385_v47 = vmax.f32 %v5321_v15, 0.0  ;;  %v5554_v15 = vld [vmem:[#allocation2 + $0x1f8] sm:$0x80] }
 0x582   :  { %v5388_v0 = vmax.f32 %v5324_v53, 0.0  ;;  %v5972_v38 = vrot.slane %v5970_v43, 7 }
 0x583   :  { %v5386_v10 = vmax.f32 %v5322_v56, 0.0 }
 0x584   :  { %v16805_v45 = vpack.c.bf16 %v5388_v0, %v5387_v27  ;;  %v5975_v35 = vor.u32 %v5973_v54, %v5972_v38  ;;  %v6004_v27 = vrot.slane %v6002_v42, 7  ;;  %v5555_v0 = vld [vmem:[#allocation2 + $0x210] sm:$0x80] }
 0x585   :  { %v16807_v11 = vpack.c.bf16 %v5386_v10, %v5385_v47  ;;  %v13190_v28 = vpop.f32.mrb[36].mxu0  ;;  %v5611_v10 = vsel %vm473_vm7, %v5554_v15, 0  ;;  %v5613_v16 = vsel %vm473_vm7, %v5555_v0, 0 }
 0x586   :  { %18125 = vst [vmem:[#allocation52_spill] sm:$0xff] %v16805_v45  ;;  %5466 = vst [vmem:[#allocation2 + $0x1e8] sm:$0xff] %v16805_v45  ;;  %v5327_v22 = vadd.f32 %v13190_v28, %v16635_v49  ;;  %v5107_v29 = vpop.f32.mrb[37].mxu0  ;;  %v16812_v17 = vsel %vm711_vm8, %v5968_v6, %v5975_v35  ;;  %v5610_v58 = vsel %vm474_vm6, %v16805_v45, 0  ;;  %v6014_v20 = vshrl.u32 %v5611_v10, 16 }
 0x587   :  { %18126 = vst [vmem:[#allocation53_spill] sm:$0xff] %v16807_v11  ;;  %18127 = vst [vmem:[#allocation44_spill] sm:$0xff] %v16812_v17  ;;  %v5325_v4 = vadd.f32 %v16635_v49, %v5107_v29  ;;  %v13191_v53 = vpop.f32.mrb[38].mxu0  ;;  %13261 = vmatmul.mubr.bf16.gmra.mrb[92].mxu0 %v16812_v17  ;;  %v5608_v18 = vsel %vm474_vm6, %v16807_v11, 0  ;;  %v6006_v43 = vshrl.u32 %v5610_v58, 16  ;;  %v6009_v47 = vshll.u32 %v5610_v58, 16 }
 0x588   :  { %5465 = vst [vmem:[#allocation2 + $0x1d0] sm:$0xff] %v16807_v11  ;;  %v5328_v56 = vadd.f32 %v13191_v53, %v16635_v49  ;;  %v5110_v6 = vpop.f32.mrb[39].mxu0  ;;  %v5994_v40 = vshrl.u32 %v5608_v18, 16  ;;  %v5391_v35 = vmax.f32 %v5327_v22, 0.0  ;;  %v5997_v17 = vshll.u32 %v5608_v18, 16 }
 0x589   :  { %v5326_v38 = vadd.f32 %v16635_v49, %v5110_v6  ;;  %v6008_v54 = vrot.slane %v6006_v43, 7  ;;  %v5389_v25 = vmax.f32 %v5325_v4, 0.0  ;;  %v15242_v43 = vld [vmem:[#allocation9 + $0x8] sm:$0xff]   ;;  %v5557_v45 = vld [vmem:[#allocation2 + $0x240] sm:$0x80] }
 0x58a   :  { %v5392_v28 = vmax.f32 %v5328_v56, 0.0  ;;  %v5996_v29 = vrot.slane %v5994_v40, 7  ;;  %v6026_v56 = vshrl.u32 %v5613_v16, 16  ;;  %v15243_v16 = vld [vmem:[#allocation9 + $0x10] sm:$0xff]  }
 0x58b   :  { %v5390_v1 = vmax.f32 %v5326_v38, 0.0  ;;  %v6011_v24 = vor.u32 %v6009_v47, %v6008_v54  ;;  %v6016_v47 = vrot.slane %v6014_v20, 7 }
 0x58c   :  { %v16829_v53 = vpack.c.bf16 %v5392_v28, %v5391_v35  ;;  %v5999_v42 = vor.u32 %v5997_v17, %v5996_v29  ;;  %v5556_v17 = vld [vmem:[#allocation2 + $0x228] sm:$0x80]  ;;  %v5617_v35 = vsel %vm473_vm7, %v5557_v45, 0  ;;  %v6028_v20 = vrot.slane %v6026_v56, 7 }
 0x58d   :  { %v16831_v6 = vpack.c.bf16 %v5390_v1, %v5389_v25  ;;  %v13194_v58 = vpop.f32.mrb[40].mxu0  ;;  %v16845_v40 = vsel %vm711_vm8, %v6004_v27, %v6011_v24  ;;  %v5615_v29 = vsel %vm473_vm7, %v5556_v17, 0  ;;  %v15244_v17 = vld [vmem:[#allocation9 + $0x18] sm:$0xff]  }
 0x58e   :  { %18128 = vst [vmem:[#allocation55_spill] sm:$0xff] %v16829_v53  ;;  %5468 = vst [vmem:[#allocation2 + $0x218] sm:$0xff] %v16829_v53  ;;  %v5331_v22 = vadd.f32 %v13194_v58, %v16635_v49  ;;  %v5123_v15 = vpop.f32.mrb[41].mxu0  ;;  %v16836_v4 = vsel %vm711_vm8, %v5992_v26, %v5999_v42  ;;  %v5614_v18 = vsel %vm474_vm6, %v16829_v53, 0 }
 0x58f   :  { %18129 = vst [vmem:[#allocation56_spill] sm:$0xff] %v16831_v6  ;;  %18130 = vst [vmem:[#allocation57_spill] sm:$0xff] %v16836_v4  ;;  %v5329_v1 = vadd.f32 %v16635_v49, %v5123_v15  ;;  %v13195_v25 = vpop.f32.mrb[42].mxu0  ;;  %13265 = vmatmul.mubr.bf16.vlgmr.msra.gmra.mrb[0].mxu1 %v16836_v4  ;;  %v5612_v26 = vsel %vm474_vm6, %v16831_v6, 0  ;;  %v6030_v0 = vshrl.u32 %v5614_v18, 16  ;;  %v6033_v28 = vshll.u32 %v5614_v18, 16 }
 0x590   :  { %5467 = vst [vmem:[#allocation2 + $0x200] sm:$0xff] %v16831_v6  ;;  %18131 = vst [vmem:[#allocation58_spill] sm:$0xff] %v16845_v40  ;;  %v5332_v38 = vadd.f32 %v13195_v25, %v16635_v49  ;;  %v5126_v54 = vpop.f32.mrb[43].mxu0  ;;  %13268 = vmatprep.mubr.bf16.mxu1 %v16845_v40  ;;  %13297 = vmatpush3.bf16.msra.mxu1 %v16629_v39  ;;  %v6018_v10 = vshrl.u32 %v5612_v26, 16  ;;  %v5395_v42 = vmax.f32 %v5331_v22, 0.0  ;;  %v6021_v25 = vshll.u32 %v5612_v26, 16 }
 0x591   :  { %v5330_v24 = vadd.f32 %v16635_v49, %v5126_v54  ;;  %13298 = vmatprep.subr.bf16.mxu1 %v15242_v43  ;;  %v6032_v27 = vrot.slane %v6030_v0, 7  ;;  %v5393_v40 = vmax.f32 %v5329_v1, 0.0  ;;  %v6038_v54 = vshrl.u32 %v5615_v29, 16 }
 0x592   :  { %v5396_v58 = vmax.f32 %v5332_v38, 0.0  ;;  %v6020_v15 = vrot.slane %v6018_v10, 7  ;;  %v6050_v6 = vshrl.u32 %v5617_v35, 16 }
 0x593   :  { %v5394_v39 = vmax.f32 %v5330_v24, 0.0  ;;  %v6035_v4 = vor.u32 %v6033_v28, %v6032_v27  ;;  %v6040_v28 = vrot.slane %v6038_v54, 7 }
 0x594   :  { %v16858_v53 = vpack.c.bf16 %v5396_v58, %v5395_v42  ;;  %v6023_v45 = vor.u32 %v6021_v25, %v6020_v15  ;;  %13299 = vmatpush3.bf16.msra.mxu1 %v15242_v43  ;;  %v5558_v43 = vld [vmem:[#allocation2 + $0x258] sm:$0x80]  ;;  %v6052_v42 = vrot.slane %v6050_v6, 7  ;;  %v5559_v58 = vld [vmem:[#allocation2 + $0x270] sm:$0x80] }
 0x595   :  { %v16860_v0 = vpack.c.bf16 %v5394_v39, %v5393_v40  ;;  %v13198_v18 = vpop.f32.mrb[44].mxu0  ;;  %13300 = vmatprep.subr.bf16.mxu1 %v15243_v16  ;;  %v16874_v10 = vsel %vm711_vm8, %v6028_v20, %v6035_v4  ;;  %v5619_v39 = vsel %vm473_vm7, %v5558_v43, 0  ;;  %v15245_v20 = vld [vmem:[#allocation9 + $0x20] sm:$0xff]   ;;  %v5621_v6 = vsel %vm473_vm7, %v5559_v58, 0 }
 0x596   :  { %18132 = vst [vmem:[#allocation59_spill] sm:$0xff] %v16858_v53  ;;  %5470 = vst [vmem:[#allocation2 + $0x248] sm:$0xff] %v16858_v53  ;;  %v5335_v22 = vadd.f32 %v13198_v18, %v16635_v49  ;;  %v5139_v26 = vpop.f32.mrb[45].mxu0  ;;  %v16865_v1 = vsel %vm711_vm8, %v6016_v47, %v6023_v45  ;;  %v5618_v56 = vsel %vm474_vm6, %v16858_v53, 0  ;;  %v5561_v53 = vld [vmem:[#allocation2 + $0x2a0] sm:$0x80] }
 0x597   :  { %18133 = vst [vmem:[#allocation60_spill] sm:$0xff] %v16860_v0  ;;  %18134 = vst [vmem:[#allocation61_spill] sm:$0xff] %v16865_v1  ;;  %v5333_v40 = vadd.f32 %v16635_v49, %v5139_v26  ;;  %v13199_v38 = vpop.f32.mrb[46].mxu0  ;;  %13269 = vmatmul.mubr.bf16.gmra.mrb[4].mxu1 %v16865_v1  ;;  %v5616_v47 = vsel %vm474_vm6, %v16860_v0, 0  ;;  %v6054_v35 = vshrl.u32 %v5618_v56, 16  ;;  %v6057_v4 = vshll.u32 %v5618_v56, 16 }
 0x598   :  { %5469 = vst [vmem:[#allocation2 + $0x230] sm:$0xff] %v16860_v0  ;;  %18135 = vst [vmem:[#allocation62_spill] sm:$0xff] %v16874_v10  ;;  %v5336_v24 = vadd.f32 %v13199_v38, %v16635_v49  ;;  %v5142_v27 = vpop.f32.mrb[47].mxu0  ;;  %13272 = vmatprep.mubr.bf16.mxu1 %v16874_v10  ;;  %v6042_v29 = vshrl.u32 %v5616_v47, 16  ;;  %13301 = vmatpush3.bf16.msra.mxu1 %v15243_v16  ;;  %v5399_v45 = vmax.f32 %v5335_v22, 0.0  ;;  %v6045_v38 = vshll.u32 %v5616_v47, 16 }
 0x599   :  { %v5334_v15 = vadd.f32 %v16635_v49, %v5142_v27  ;;  %v6056_v25 = vrot.slane %v6054_v35, 7  ;;  %13302 = vmatprep.subr.bf16.mxu1 %v15244_v17  ;;  %v5397_v1 = vmax.f32 %v5333_v40, 0.0  ;;  %v6062_v35 = vshrl.u32 %v5619_v39, 16  ;;  %v15246_v22 = vld [vmem:[#allocation9 + $0x28] sm:$0xff]  }
 0x59a   :  { %v5400_v18 = vmax.f32 %v5336_v24, 0.0  ;;  %v6044_v26 = vrot.slane %v6042_v29, 7  ;;  %v6074_v58 = vshrl.u32 %v5621_v6, 16 }
 0x59b   :  { %v5398_v10 = vmax.f32 %v5334_v15, 0.0  ;;  %v6059_v54 = vor.u32 %v6057_v4, %v6056_v25 }
 0x59c   :  { %v16886_v16 = vpack.c.bf16 %v5400_v18, %v5399_v45  ;;  %v6047_v27 = vor.u32 %v6045_v38, %v6044_v26  ;;  %13303 = vmatpush3.bf16.msra.mxu1 %v15244_v17  ;;  %v5560_v17 = vld [vmem:[#allocation2 + $0x288] sm:$0x80]  ;;  %v6064_v45 = vrot.slane %v6062_v35, 7  ;;  %v5625_v26 = vsel %vm473_vm7, %v5561_v53, 0 }
 0x59d   :  { %v16888_v56 = vpack.c.bf16 %v5398_v10, %v5397_v1  ;;  %v13202_v43 = vpop.f32.mrb[48].mxu0  ;;  %13304 = vmatprep.subr.bf16.mxu1 %v15245_v20  ;;  %v16902_v15 = vsel %vm711_vm8, %v6052_v42, %v6059_v54  ;;  %v5623_v6 = vsel %vm473_vm7, %v5560_v17, 0  ;;  %v15248_v17 = vld [vmem:[#allocation9 + $0x38] sm:$0xff]  }
 0x59e   :  { %18136 = vst [vmem:[#allocation63_spill] sm:$0xff] %v16886_v16  ;;  %5472 = vst [vmem:[#allocation2 + $0x278] sm:$0xff] %v16886_v16  ;;  %v5339_v40 = vadd.f32 %v13202_v43, %v16635_v49  ;;  %v5155_v47 = vpop.f32.mrb[49].mxu0  ;;  %v16893_v24 = vsel %vm711_vm8, %v6040_v28, %v6047_v27  ;;  %v5622_v29 = vsel %vm474_vm6, %v16886_v16, 0  ;;  %v15247_v27 = vld [vmem:[#allocation9 + $0x30] sm:$0xff]   ;;  %v6076_v16 = vrot.slane %v6074_v58, 7 }
 0x59f   :  { %18137 = vst [vmem:[#allocation64_spill] sm:$0xff] %v16888_v56  ;;  %18138 = vst [vmem:[#allocation65_spill] sm:$0xff] %v16893_v24  ;;  %v5337_v1 = vadd.f32 %v16635_v49, %v5155_v47  ;;  %v13203_v10 = vpop.f32.mrb[50].mxu0  ;;  %13273 = vmatmul.mubr.bf16.gmra.mrb[8].mxu1 %v16893_v24  ;;  %v5620_v28 = vsel %vm474_vm6, %v16888_v56, 0  ;;  %v6078_v25 = vshrl.u32 %v5622_v29, 16  ;;  %v6081_v54 = vshll.u32 %v5622_v29, 16 }
 0x5a0   :  { %5471 = vst [vmem:[#allocation2 + $0x260] sm:$0xff] %v16888_v56  ;;  %18139 = vst [vmem:[#allocation66_spill] sm:$0xff] %v16902_v15  ;;  %v5340_v4 = vadd.f32 %v13203_v10, %v16635_v49  ;;  %v5158_v39 = vpop.f32.mrb[51].mxu0  ;;  %13276 = vmatprep.mubr.bf16.mxu1 %v16902_v15  ;;  %v6066_v18 = vshrl.u32 %v5620_v28, 16  ;;  %13305 = vmatpush3.bf16.msra.mxu1 %v15245_v20  ;;  %v5403_v43 = vmax.f32 %v5339_v40, 0.0  ;;  %v6069_v24 = vshll.u32 %v5620_v28, 16 }
 0x5a1   :  { %v5338_v38 = vadd.f32 %v16635_v49, %v5158_v39  ;;  %v6080_v42 = vrot.slane %v6078_v25, 7  ;;  %13306 = vmatprep.subr.bf16.mxu1 %v15246_v22  ;;  %v5401_v15 = vmax.f32 %v5337_v1, 0.0  ;;  %v6086_v20 = vshrl.u32 %v5623_v6, 16  ;;  %v5562_v58 = vld [vmem:[#allocation2 + $0x2b8] sm:$0x80] }
 0x5a2   :  { %v5404_v47 = vmax.f32 %v5340_v4, 0.0  ;;  %v6068_v10 = vrot.slane %v6066_v18, 7  ;;  %v6098_v39 = vshrl.u32 %v5625_v26, 16 }
 0x5a3   :  { %v5402_v35 = vmax.f32 %v5338_v38, 0.0  ;;  %v6083_v56 = vor.u32 %v6081_v54, %v6080_v42  ;;  %v6088_v42 = vrot.slane %v6086_v20, 7 }
 0x5a4   :  { %v16914_v0 = vpack.c.bf16 %v5404_v47, %v5403_v43  ;;  %v6071_v53 = vor.u32 %v6069_v24, %v6068_v10  ;;  %13307 = vmatpush3.bf16.msra.mxu1 %v15246_v22  ;;  %v6100_v6 = vrot.slane %v6098_v39, 7  ;;  %v5563_v43 = vld [vmem:[#allocation2 + $0x2d0] sm:$0x80] }
 0x5a5   :  { %v16916_v29 = vpack.c.bf16 %v5402_v35, %v5401_v15  ;;  %v13206_v25 = vpop.f32.mrb[52].mxu0  ;;  %13308 = vmatprep.subr.bf16.mxu1 %v15247_v27  ;;  %v16930_v4 = vsel %vm711_vm8, %v6076_v16, %v6083_v56  ;;  %v5627_v56 = vsel %vm473_vm7, %v5562_v58, 0  ;;  %v16940_v35 = vld [vmem:[#allocation8 + $0x40] sm:$0xff]  }
 0x5a6   :  { %18140 = vst [vmem:[#allocation67_spill] sm:$0xff] %v16914_v0  ;;  %5474 = vst [vmem:[#allocation2 + $0x2a8] sm:$0xff] %v16914_v0  ;;  %v5343_v40 = vadd.f32 %v13206_v25, %v16635_v49  ;;  %v5171_v28 = vpop.f32.mrb[53].mxu0  ;;  %v16921_v1 = vsel %vm711_vm8, %v6064_v45, %v6071_v53  ;;  %v5626_v24 = vsel %vm474_vm6, %v16914_v0, 0 }
 0x5a7   :  { %18141 = vst [vmem:[#allocation68_spill] sm:$0xff] %v16916_v29  ;;  %18142 = vst [vmem:[#allocation18_spill] sm:$0xff] %v16921_v1  ;;  %v5341_v22 = vadd.f32 %v16635_v49, %v5171_v28  ;;  %v13207_v15 = vpop.f32.mrb[54].mxu0  ;;  %13277 = vmatmul.mubr.bf16.gmra.mrb[12].mxu1 %v16921_v1  ;;  %v5624_v45 = vsel %vm474_vm6, %v16916_v29, 0  ;;  %v6102_v18 = vshrl.u32 %v5626_v24, 16  ;;  %v6105_v16 = vshll.u32 %v5626_v24, 16 }
 0x5a8   :  { %5473 = vst [vmem:[#allocation2 + $0x290] sm:$0xff] %v16916_v29  ;;  %18143 = vst [vmem:[#allocation19_spill] sm:$0xff] %v16930_v4  ;;  %v5344_v26 = vadd.f32 %v13207_v15, %v16635_v49  ;;  %v5174_v38 = vpop.f32.mrb[55].mxu0  ;;  %13280 = vmatprep.mubr.bf16.mxu1 %v16930_v4  ;;  %v6090_v54 = vshrl.u32 %v5624_v45, 16  ;;  %13309 = vmatpush3.bf16.msra.mxu1 %v15247_v27  ;;  %v5407_v53 = vmax.f32 %v5343_v40, 0.0  ;;  %v6093_v15 = vshll.u32 %v5624_v45, 16 }
 0x5a9   :  { %v5342_v47 = vadd.f32 %v16635_v49, %v5174_v38  ;;  %v6104_v10 = vrot.slane %v6102_v18, 7  ;;  %13310 = vmatprep.subr.bf16.mxu1 %v15248_v17  ;;  %v5405_v4 = vmax.f32 %v5341_v22, 0.0  ;;  %v5629_v27 = vsel %vm473_vm7, %v5563_v43, 0  ;;  %v5565_v38 = vld [vmem:[#allocation2 + $0x300] sm:$0x80] }
 0x5aa   :  { %v5408_v25 = vmax.f32 %v5344_v26, 0.0  ;;  %v6092_v28 = vrot.slane %v6090_v54, 7  ;;  %v6110_v24 = vshrl.u32 %v5627_v56, 16  ;;  %v15360_v40 = vld [vmem:[%s17806_s2] ss:$0 sm:$0xff] }
 0x5ab   :  { %v5406_v20 = vmax.f32 %v5342_v47, 0.0  ;;  %v6107_v1 = vor.u32 %v6105_v16, %v6104_v10  ;;  %v5564_v54 = vld [vmem:[#allocation2 + $0x2e8] sm:$0x80] }
 0x5ac   :  { %v16944_v39 = vpack.c.bf16 %v5408_v25, %v5407_v53  ;;  %v6095_v49 = vor.u32 %v6093_v15, %v6092_v28  ;;  %13311 = vmatpush3.bf16.msra.mxu1 %v15248_v17  ;;  %v6112_v25 = vrot.slane %v6110_v24, 7  ;;  %v5633_v15 = vsel %vm473_vm7, %v5565_v38, 0 }
 0x5ad   :  { %v16946_v18 = vpack.c.bf16 %v5406_v20, %v5405_v4  ;;  %v13210_v58 = vpop.f32.mrb[56].mxu0  ;;  %13376 = vmatprep.subr.bf16.mxu1 %v16940_v35  ;;  %v6122_v4 = vshrl.u32 %v5629_v27, 16  ;;  %v16962_v10 = vsel %vm711_vm8, %v6100_v6, %v6107_v1  ;;  %v5631_v1 = vsel %vm473_vm7, %v5564_v54, 0 }
 0x5ae   :  { %18144 = vst [vmem:[#allocation20_spill] sm:$0xff] %v16944_v39  ;;  %5476 = vst [vmem:[#allocation2 + $0x2d8] sm:$0xff] %v16944_v39  ;;  %v5347_v22 = vadd.f32 %v15360_v40, %v13210_v58  ;;  %v5187_v45 = vpop.f32.mrb[57].mxu0  ;;  %v16954_v26 = vsel %vm711_vm8, %v6088_v42, %v6095_v49  ;;  %v5630_v17 = vsel %vm474_vm6, %v16944_v39, 0  ;;  %v6146_v29 = vshrl.u32 %v5633_v15, 16 }
 0x5af   :  { %18145 = vst [vmem:[#allocation21_spill] sm:$0xff] %v16946_v18  ;;  %18146 = vst [vmem:[#allocation22_spill] sm:$0xff] %v16954_v26  ;;  %v5345_v43 = vadd.f32 %v15360_v40, %v5187_v45  ;;  %v13211_v47 = vpop.f32.mrb[58].mxu0  ;;  %13281 = vmatmul.mubr.bf16.gmra.mrb[16].mxu1 %v16954_v26  ;;  %v5628_v42 = vsel %vm474_vm6, %v16946_v18, 0  ;;  %v6126_v16 = vshrl.u32 %v5630_v17, 16  ;;  %v6129_v49 = vshll.u32 %v5630_v17, 16 }
 0x5b0   :  { %5475 = vst [vmem:[#allocation2 + $0x2c0] sm:$0xff] %v16946_v18  ;;  %18147 = vst [vmem:[#allocation23_spill] sm:$0xff] %v16962_v10  ;;  %v5348_v56 = vadd.f32 %v15360_v40, %v13211_v47  ;;  %v5190_v53 = vpop.f32.mrb[59].mxu0  ;;  %13284 = vmatprep.mubr.bf16.mxu1 %v16962_v10  ;;  %v6114_v28 = vshrl.u32 %v5628_v42, 16  ;;  %v5411_v6 = vmax.f32 %v5347_v22, 0.0  ;;  %v6117_v26 = vshll.u32 %v5628_v42, 16 }
 0x5b1   :  { %v5346_v20 = vadd.f32 %v15360_v40, %v5190_v53  ;;  %v6128_v27 = vrot.slane %v6126_v16, 7  ;;  %v5409_v39 = vmax.f32 %v5345_v43, 0.0  ;;  %v6124_v18 = vrot.slane %v6122_v4, 7 }
 0x5b2   :  { %v5412_v58 = vmax.f32 %v5348_v56, 0.0  ;;  %v6116_v45 = vrot.slane %v6114_v28, 7  ;;  %v6134_v16 = vshrl.u32 %v5631_v1, 16  ;;  %v6148_v15 = vrot.slane %v6146_v29, 7 }
 0x5b3   :  { %v5410_v47 = vmax.f32 %v5346_v20, 0.0  ;;  %v6131_v0 = vor.u32 %v6129_v49, %v6128_v27  ;;  %v5566_v20 = vld [vmem:[#allocation2 + $0x318] sm:$0x80] }
 0x5b4   :  { %v16972_v10 = vpack.c.bf16 %v5412_v58, %v5411_v6  ;;  %v6119_v24 = vor.u32 %v6117_v26, %v6116_v45  ;;  %v6136_v49 = vrot.slane %v6134_v16, 7 }
 0x5b5   :  { %v16974_v11 = vpack.c.bf16 %v5410_v47, %v5409_v39  ;;  %v13214_v38 = vpop.f32.mrb[60].mxu0  ;;  %v16986_v39 = vsel %vm711_vm8, %v6124_v18, %v6131_v0 }
 0x5b6   :  { %5478 = vst [vmem:[#allocation2 + $0x308] sm:$0xff] %v16972_v10  ;;  %v5351_v17 = vadd.f32 %v15360_v40, %v13214_v38  ;;  %v5203_v54 = vpop.f32.mrb[61].mxu0  ;;  %v16978_v22 = vsel %vm711_vm8, %v6112_v25, %v6119_v24  ;;  %v5634_v4 = vsel %vm474_vm6, %v16972_v10, 0  ;;  %18149 = vst [vmem:[#allocation25_spill] sm:$0xff] %v16986_v39 }
 0x5b7   :  { %18148 = vst [vmem:[#allocation24_spill] sm:$0xff] %v16978_v22  ;;  %5477 = vst [vmem:[#allocation2 + $0x2f0] sm:$0xff] %v16974_v11  ;;  %v5349_v43 = vadd.f32 %v15360_v40, %v5203_v54  ;;  %v13215_v26 = vpop.f32.mrb[62].mxu0  ;;  %13285 = vmatmul.mubr.bf16.gmra.mrb[20].mxu1 %v16978_v22  ;;  %v5632_v42 = vsel %vm474_vm6, %v16974_v11, 0  ;;  %v6150_v56 = vshrl.u32 %v5634_v4, 16  ;;  %v6153_v6 = vshll.u32 %v5634_v4, 16 }
 0x5b8   :  { %v5352_v53 = vadd.f32 %v15360_v40, %v13215_v26  ;;  %v5206_v25 = vpop.f32.mrb[63].mxu0  ;;  %13288 = vmatprep.mubr.bf16.mxu1 %v16986_v39  ;;  %v6138_v28 = vshrl.u32 %v5632_v42, 16  ;;  %v5415_v58 = vmax.f32 %v5351_v17, 0.0  ;;  %v6141_v18 = vshll.u32 %v5632_v42, 16 }
 0x5b9   :  { %v5350_v27 = vadd.f32 %v15360_v40, %v5206_v25  ;;  %v6152_v1 = vrot.slane %v6150_v56, 7  ;;  %v5413_v47 = vmax.f32 %v5349_v43, 0.0  ;;  %v5635_v54 = vsel %vm473_vm7, %v5566_v20, 0  ;;  %v18151_v25 = vld [vmem:[#allocation45_spill] sm:$0xff]  ;;  %v15252_v20 = vld [vmem:[#allocation8 + $0x58] sm:$0xff]  }
 0x5ba   :  { %v5416_v45 = vmax.f32 %v5352_v53, 0.0  ;;  %v6140_v0 = vrot.slane %v6138_v28, 7  ;;  %v6158_v40 = vshrl.u32 %v5635_v54, 16  ;;  %v15250_v28 = vld [vmem:[#allocation8 + $0x48] sm:$0xff]  }
 0x5bb   :  { %v5414_v24 = vmax.f32 %v5350_v27, 0.0  ;;  %v6155_v38 = vor.u32 %v6153_v6, %v6152_v1  ;;  %v15253_v27 = vld [vmem:[#allocation8 + $0x60] sm:$0xff]  }
 0x5bc   :  { %v5448_v26 = vpack.c.bf16 %v5416_v45, %v5415_v58  ;;  %v6143_v22 = vor.u32 %v6141_v18, %v6140_v0  ;;  %v6160_v43 = vrot.slane %v6158_v40, 7  ;;  %v15258_v58 = vld [vmem:[#allocation8 + $0x88] sm:$0xff]   ;;  %v15364_v45 = vld [vmem:[#allocation2 + $0x20] sm:$0xff]  ;;  %v15365_v0 = vld [vmem:[#allocation2 + $0x38] sm:$0xff] }
 0x5bd   :  { %v16994_v39 = vpack.c.bf16 %v5414_v24, %v5413_v47  ;;  %v17002_v16 = vsel %vm711_vm8, %v6148_v15, %v6155_v38  ;;  %v15251_v15 = vld [vmem:[#allocation8 + $0x50] sm:$0xff]  }
 0x5be   :  { %5480 = vst [vmem:[#allocation2 + $0x338] sm:$0xff] %v5448_v26  ;;  %v16997_v29 = vsel %vm711_vm8, %v6136_v49, %v6143_v22  ;;  %v15254_v49 = vld [vmem:[#allocation8 + $0x68] sm:$0xff]   ;;  %v15259_v18 = vld [vmem:[#allocation8 + $0x90] sm:$0xff]   ;;  %v15260_v26 = vld [vmem:[#allocation8 + $0x98] sm:$0xff]  }
 0x5bf   :  { %18150 = vst [vmem:[#allocation26_spill] sm:$0xff] %v16997_v29  ;;  %5479 = vst [vmem:[#allocation2 + $0x320] sm:$0xff] %v16994_v39  ;;  %13289 = vmatmul.mubr.bf16.gmra.mrb[24].mxu1 %v16997_v29  ;;  %v5636_v17 = vsel %vm474_vm6, %v16994_v39, 0  ;;  %v15366_v40 = vld [vmem:[#allocation2 + $0x50] sm:$0xff] }
 0x5c0   :  { %13292 = vmatprep.mubr.bf16.mxu1 %v17002_v16  ;;  %v6162_v4 = vshrl.u32 %v5636_v17, 16  ;;  %v6165_v56 = vshll.u32 %v5636_v17, 16  ;;  %v15367_v17 = vld [vmem:[#allocation2 + $0x68] sm:$0xff] }
 0x5c2   :  { %v6164_v42 = vrot.slane %v6162_v4, 7  ;;  %v15261_v4 = vld [vmem:[#allocation8 + $0xa0] sm:$0xff]  }
 0x5c4   :  { %v6167_v22 = vor.u32 %v6165_v56, %v6164_v42 }
 0x5c6   :  { %v17009_v53 = vsel %vm711_vm8, %v6160_v43, %v6167_v22 }
 0x5c7   :  { %13293 = vmatmul.mubr.bf16.gmra.mrb[28].mxu1 %v17009_v53 }
 0x5c8   :  { %13312 = vmatprep.mubr.bf16.mxu1 %v18151_v25  ;;  %v15262_v25 = vld [vmem:[#allocation8 + $0xa8] sm:$0xff]  }
 0x5cf   :  { %13313 = vmatmul.mubr.bf16.vlgmr.msra.gmra.mrb[32].mxu1 %v16368_v13  ;;  %v15255_v13 = vld [vmem:[#allocation8 + $0x70] sm:$0xff]  }
 0x5d0   :  { %13377 = vmatpush3.bf16.msra.mxu1 %v16940_v35  ;;  %13316 = vmatprep.mubr.bf16.mxu1 %v16371_v8  ;;  %v15256_v8 = vld [vmem:[#allocation8 + $0x78] sm:$0xff]   ;;  %v17083_v35 = vld [vmem:[#allocation2 + $0x8] sm:$0xff] }
 0x5d1   :  { %13378 = vmatprep.subr.bf16.mxu1 %v15250_v28 }
 0x5d4   :  { %13379 = vmatpush3.bf16.msra.mxu1 %v15250_v28  ;;  %v15368_v28 = vld [vmem:[#allocation2 + $0x80] sm:$0xff] }
 0x5d5   :  { %13380 = vmatprep.subr.bf16.mxu1 %v15251_v15 }
 0x5d7   :  { %13317 = vmatmul.mubr.bf16.gmra.mrb[36].mxu1 %v16374_v7  ;;  %v15257_v7 = vld [vmem:[#allocation8 + $0x80] sm:$0xff]  }
 0x5d8   :  { %13320 = vmatprep.mubr.bf16.mxu1 %v16377_v34  ;;  %13381 = vmatpush3.bf16.msra.mxu1 %v15251_v15  ;;  %v15361_v34 = vld [vmem:[#allocation3 + $0x78] sm:$0xff]  }
 0x5d9   :  { %13382 = vmatprep.subr.bf16.mxu1 %v15252_v20  ;;  %v15369_v15 = vld [vmem:[#allocation2 + $0x98] sm:$0xff] }
 0x5dc   :  { %13383 = vmatpush3.bf16.msra.mxu1 %v15252_v20  ;;  %v15263_v20 = vld [vmem:[#allocation8 + $0xb0] sm:$0xff]  }
 0x5dd   :  { %13384 = vmatprep.subr.bf16.mxu1 %v15253_v27 }
 0x5df   :  { %13321 = vmatmul.mubr.bf16.gmra.mrb[40].mxu1 %v16380_v37  ;;  %v18152_v37 = vld [vmem:[#allocation54_spill] sm:$0xff] }
 0x5e0   :  { %13324 = vmatprep.mubr.bf16.mxu1 %v16383_v50  ;;  %13385 = vmatpush3.bf16.msra.mxu1 %v15253_v27  ;;  %v15264_v27 = vld [vmem:[#allocation8 + $0xb8] sm:$0xff]  }
 0x5e1   :  { %13386 = vmatprep.subr.bf16.mxu1 %v15254_v49 }
 0x5e4   :  { %13387 = vmatpush3.bf16.msra.mxu1 %v15254_v49  ;;  %v15370_v49 = vld [vmem:[#allocation2 + $0xb0] sm:$0xff] }
 0x5e5   :  { %13388 = vmatprep.subr.bf16.mxu1 %v15255_v13 }
 0x5e7   :  { %13325 = vmatmul.mubr.bf16.gmra.mrb[44].mxu1 %v18070_v5 }
 0x5e8   :  { %13328 = vmatprep.mubr.bf16.mxu1 %v18071_v52  ;;  %13389 = vmatpush3.bf16.msra.mxu1 %v15255_v13  ;;  %v15371_v13 = vld [vmem:[#allocation2 + $0xc8] sm:$0xff] }
 0x5e9   :  { %13390 = vmatprep.subr.bf16.mxu1 %v15256_v8 }
 0x5ec   :  { %13391 = vmatpush3.bf16.msra.mxu1 %v15256_v8  ;;  %v17110_v8 = vld [vmem:[#allocation8 + $0xc0] sm:$0xff]  }
 0x5ed   :  { %13456 = vmatprep.subr.bf16.mxu1 %v15257_v7 }
 0x5ef   :  { %13329 = vmatmul.mubr.bf16.gmra.mrb[48].mxu1 %v18072_v21 }
 0x5f0   :  { %13332 = vmatprep.mubr.bf16.mxu1 %v18073_v32 }
 0x5f7   :  { %13333 = vmatmul.mubr.bf16.gmra.mrb[52].mxu1 %v18074_v60 }
 0x5f8   :  { %13336 = vmatprep.mubr.bf16.mxu1 %v18075_v44 }
 0x5ff   :  { %13337 = vmatmul.mubr.bf16.gmra.mrb[56].mxu1 %v18076_v61 }
 0x600   :  { %13340 = vmatprep.mubr.bf16.mxu1 %v18077_v55 }
 0x607   :  { %13341 = vmatmul.mubr.bf16.gmra.mrb[60].mxu1 %v15361_v34  ;;  %v15373_v34 = vld [vmem:[#allocation2 + $0xf8] sm:$0xff] }
 0x608   :  { %13344 = vmatprep.mubr.bf16.mxu1 %v18152_v37  ;;  %v15374_v37 = vld [vmem:[#allocation2 + $0x110] sm:$0xff] }
 0x60f   :  { %13345 = vmatmul.mubr.bf16.gmra.mrb[0].mxu1 %v18079_v48 }
 0x610   :  { %13348 = vmatprep.mubr.bf16.mxu1 %v18080_v19 }
 0x617   :  { %13349 = vmatmul.mubr.bf16.gmra.mrb[4].mxu1 %v18081_v31 }
 0x618   :  { %13352 = vmatprep.mubr.bf16.mxu1 %v18082_v33 }
 0x61f   :  { %13353 = vmatmul.mubr.bf16.gmra.mrb[8].mxu1 %v18083_v2 }
 0x620   :  { %13356 = vmatprep.mubr.bf16.mxu1 %v18084_v51 }
 0x622   :  { %v17035_v50 = vpop.f32.mrb[64].mxu0 }
 0x623   :  { %18153 = vst [vmem:[#allocation27_spill] sm:$0xff] %v17035_v50  ;;  %v17037_v5 = vpop.f32.mrb[65].mxu0  ;;  %v18221_v50 = vld [vmem:[#allocation57_spill] sm:$0xff] }
 0x624   :  { %18154 = vst [vmem:[#allocation28_spill] sm:$0xff] %v17037_v5  ;;  %v17039_v52 = vpop.f32.mrb[66].mxu0 }
 0x625   :  { %18155 = vst [vmem:[#allocation29_spill] sm:$0xff] %v17039_v52  ;;  %v17041_v21 = vpop.f32.mrb[67].mxu0 }
 0x626   :  { %18156 = vst [vmem:[#allocation38_spill] sm:$0xff] %v17041_v21 }
 0x627   :  { %13357 = vmatmul.mubr.bf16.gmra.mrb[12].mxu1 %v18085_v9 }
 0x628   :  { %13360 = vmatprep.mubr.bf16.mxu1 %v18086_v12 }
 0x62a   :  { %v17045_v32 = vpop.f32.mrb[68].mxu0 }
 0x62b   :  { %18157 = vst [vmem:[#allocation39_spill] sm:$0xff] %v17045_v32  ;;  %v17047_v60 = vpop.f32.mrb[69].mxu0 }
 0x62c   :  { %18158 = vst [vmem:[#allocation40_spill] sm:$0xff] %v17047_v60  ;;  %v17049_v44 = vpop.f32.mrb[70].mxu0  ;;  %v18219_v60 = vld [vmem:[#allocation44_spill] sm:$0xff] }
 0x62d   :  { %18159 = vst [vmem:[#allocation41_spill] sm:$0xff] %v17049_v44  ;;  %v17051_v61 = vpop.f32.mrb[71].mxu0  ;;  %v18218_v44 = vld [vmem:[#allocation51_spill] sm:$0xff] }
 0x62e   :  { %18160 = vst [vmem:[#allocation42_spill] sm:$0xff] %v17051_v61 }
 0x62f   :  { %13361 = vmatmul.mubr.bf16.gmra.mrb[16].mxu1 %v18087_v41 }
 0x630   :  { %13364 = vmatprep.mubr.bf16.mxu1 %v18088_v62 }
 0x632   :  { %v17055_v55 = vpop.f32.mrb[72].mxu0 }
 0x633   :  { %18161 = vst [vmem:[#allocation43_spill] sm:$0xff] %v17055_v55  ;;  %v17057_v48 = vpop.f32.mrb[73].mxu0 }
 0x634   :  { %18162 = vst [vmem:[#allocation45_spill] sm:$0xff] %v17057_v48  ;;  %v17059_v19 = vpop.f32.mrb[74].mxu0 }
 0x635   :  { %18163 = vst [vmem:[#allocation54_spill] sm:$0xff] %v17059_v19  ;;  %v17061_v31 = vpop.f32.mrb[75].mxu0 }
 0x636   :  { %18164 = vst [vmem:[#allocation69_spill] sm:$0xff] %v17061_v31 }
 0x637   :  { %13365 = vmatmul.mubr.bf16.gmra.mrb[20].mxu1 %v18089_v3 }
 0x638   :  { %13368 = vmatprep.mubr.bf16.mxu1 %v18090_v23  ;;  %v15362_v23 = vld [vmem:[#allocation3 + $0xf8] sm:$0xff]  }
 0x63a   :  { %v17065_v33 = vpop.f32.mrb[76].mxu0 }
 0x63b   :  { %18165 = vst [vmem:[#allocation70_spill] sm:$0xff] %v17065_v33  ;;  %v17067_v2 = vpop.f32.mrb[77].mxu0 }
 0x63c   :  { %18166 = vst [vmem:[#allocation71_spill] sm:$0xff] %v17067_v2  ;;  %v17069_v51 = vpop.f32.mrb[78].mxu0 }
 0x63d   :  { %18167 = vst [vmem:[#allocation72_spill] sm:$0xff] %v17069_v51  ;;  %v17071_v9 = vpop.f32.mrb[79].mxu0 }
 0x63e   :  { %18168 = vst [vmem:[#allocation73_spill] sm:$0xff] %v17071_v9 }
 0x63f   :  { %13369 = vmatmul.mubr.bf16.gmra.mrb[24].mxu1 %v18091_v30 }
 0x640   :  { %13372 = vmatprep.mubr.bf16.mxu1 %v18092_v36 }
 0x642   :  { %v17075_v12 = vpop.f32.mrb[80].mxu0 }
 0x643   :  { %18169 = vst [vmem:[#allocation74_spill] sm:$0xff] %v17075_v12  ;;  %v17077_v41 = vpop.f32.mrb[81].mxu0 }
 0x644   :  { %18170 = vst [vmem:[#allocation75_spill] sm:$0xff] %v17077_v41  ;;  %v17079_v62 = vpop.f32.mrb[82].mxu0 }
 0x645   :  { %18171 = vst [vmem:[#allocation76_spill] sm:$0xff] %v17079_v62  ;;  %v17081_v3 = vpop.f32.mrb[83].mxu0 }
 0x646   :  { %18172 = vst [vmem:[#allocation77_spill] sm:$0xff] %v17081_v3 }
 0x647   :  { %13373 = vmatmul.mubr.bf16.gmra.mrb[28].mxu1 %v15362_v23  ;;  %v15375_v23 = vld [vmem:[#allocation2 + $0x128] sm:$0xff] }
 0x648   :  { %13392 = vmatprep.mubr.bf16.mxu1 %v17083_v35 }
 0x64a   :  { %v17086_v1 = vpop.f32.mrb[84].mxu0 }
 0x64b   :  { %18173 = vst [vmem:[#allocation78_spill] sm:$0xff] %v17086_v1  ;;  %v17088_v6 = vpop.f32.mrb[85].mxu0 }
 0x64c   :  { %18174 = vst [vmem:[#allocation79_spill] sm:$0xff] %v17088_v6  ;;  %v17090_v30 = vpop.f32.mrb[86].mxu0 }
 0x64d   :  { %18175 = vst [vmem:[#allocation80_spill] sm:$0xff] %v17090_v30  ;;  %v17092_v36 = vpop.f32.mrb[87].mxu0 }
 0x64e   :  { %18176 = vst [vmem:[#allocation81_spill] sm:$0xff] %v17092_v36 }
 0x64f   :  { %13393 = vmatmul.mubr.bf16.vlgmr.msra.gmra.mrb[32].mxu1 %v15364_v45  ;;  %v18186_v45 = vld [vmem:[#allocation52_spill] sm:$0xff] }
 0x650   :  { %13396 = vmatprep.mubr.bf16.mxu1 %v15365_v0  ;;  %13457 = vmatpush3.bf16.msra.mxu1 %v15257_v7  ;;  %v15372_v7 = vld [vmem:[#allocation2 + $0xe0] sm:$0xff] }
 0x651   :  { %13458 = vmatprep.subr.bf16.mxu1 %v15258_v58  ;;  %v18187_v0 = vld [vmem:[#allocation56_spill] sm:$0xff] }
 0x652   :  { %v17094_v47 = vpop.f32.mrb[88].mxu0 }
 0x653   :  { %18177 = vst [vmem:[#allocation82_spill] sm:$0xff] %v17094_v47  ;;  %v17096_v24 = vpop.f32.mrb[89].mxu0  ;;  %v5667_v47 = vld [vmem:[#allocation2 + $0x140] sm:$0xff] }
 0x654   :  { %18178 = vst [vmem:[#allocation83_spill] sm:$0xff] %v17096_v24  ;;  %v17098_v38 = vpop.f32.mrb[90].mxu0  ;;  %13459 = vmatpush3.bf16.msra.mxu1 %v15258_v58  ;;  %v18185_v58 = vld [vmem:[#allocation53_spill] sm:$0xff] }
 0x655   :  { %18179 = vst [vmem:[#allocation84_spill] sm:$0xff] %v17098_v38  ;;  %v17100_v54 = vpop.f32.mrb[91].mxu0  ;;  %13460 = vmatprep.subr.bf16.mxu1 %v15259_v18  ;;  %v5663_v38 = vld [vmem:[#allocation2 + $0x110] sm:$0xff] }
 0x656   :  { %18180 = vst [vmem:[#allocation85_spill] sm:$0xff] %v17100_v54 }
 0x657   :  { %13397 = vmatmul.mubr.bf16.gmra.mrb[36].mxu1 %v15366_v40  ;;  %v18190_v40 = vld [vmem:[#allocation59_spill] sm:$0xff] }
 0x658   :  { %13400 = vmatprep.mubr.bf16.mxu1 %v15367_v17  ;;  %13461 = vmatpush3.bf16.msra.mxu1 %v15259_v18  ;;  %v18188_v18 = vld [vmem:[#allocation55_spill] sm:$0xff]  ;;  %v18191_v17 = vld [vmem:[#allocation64_spill] sm:$0xff] }
 0x659   :  { %13462 = vmatprep.subr.bf16.mxu1 %v15260_v26 }
 0x65a   :  { %v17102_v43 = vpop.f32.mrb[92].mxu0 }
 0x65b   :  { %18181 = vst [vmem:[#allocation86_spill] sm:$0xff] %v17102_v43  ;;  %v17104_v42 = vpop.f32.mrb[93].mxu0  ;;  %v5659_v43 = vld [vmem:[#allocation2 + $0xe0] sm:$0xff] }
 0x65c   :  { %18182 = vst [vmem:[#allocation87_spill] sm:$0xff] %v17104_v42  ;;  %v17106_v56 = vpop.f32.mrb[94].mxu0  ;;  %13463 = vmatpush3.bf16.msra.mxu1 %v15260_v26  ;;  %v18189_v26 = vld [vmem:[#allocation60_spill] sm:$0xff] }
 0x65d   :  { %18183 = vst [vmem:[#allocation88_spill] sm:$0xff] %v17106_v56  ;;  %v17108_v22 = vpop.f32.mrb[95].mxu0  ;;  %13464 = vmatprep.subr.bf16.mxu1 %v15261_v4  ;;  %v5657_v56 = vld [vmem:[#allocation2 + $0xc8] sm:$0xff] }
 0x65e   :  { %18184 = vst [vmem:[#allocation89_spill] sm:$0xff] %v17108_v22 }
 0x65f   :  { %13401 = vmatmul.mubr.bf16.gmra.mrb[40].mxu1 %v15368_v28  ;;  %v18196_v28 = vld [vmem:[#allocation21_spill] sm:$0xff] }
 0x660   :  { %13404 = vmatprep.mubr.bf16.mxu1 %v15369_v15  ;;  %13465 = vmatpush3.bf16.msra.mxu1 %v15261_v4  ;;  %v5642_v15 = vld [vmem:[#allocation2 + $0x10] sm:$0x1] }
 0x661   :  { %13466 = vmatprep.subr.bf16.mxu1 %v15262_v25 }
 0x664   :  { %13467 = vmatpush3.bf16.msra.mxu1 %v15262_v25  ;;  %v5713_v25 = vsel %vm637_vm9, %v17083_v35, 0 }
 0x665   :  { %13468 = vmatprep.subr.bf16.mxu1 %v15263_v20 }
 0x667   :  { %13405 = vmatmul.mubr.bf16.gmra.mrb[44].mxu1 %v15370_v49  ;;  %v18295_v49 = vld [vmem:[#allocation28_spill] sm:$0xff] }
 0x668   :  { %13408 = vmatprep.mubr.bf16.mxu1 %v15371_v13  ;;  %13469 = vmatpush3.bf16.msra.mxu1 %v15263_v20  ;;  %v18197_v20 = vld [vmem:[#allocation20_spill] sm:$0xff]  ;;  %v5714_v13 = vsel %vm638_vm10, %v5642_v15, 0 }
 0x669   :  { %13470 = vmatprep.subr.bf16.mxu1 %v15264_v27 }
 0x66c   :  { %13471 = vmatpush3.bf16.msra.mxu1 %v15264_v27  ;;  %v7312_v27 = vshll.u32 %v5713_v25, 16 }
 0x66d   :  { %13536 = vmatprep.subr.bf16.mxu1 %v17110_v8 }
 0x66f   :  { %13409 = vmatmul.mubr.bf16.gmra.mrb[48].mxu1 %v15372_v7  ;;  %v5643_v7 = vld [vmem:[#allocation2 + $0x20] sm:$0xff] }
 0x670   :  { %13412 = vmatprep.mubr.bf16.mxu1 %v15373_v34  ;;  %v7310_v34 = vshrl.u32 %v5713_v25, 16  ;;  %v5649_v25 = vld [vmem:[#allocation2 + $0x68] sm:$0xff] }
 0x677   :  { %13413 = vmatmul.mubr.bf16.gmra.mrb[52].mxu1 %v15374_v37  ;;  %v7314_v37 = vrot.slane %v7312_v27, 1 }
 0x678   :  { %13416 = vmatprep.mubr.bf16.mxu1 %v15375_v23  ;;  %v7317_v23 = vshll.u32 %v5714_v13, 16 }
 0x67f   :  { %13417 = vmatmul.mubr.bf16.gmra.mrb[56].mxu1 %v16759_v46  ;;  %v18192_v46 = vld [vmem:[#allocation63_spill] sm:$0xff] }
 0x680   :  { %13420 = vmatprep.mubr.bf16.mxu1 %v16757_v63  ;;  %v18193_v63 = vld [vmem:[#allocation68_spill] sm:$0xff] }
 0x687   :  { %13421 = vmatmul.mubr.bf16.gmra.mrb[60].mxu1 %v16783_v14  ;;  %v18194_v14 = vld [vmem:[#allocation67_spill] sm:$0xff] }
 0x688   :  { %13424 = vmatprep.mubr.bf16.mxu1 %v17083_v35  ;;  %v5644_v35 = vld [vmem:[#allocation2 + $0x28] sm:$0x1] }
 0x68f   :  { %13425 = vmatmul.mubr.bf16.gmra.mrb[0].mxu1 %v18185_v58  ;;  %v5645_v58 = vld [vmem:[#allocation2 + $0x38] sm:$0xff] }
 0x690   :  { %13428 = vmatprep.mubr.bf16.mxu1 %v18186_v45  ;;  %v5715_v45 = vsel %vm637_vm9, %v5643_v7, 0 }
 0x691   :  { %v7322_v7 = vshrl.u32 %v5715_v45, 16 }
 0x697   :  { %13429 = vmatmul.mubr.bf16.gmra.mrb[4].mxu1 %v18187_v0  ;;  %v5717_v0 = vsel %vm637_vm9, %v5645_v58, 0  ;;  %v5650_v58 = vld [vmem:[#allocation2 + $0x70] sm:$0x1] }
 0x698   :  { %13432 = vmatprep.mubr.bf16.mxu1 %v18188_v18  ;;  %v17140_v18 = vor.u32 %v7314_v37, %v7310_v34  ;;  %v5648_v34 = vld [vmem:[#allocation2 + $0x58] sm:$0x1]  ;;  %v5721_v37 = vsel %vm637_vm9, %v5649_v25, 0 }
 0x69f   :  { %13433 = vmatmul.mubr.bf16.gmra.mrb[8].mxu1 %v18189_v26  ;;  %v7319_v26 = vrot.slane %v7317_v23, 1  ;;  %v7334_v23 = vshrl.u32 %v5717_v0, 16 }
 0x6a0   :  { %13436 = vmatprep.mubr.bf16.mxu1 %v18190_v40  ;;  %v5646_v40 = vld [vmem:[#allocation2 + $0x40] sm:$0x1] }
 0x6a7   :  { %13437 = vmatmul.mubr.bf16.gmra.mrb[12].mxu1 %v18191_v17  ;;  %v7324_v17 = vshll.u32 %v5715_v45, 16  ;;  %v15266_v45 = vld [vmem:[#allocation8 + $0xc8] sm:$0xff]  }
 0x6a8   :  { %13440 = vmatprep.mubr.bf16.mxu1 %v18192_v46  ;;  %v5716_v46 = vsel %vm638_vm10, %v5644_v35, 0 }
 0x6a9   :  { %v7329_v15 = vshll.u32 %v5716_v46, 16 }
 0x6af   :  { %13441 = vmatmul.mubr.bf16.gmra.mrb[16].mxu1 %v18193_v63  ;;  %v7336_v63 = vshll.u32 %v5717_v0, 16 }
 0x6b0   :  { %13444 = vmatprep.mubr.bf16.mxu1 %v18194_v14  ;;  %v5647_v14 = vld [vmem:[#allocation2 + $0x50] sm:$0xff] }
 0x6b1   :  { %v5719_v13 = vsel %vm637_vm9, %v5647_v14, 0  ;;  %v5651_v14 = vld [vmem:[#allocation2 + $0x80] sm:$0xff] }
 0x6b7   :  { %13445 = vmatmul.mubr.bf16.gmra.mrb[20].mxu1 %v18196_v28  ;;  %v7326_v28 = vrot.slane %v7324_v17, 1 }
 0x6b8   :  { %13448 = vmatprep.mubr.bf16.mxu1 %v18197_v20  ;;  %v7338_v20 = vrot.slane %v7336_v63, 1  ;;  %v7360_v63 = vshll.u32 %v5721_v37, 16 }
 0x6b9   :  { %v7327_v35 = vor.u32 %v7326_v28, %v7322_v7  ;;  %v7346_v7 = vshrl.u32 %v5719_v13, 16 }
 0x6ba   :  { %v7339_v17 = vor.u32 %v7338_v20, %v7334_v23 }
 0x6bf   :  { %13449 = vmatmul.mubr.bf16.gmra.mrb[24].mxu1 %v16974_v11  ;;  %v5718_v11 = vsel %vm638_vm10, %v5646_v40, 0  ;;  %v7348_v40 = vshll.u32 %v5719_v13, 16  ;;  %v5655_v13 = vld [vmem:[#allocation2 + $0xb0] sm:$0xff] }
 0x6c0   :  { %13452 = vmatprep.mubr.bf16.mxu1 %v16972_v10  ;;  %v7320_v10 = vsel %vm1835_vm11, %v17140_v18, %v7319_v26  ;;  %v7341_v27 = vshll.u32 %v5718_v11, 16  ;;  %v7331_v26 = vrot.slane %v7329_v15, 1  ;;  %v5722_v11 = vsel %vm638_vm10, %v5650_v58, 0 }
 0x6c1   :  { %v7350_v0 = vrot.slane %v7348_v40, 1  ;;  %v7362_v15 = vrot.slane %v7360_v63, 1  ;;  %v7365_v20 = vshll.u32 %v5722_v11, 16  ;;  %v7358_v58 = vshrl.u32 %v5721_v37, 16  ;;  %v15268_v37 = vld [vmem:[#allocation8 + $0xd8] sm:$0xff]  }
 0x6c2   :  { %v7343_v46 = vrot.slane %v7341_v27, 1  ;;  %v17158_v22 = vsel %vm1835_vm11, %v7327_v35, %v7331_v26  ;;  %v5723_v27 = vsel %vm637_vm9, %v5651_v14, 0  ;;  %v5654_v35 = vld [vmem:[#allocation2 + $0xa0] sm:$0x1]  ;;  %v15267_v26 = vld [vmem:[#allocation8 + $0xd0] sm:$0xff]  }
 0x6c3   :  { %v7351_v40 = vor.u32 %v7350_v0, %v7346_v7  ;;  %v7367_v63 = vrot.slane %v7365_v20, 1 }
 0x6c4   :  { %v17162_v28 = vsel %vm1835_vm11, %v7339_v17, %v7343_v46  ;;  %v7372_v46 = vshll.u32 %v5723_v27, 16 }
 0x6c6   :  { %v7374_v0 = vrot.slane %v7372_v46, 1  ;;  %v15269_v46 = vld [vmem:[#allocation8 + $0xe0] sm:$0xff]  }
 0x6c7   :  { %13453 = vmatmul.mubr.bf16.gmra.mrb[28].mxu1 %v16994_v39  ;;  %v5720_v39 = vsel %vm638_vm10, %v5648_v34, 0  ;;  %v5652_v34 = vld [vmem:[#allocation2 + $0x88] sm:$0x1] }
 0x6c8   :  { %13472 = vmatprep.mubr.bf16.mxu1 %v7320_v10  ;;  %v5653_v10 = vld [vmem:[#allocation2 + $0x98] sm:$0xff]  ;;  %v7353_v25 = vshll.u32 %v5720_v39, 16  ;;  %v7363_v39 = vor.u32 %v7362_v15, %v7358_v58  ;;  %v5724_v11 = vsel %vm638_vm10, %v5652_v34, 0  ;;  %v5727_v34 = vsel %vm637_vm9, %v5655_v13, 0 }
 0x6c9   :  { %v5725_v23 = vsel %vm637_vm9, %v5653_v10, 0  ;;  %v5656_v58 = vld [vmem:[#allocation2 + $0xb8] sm:$0x1] }
 0x6ca   :  { %v7355_v17 = vrot.slane %v7353_v25, 1  ;;  %v7384_v14 = vshll.u32 %v5725_v23, 16  ;;  %v7377_v25 = vshll.u32 %v5724_v11, 16  ;;  %v17179_v15 = vsel %vm1835_vm11, %v7363_v39, %v7367_v63 }
 0x6cb   :  { %v7396_v63 = vshll.u32 %v5727_v34, 16  ;;  %v5728_v13 = vsel %vm638_vm10, %v5656_v58, 0  ;;  %v5731_v58 = vsel %vm637_vm9, %v5659_v43, 0 }
 0x6cc   :  { %v17175_v10 = vsel %vm1835_vm11, %v7351_v40, %v7355_v17  ;;  %v7386_v20 = vrot.slane %v7384_v14, 1  ;;  %v7382_v40 = vshrl.u32 %v5725_v23, 16  ;;  %v5658_v17 = vld [vmem:[#allocation2 + $0xd0] sm:$0x1]  ;;  %v7379_v39 = vrot.slane %v7377_v25, 1  ;;  %v15270_v23 = vld [vmem:[#allocation8 + $0xe8] sm:$0xff]  }
 0x6cd   :  { %v7401_v25 = vshll.u32 %v5728_v13, 16 }
 0x6ce   :  { %v7387_v14 = vor.u32 %v7386_v20, %v7382_v40  ;;  %v5660_v40 = vld [vmem:[#allocation2 + $0xe8] sm:$0x1] }
 0x6cf   :  { %13473 = vmatmul.mubr.bf16.vlgmr.msra.gmra.mrb[32].mxu1 %v17158_v22  ;;  %v5732_v43 = vsel %vm638_vm10, %v5660_v40, 0  ;;  %v5735_v40 = vsel %vm637_vm9, %v5663_v38, 0 }
 0x6d0   :  { %13476 = vmatprep.mubr.bf16.mxu1 %v17162_v28  ;;  %13537 = vmatpush3.bf16.msra.mxu1 %v17110_v8  ;;  %v5726_v8 = vsel %vm638_vm10, %v5654_v35, 0  ;;  %v5729_v35 = vsel %vm637_vm9, %v5657_v56, 0  ;;  %v5661_v56 = vld [vmem:[#allocation2 + $0xf8] sm:$0xff] }
 0x6d1   :  { %13538 = vmatprep.subr.bf16.mxu1 %v15266_v45  ;;  %v7389_v7 = vshll.u32 %v5726_v8, 16  ;;  %v7408_v42 = vshll.u32 %v5729_v35, 16 }
 0x6d3   :  { %v7391_v8 = vrot.slane %v7389_v7, 1  ;;  %v7410_v7 = vrot.slane %v7408_v42, 1 }
 0x6d4   :  { %13539 = vmatpush3.bf16.msra.mxu1 %v15266_v45  ;;  %v7370_v45 = vshrl.u32 %v5723_v27, 16  ;;  %v5730_v27 = vsel %vm638_vm10, %v5658_v17, 0  ;;  %v5733_v17 = vsel %vm637_vm9, %v5661_v56, 0  ;;  %v5665_v56 = vld [vmem:[#allocation2 + $0x128] sm:$0xff] }
 0x6d5   :  { %13540 = vmatprep.subr.bf16.mxu1 %v15267_v26  ;;  %v17195_v20 = vsel %vm1835_vm11, %v7387_v14, %v7391_v8  ;;  %v7403_v14 = vrot.slane %v7401_v25, 1  ;;  %v7420_v8 = vshll.u32 %v5731_v58, 16  ;;  %v7432_v54 = vshll.u32 %v5733_v17, 16 }
 0x6d6   :  { %v7375_v11 = vor.u32 %v7374_v0, %v7370_v45  ;;  %v7398_v0 = vrot.slane %v7396_v63, 1  ;;  %v7413_v45 = vshll.u32 %v5730_v27, 16  ;;  %v15271_v63 = vld [vmem:[#allocation8 + $0xf0] sm:$0xff]   ;;  %v7425_v25 = vshll.u32 %v5732_v43, 16 }
 0x6d7   :  { %13477 = vmatmul.mubr.bf16.gmra.mrb[36].mxu1 %v17175_v10 }
 0x6d8   :  { %13480 = vmatprep.mubr.bf16.mxu1 %v17179_v15  ;;  %13541 = vmatpush3.bf16.msra.mxu1 %v15267_v26  ;;  %v17191_v26 = vsel %vm1835_vm11, %v7375_v11, %v7379_v39  ;;  %v7406_v11 = vshrl.u32 %v5729_v35, 16  ;;  %v5662_v39 = vld [vmem:[#allocation2 + $0x100] sm:$0x1]  ;;  %v7415_v27 = vrot.slane %v7413_v45, 1  ;;  %v15272_v35 = vld [vmem:[#allocation8 + $0xf8] sm:$0xff]   ;;  %v7434_v45 = vrot.slane %v7432_v54, 1 }
 0x6d9   :  { %13542 = vmatprep.subr.bf16.mxu1 %v15268_v37  ;;  %v7444_v54 = vshll.u32 %v5735_v40, 16 }
 0x6da   :  { %v7411_v42 = vor.u32 %v7410_v7, %v7406_v11  ;;  %v5664_v11 = vld [vmem:[#allocation2 + $0x118] sm:$0x1] }
 0x6db   :  { %v5736_v38 = vsel %vm638_vm10, %v5664_v11, 0  ;;  %v5668_v11 = vld [vmem:[#allocation2 + $0x148] sm:$0x1] }
 0x6dc   :  { %13543 = vmatpush3.bf16.msra.mxu1 %v15268_v37  ;;  %v7394_v37 = vshrl.u32 %v5727_v34, 16  ;;  %v5734_v34 = vsel %vm638_vm10, %v5662_v39, 0  ;;  %v17211_v7 = vsel %vm1835_vm11, %v7411_v42, %v7415_v27  ;;  %v5737_v39 = vsel %vm637_vm9, %v5665_v56, 0 }
 0x6dd   :  { %13544 = vmatprep.subr.bf16.mxu1 %v15269_v46  ;;  %18199 = vst [vmem:[#allocation53_spill] sm:$0xff] %v17211_v7  ;;  %v7427_v27 = vrot.slane %v7425_v25, 1  ;;  %v7456_v24 = vshll.u32 %v5737_v39, 16  ;;  %v7446_v56 = vrot.slane %v7444_v54, 1 }
 0x6de   :  { %v7399_v13 = vor.u32 %v7398_v0, %v7394_v37  ;;  %v7422_v0 = vrot.slane %v7420_v8, 1  ;;  %v7437_v37 = vshll.u32 %v5734_v34, 16  ;;  %v17218_v8 = vld [vmem:[#allocation8 + $0x100] sm:$0xff]  }
 0x6df   :  { %13481 = vmatmul.mubr.bf16.gmra.mrb[40].mxu1 %v17191_v26 }
 0x6e0   :  { %13484 = vmatprep.mubr.bf16.mxu1 %v17195_v20  ;;  %13545 = vmatpush3.bf16.msra.mxu1 %v15269_v46  ;;  %v17207_v46 = vsel %vm1835_vm11, %v7399_v13, %v7403_v14  ;;  %v7430_v13 = vshrl.u32 %v5733_v17, 16  ;;  %v5666_v14 = vld [vmem:[#allocation2 + $0x130] sm:$0x1]  ;;  %v7439_v34 = vrot.slane %v7437_v37, 1 }
 0x6e1   :  { %13546 = vmatprep.subr.bf16.mxu1 %v15270_v23 }
 0x6e2   :  { %v7435_v43 = vor.u32 %v7434_v45, %v7430_v13  ;;  %v7458_v45 = vrot.slane %v7456_v24, 1  ;;  %v5740_v24 = vsel %vm638_vm10, %v5668_v11, 0  ;;  %v5672_v11 = vld [vmem:[#allocation2 + $0x178] sm:$0x1] }
 0x6e4   :  { %13547 = vmatpush3.bf16.msra.mxu1 %v15270_v23  ;;  %v7418_v23 = vshrl.u32 %v5731_v58, 16  ;;  %v5738_v58 = vsel %vm638_vm10, %v5666_v14, 0  ;;  %v17230_v25 = vsel %vm1835_vm11, %v7435_v43, %v7439_v34  ;;  %v7454_v14 = vshrl.u32 %v5737_v39, 16 }
 0x6e5   :  { %13548 = vmatprep.subr.bf16.mxu1 %v15271_v63  ;;  %18201 = vst [vmem:[#allocation56_spill] sm:$0xff] %v17230_v25  ;;  %v7461_v37 = vshll.u32 %v5738_v58, 16  ;;  %v5671_v58 = vld [vmem:[#allocation2 + $0x170] sm:$0xff] }
 0x6e6   :  { %v7423_v42 = vor.u32 %v7422_v0, %v7418_v23  ;;  %v7449_v0 = vshll.u32 %v5736_v38, 16  ;;  %v5739_v23 = vsel %vm637_vm9, %v5667_v47, 0  ;;  %v7459_v36 = vor.u32 %v7458_v45, %v7454_v14 }
 0x6e7   :  { %13485 = vmatmul.mubr.bf16.gmra.mrb[44].mxu1 %v17207_v46  ;;  %v7468_v38 = vshll.u32 %v5739_v23, 16  ;;  %v7463_v43 = vrot.slane %v7461_v37, 1  ;;  %v5743_v45 = vsel %vm637_vm9, %v5671_v58, 0  ;;  %v5678_v37 = vld [vmem:[#allocation2 + $0x1c0] sm:$0x1]  ;;  %v5681_v58 = vld [vmem:[#allocation2 + $0x1e8] sm:$0xff] }
 0x6e8   :  { %13488 = vmatprep.mubr.bf16.mxu1 %v17211_v7  ;;  %13549 = vmatpush3.bf16.msra.mxu1 %v15271_v63  ;;  %v5669_v63 = vld [vmem:[#allocation2 + $0x158] sm:$0xff]  ;;  %v17226_v17 = vsel %vm1835_vm11, %v7423_v42, %v7427_v27  ;;  %v5670_v42 = vld [vmem:[#allocation2 + $0x160] sm:$0x1]  ;;  %v7451_v54 = vrot.slane %v7449_v0, 1 }
 0x6e9   :  { %13550 = vmatprep.subr.bf16.mxu1 %v15272_v35  ;;  %18200 = vst [vmem:[#allocation52_spill] sm:$0xff] %v17226_v17  ;;  %v5741_v13 = vsel %vm637_vm9, %v5669_v63, 0  ;;  %v5742_v47 = vsel %vm638_vm10, %v5670_v42, 0  ;;  %v7470_v30 = vrot.slane %v7468_v38, 1  ;;  %v7473_v63 = vshll.u32 %v5740_v24, 16 }
 0x6ea   :  { %v7480_v34 = vshll.u32 %v5741_v13, 16  ;;  %v17246_v39 = vsel %vm1835_vm11, %v7459_v36, %v7463_v43  ;;  %v7485_v0 = vshll.u32 %v5742_v47, 16  ;;  %v7478_v14 = vshrl.u32 %v5741_v13, 16 }
 0x6eb   :  { %18203 = vst [vmem:[#allocation60_spill] sm:$0xff] %v17246_v39  ;;  %v5750_v38 = vsel %vm638_vm10, %v5678_v37, 0  ;;  %v5744_v43 = vsel %vm638_vm10, %v5672_v11, 0 }
 0x6ec   :  { %13551 = vmatpush3.bf16.msra.mxu1 %v15272_v35  ;;  %v7442_v35 = vshrl.u32 %v5735_v40, 16  ;;  %v7487_v36 = vrot.slane %v7485_v0, 1  ;;  %v7509_v47 = vshll.u32 %v5750_v38, 16  ;;  %v7497_v1 = vshll.u32 %v5744_v43, 16 }
 0x6ed   :  { %13616 = vmatprep.subr.bf16.mxu1 %v17218_v8  ;;  %v5753_v0 = vsel %vm637_vm9, %v5681_v58, 0 }
 0x6ee   :  { %v7447_v27 = vor.u32 %v7446_v56, %v7442_v35  ;;  %v7482_v56 = vrot.slane %v7480_v34, 1  ;;  %v7466_v35 = vshrl.u32 %v5739_v23, 16  ;;  %v5679_v34 = vld [vmem:[#allocation2 + $0x1d0] sm:$0xff]  ;;  %v7511_v37 = vrot.slane %v7509_v47, 1 }
 0x6ef   :  { %13489 = vmatmul.mubr.bf16.gmra.mrb[48].mxu1 %v17226_v17  ;;  %v5751_v13 = vsel %vm637_vm9, %v5679_v34, 0 }
 0x6f0   :  { %13492 = vmatprep.mubr.bf16.mxu1 %v17230_v25  ;;  %v17242_v40 = vsel %vm1835_vm11, %v7447_v27, %v7451_v54  ;;  %v7471_v42 = vor.u32 %v7470_v30, %v7466_v35  ;;  %v7475_v27 = vrot.slane %v7473_v63, 1  ;;  %v7492_v54 = vshll.u32 %v5743_v45, 16  ;;  %v5682_v35 = vld [vmem:[#allocation2 + $0x1f0] sm:$0x1] }
 0x6f1   :  { %18202 = vst [vmem:[#allocation55_spill] sm:$0xff] %v17242_v40  ;;  %v7483_v24 = vor.u32 %v7482_v56, %v7478_v14  ;;  %v7490_v63 = vshrl.u32 %v5743_v45, 16  ;;  %v5680_v56 = vld [vmem:[#allocation2 + $0x1d8] sm:$0x1]  ;;  %v7499_v14 = vrot.slane %v7497_v1, 1  ;;  %v5754_v38 = vsel %vm638_vm10, %v5682_v35, 0 }
 0x6f2   :  { %v17256_v6 = vsel %vm1835_vm11, %v7471_v42, %v7475_v27  ;;  %v7494_v23 = vrot.slane %v7492_v54, 1  ;;  %v7516_v42 = vshll.u32 %v5751_v13, 16  ;;  %v5752_v27 = vsel %vm638_vm10, %v5680_v56, 0  ;;  %v5684_v56 = vld [vmem:[#allocation2 + $0x208] sm:$0x1] }
 0x6f3   :  { %v17260_v30 = vsel %vm1835_vm11, %v7483_v24, %v7487_v36  ;;  %v7528_v54 = vshll.u32 %v5753_v0, 16  ;;  %v5683_v24 = vld [vmem:[#allocation2 + $0x200] sm:$0xff]  ;;  %v7512_v45 = vsel %vm1835_vm11, %v17140_v18, %v7511_v37  ;;  %v5685_v36 = vld [vmem:[#allocation2 + $0x218] sm:$0xff]  ;;  %v7521_v47 = vshll.u32 %v5752_v27, 16 }
 0x6f4   :  { %v7495_v11 = vor.u32 %v7494_v23, %v7490_v63  ;;  %v7518_v34 = vrot.slane %v7516_v42, 1  ;;  %v7533_v58 = vshll.u32 %v5754_v38, 16  ;;  %v5755_v23 = vsel %vm637_vm9, %v5683_v24, 0  ;;  %v5686_v37 = vld [vmem:[#allocation2 + $0x220] sm:$0x1] }
 0x6f5   :  { %v7530_v1 = vrot.slane %v7528_v54, 1  ;;  %v7514_v63 = vshrl.u32 %v5751_v13, 16  ;;  %v5757_v35 = vsel %vm637_vm9, %v5685_v36, 0  ;;  %v7526_v18 = vshrl.u32 %v5753_v0, 16  ;;  %v5689_v13 = vld [vmem:[#allocation2 + $0x248] sm:$0xff] }
 0x6f6   :  { %v17274_v43 = vsel %vm1835_vm11, %v7495_v11, %v7499_v14  ;;  %v7523_v11 = vrot.slane %v7521_v47, 1  ;;  %v7540_v14 = vshll.u32 %v5755_v23, 16  ;;  %v7535_v27 = vrot.slane %v7533_v58, 1 }
 0x6f7   :  { %13493 = vmatmul.mubr.bf16.gmra.mrb[52].mxu1 %v17242_v40  ;;  %v7519_v3 = vor.u32 %v7518_v34, %v7514_v63  ;;  %v7531_v42 = vor.u32 %v7530_v1, %v7526_v18  ;;  %v5756_v54 = vsel %vm638_vm10, %v5684_v56, 0  ;;  %v7552_v38 = vshll.u32 %v5757_v35, 16  ;;  %v5688_v56 = vld [vmem:[#allocation2 + $0x238] sm:$0x1] }
 0x6f8   :  { %13496 = vmatprep.mubr.bf16.mxu1 %v17246_v39  ;;  %v5758_v24 = vsel %vm638_vm10, %v5686_v37, 0  ;;  %v7542_v36 = vrot.slane %v7540_v14, 1  ;;  %v7545_v0 = vshll.u32 %v5756_v54, 16  ;;  %v7538_v63 = vshrl.u32 %v5755_v23, 16  ;;  %v5690_v37 = vld [vmem:[#allocation2 + $0x250] sm:$0x1] }
 0x6f9   :  { %v17286_v62 = vsel %vm1835_vm11, %v7519_v3, %v7523_v11  ;;  %v17290_v34 = vsel %vm1835_vm11, %v7531_v42, %v7535_v27  ;;  %v7554_v47 = vrot.slane %v7552_v38, 1  ;;  %v7557_v1 = vshll.u32 %v5758_v24, 16  ;;  %v5693_v23 = vld [vmem:[#allocation2 + $0x278] sm:$0xff] }
 0x6fa   :  { %v5761_v3 = vsel %vm637_vm9, %v5689_v13, 0  ;;  %v7550_v18 = vshrl.u32 %v5757_v35, 16  ;;  %v7543_v11 = vor.u32 %v7542_v36, %v7538_v63  ;;  %v7547_v14 = vrot.slane %v7545_v0, 1 }
 0x6fb   :  { %v7559_v42 = vrot.slane %v7557_v1, 1  ;;  %v5760_v27 = vsel %vm638_vm10, %v5688_v56, 0  ;;  %v7576_v38 = vshll.u32 %v5761_v3, 16  ;;  %v5762_v24 = vsel %vm638_vm10, %v5690_v37, 0  ;;  %v5692_v56 = vld [vmem:[#allocation2 + $0x268] sm:$0x1] }
 0x6fc   :  { %v7555_v41 = vor.u32 %v7554_v47, %v7550_v18  ;;  %v17302_v12 = vsel %vm1835_vm11, %v7543_v11, %v7547_v14  ;;  %v7569_v35 = vshll.u32 %v5760_v27, 16  ;;  %v7581_v47 = vshll.u32 %v5762_v24, 16  ;;  %v5694_v11 = vld [vmem:[#allocation2 + $0x280] sm:$0x1] }
 0x6fd   :  { %v7578_v0 = vrot.slane %v7576_v38, 1  ;;  %v5765_v18 = vsel %vm637_vm9, %v5693_v23, 0  ;;  %v7574_v37 = vshrl.u32 %v5761_v3, 16  ;;  %v5766_v24 = vsel %vm638_vm10, %v5694_v11, 0 }
 0x6fe   :  { %v17306_v36 = vsel %vm1835_vm11, %v7555_v41, %v7559_v42  ;;  %v7583_v41 = vrot.slane %v7581_v47, 1  ;;  %v5764_v42 = vsel %vm638_vm10, %v5692_v56, 0  ;;  %v7600_v38 = vshll.u32 %v5765_v18, 16  ;;  %v5696_v56 = vld [vmem:[#allocation2 + $0x298] sm:$0x1] }
 0x6ff   :  { %13497 = vmatmul.mubr.bf16.gmra.mrb[56].mxu1 %v17256_v6  ;;  %v7579_v9 = vor.u32 %v7578_v0, %v7574_v37  ;;  %v7593_v3 = vshll.u32 %v5764_v42, 16  ;;  %v7605_v0 = vshll.u32 %v5766_v24, 16  ;;  %v7598_v11 = vshrl.u32 %v5765_v18, 16 }
 0x700   :  { %13500 = vmatprep.mubr.bf16.mxu1 %v17260_v30 }
 0x707   :  { %13501 = vmatmul.mubr.bf16.gmra.mrb[60].mxu1 %v17274_v43 }
 0x708   :  { %13504 = vmatprep.mubr.bf16.mxu1 %v7512_v45  ;;  %v5687_v45 = vld [vmem:[#allocation2 + $0x230] sm:$0xff] }
 0x709   :  { %v5759_v58 = vsel %vm637_vm9, %v5687_v45, 0  ;;  %v5691_v45 = vld [vmem:[#allocation2 + $0x260] sm:$0xff] }
 0x70a   :  { %v7564_v54 = vshll.u32 %v5759_v58, 16  ;;  %v5763_v1 = vsel %vm637_vm9, %v5691_v45, 0  ;;  %v7562_v63 = vshrl.u32 %v5759_v58, 16  ;;  %v5695_v45 = vld [vmem:[#allocation2 + $0x290] sm:$0xff]  ;;  %v5697_v58 = vld [vmem:[#allocation2 + $0x2a8] sm:$0xff] }
 0x70b   :  { %v7588_v27 = vshll.u32 %v5763_v1, 16  ;;  %v5767_v47 = vsel %vm637_vm9, %v5695_v45, 0  ;;  %v5769_v37 = vsel %vm637_vm9, %v5697_v58, 0  ;;  %v5699_v45 = vld [vmem:[#allocation2 + $0x2c0] sm:$0xff] }
 0x70c   :  { %v7566_v13 = vrot.slane %v7564_v54, 1  ;;  %v7571_v54 = vrot.slane %v7569_v35, 1  ;;  %v7602_v35 = vrot.slane %v7600_v38, 1  ;;  %v7612_v42 = vshll.u32 %v5767_v47, 16 }
 0x70d   :  { %v7590_v23 = vrot.slane %v7588_v27, 1  ;;  %v7595_v27 = vrot.slane %v7593_v3, 1  ;;  %v7624_v38 = vshll.u32 %v5769_v37, 16 }
 0x70e   :  { %v7567_v14 = vor.u32 %v7566_v13, %v7562_v63  ;;  %v17322_v13 = vsel %vm1835_vm11, %v7579_v9, %v7583_v41  ;;  %v7586_v63 = vshrl.u32 %v5763_v1, 16  ;;  %v7603_v2 = vor.u32 %v7602_v35, %v7598_v11  ;;  %v5701_v1 = vld [vmem:[#allocation2 + $0x2d8] sm:$0xff] }
 0x70f   :  { %13505 = vmatmul.mubr.bf16.gmra.mrb[0].mxu1 %v17286_v62  ;;  %v7607_v9 = vrot.slane %v7605_v0, 1  ;;  %v5768_v41 = vsel %vm638_vm10, %v5696_v56, 0  ;;  %v7614_v58 = vrot.slane %v7612_v42, 1  ;;  %v7626_v3 = vrot.slane %v7624_v38, 1  ;;  %v5700_v56 = vld [vmem:[#allocation2 + $0x2c8] sm:$0x1] }
 0x710   :  { %13508 = vmatprep.mubr.bf16.mxu1 %v17290_v34  ;;  %v17318_v51 = vsel %vm1835_vm11, %v7567_v14, %v7571_v54  ;;  %v5698_v14 = vld [vmem:[#allocation2 + $0x2b0] sm:$0x1]  ;;  %v7591_v54 = vor.u32 %v7590_v23, %v7586_v63  ;;  %v7617_v18 = vshll.u32 %v5768_v41, 16  ;;  %v5771_v0 = vsel %vm637_vm9, %v5699_v45, 0 }
 0x711   :  { %v5770_v24 = vsel %vm638_vm10, %v5698_v14, 0  ;;  %v17338_v23 = vsel %vm1835_vm11, %v7603_v2, %v7607_v9  ;;  %v7610_v63 = vshrl.u32 %v5767_v47, 16  ;;  %v5773_v11 = vsel %vm637_vm9, %v5701_v1, 0  ;;  %v5703_v45 = vld [vmem:[#allocation2 + $0x2f0] sm:$0xff]  ;;  %v5705_v47 = vld [vmem:[#allocation2 + $0x308] sm:$0xff] }
 0x712   :  { %v17334_v33 = vsel %vm1835_vm11, %v7591_v54, %v7595_v27  ;;  %v7629_v35 = vshll.u32 %v5770_v24, 16  ;;  %v7622_v14 = vshrl.u32 %v5769_v37, 16  ;;  %v5702_v54 = vld [vmem:[#allocation2 + $0x2e0] sm:$0x1]  ;;  %v7619_v42 = vrot.slane %v7617_v18, 1 }
 0x713   :  { %v7615_v27 = vor.u32 %v7614_v58, %v7610_v63  ;;  %v7636_v41 = vshll.u32 %v5771_v0, 16  ;;  %v5772_v9 = vsel %vm638_vm10, %v5700_v56, 0  ;;  %v7648_v38 = vshll.u32 %v5773_v11, 16  ;;  %v5704_v56 = vld [vmem:[#allocation2 + $0x2f8] sm:$0x1] }
 0x714   :  { %v7627_v31 = vor.u32 %v7626_v3, %v7622_v14  ;;  %v7631_v2 = vrot.slane %v7629_v35, 1  ;;  %v5774_v24 = vsel %vm638_vm10, %v5702_v54, 0  ;;  %v7641_v37 = vshll.u32 %v5772_v9, 16 }
 0x715   :  { %v17350_v19 = vsel %vm1835_vm11, %v7615_v27, %v7619_v42  ;;  %v7638_v1 = vrot.slane %v7636_v41, 1  ;;  %v7650_v18 = vrot.slane %v7648_v38, 1  ;;  %v7653_v3 = vshll.u32 %v5774_v24, 16  ;;  %v5706_v27 = vld [vmem:[#allocation2 + $0x310] sm:$0x1] }
 0x716   :  { %v17354_v58 = vsel %vm1835_vm11, %v7627_v31, %v7631_v2  ;;  %v5775_v35 = vsel %vm637_vm9, %v5703_v45, 0  ;;  %v7634_v63 = vshrl.u32 %v5771_v0, 16  ;;  %v5777_v14 = vsel %vm637_vm9, %v5705_v47, 0  ;;  %v5707_v45 = vld [vmem:[#allocation2 + $0x320] sm:$0xff] }
 0x717   :  { %13509 = vmatmul.mubr.bf16.gmra.mrb[4].mxu1 %v17302_v12  ;;  %v7646_v54 = vshrl.u32 %v5773_v11, 16  ;;  %v7643_v41 = vrot.slane %v7641_v37, 1  ;;  %v7660_v9 = vshll.u32 %v5775_v35, 16  ;;  %v7655_v31 = vrot.slane %v7653_v3, 1 }
 0x718   :  { %13512 = vmatprep.mubr.bf16.mxu1 %v17306_v36  ;;  %v7639_v42 = vor.u32 %v7638_v1, %v7634_v63  ;;  %v5776_v2 = vsel %vm638_vm10, %v5704_v56, 0  ;;  %v7672_v38 = vshll.u32 %v5777_v14, 16  ;;  %v5778_v24 = vsel %vm638_vm10, %v5706_v27, 0  ;;  %v5708_v63 = vld [vmem:[#allocation2 + $0x328] sm:$0x1] }
 0x719   :  { %v7651_v48 = vor.u32 %v7650_v18, %v7646_v54  ;;  %v7662_v55 = vrot.slane %v7660_v9, 1  ;;  %v7665_v47 = vshll.u32 %v5776_v2, 16  ;;  %v7677_v37 = vshll.u32 %v5778_v24, 16 }
 0x71a   :  { %v17366_v0 = vsel %vm1835_vm11, %v7639_v42, %v7643_v41  ;;  %v7674_v1 = vrot.slane %v7672_v38, 1  ;;  %v5779_v18 = vsel %vm637_vm9, %v5707_v45, 0  ;;  %v7658_v3 = vshrl.u32 %v5775_v35, 16 }
 0x71b   :  { %v17370_v11 = vsel %vm1835_vm11, %v7651_v48, %v7655_v31  ;;  %v7670_v56 = vshrl.u32 %v5777_v14, 16  ;;  %v7667_v27 = vrot.slane %v7665_v47, 1  ;;  %v7684_v42 = vshll.u32 %v5779_v18, 16  ;;  %v18205_v47 = vld [vmem:[#allocation30_spill] sm:$0xff] }
 0x71c   :  { %v7663_v54 = vor.u32 %v7662_v55, %v7658_v3  ;;  %v7679_v9 = vrot.slane %v7677_v37, 1  ;;  %v5780_v2 = vsel %vm638_vm10, %v5708_v63, 0  ;;  %v7682_v55 = vshrl.u32 %v5779_v18, 16  ;;  %v18206_v37 = vld [vmem:[#allocation31_spill] sm:$0xff]  ;;  %v18207_v3 = vld [vmem:[#allocation32_spill] sm:$0xff]  ;;  %v15275_v63 = vld [vmem:[#allocation8 + $0x110] sm:$0xff]  }
 0x71d   :  { %v7675_v41 = vor.u32 %v7674_v1, %v7670_v56  ;;  %v7686_v31 = vrot.slane %v7684_v42, 1  ;;  %v7689_v38 = vshll.u32 %v5780_v2, 16  ;;  %v15274_v1 = vld [vmem:[#allocation8 + $0x108] sm:$0xff]   ;;  %v15276_v18 = vld [vmem:[#allocation8 + $0x118] sm:$0xff]  }
 0x71e   :  { %v17378_v48 = vsel %vm1835_vm11, %v7663_v54, %v7667_v27  ;;  %v18208_v56 = vld [vmem:[#allocation33_spill] sm:$0xff]  ;;  %v18209_v54 = vld [vmem:[#allocation34_spill] sm:$0xff]  ;;  %v15277_v27 = vld [vmem:[#allocation8 + $0x120] sm:$0xff]  }
 0x71f   :  { %13513 = vmatmul.mubr.bf16.gmra.mrb[8].mxu1 %v17318_v51  ;;  %18204 = vst [vmem:[#allocation59_spill] sm:$0xff] %v17378_v48  ;;  %v17382_v24 = vsel %vm1835_vm11, %v7675_v41, %v7679_v9  ;;  %v7687_v35 = vor.u32 %v7686_v31, %v7682_v55  ;;  %v7691_v14 = vrot.slane %v7689_v38, 1  ;;  %v15278_v42 = vld [vmem:[#allocation8 + $0x128] sm:$0xff]   ;;  %v18210_v41 = vld [vmem:[#allocation35_spill] sm:$0xff]  ;;  %v18211_v9 = vld [vmem:[#allocation36_spill] sm:$0xff] }
 0x720   :  { %13516 = vmatprep.mubr.bf16.mxu1 %v17322_v13  ;;  %v15280_v2 = vld [vmem:[#allocation8 + $0x138] sm:$0xff]   ;;  %v18212_v31 = vld [vmem:[#allocation37_spill] sm:$0xff]  ;;  %v18213_v38 = vld [vmem:[#allocation46_spill] sm:$0xff] }
 0x721   :  { %v17386_v45 = vsel %vm1835_vm11, %v7687_v35, %v7691_v14  ;;  %v15281_v55 = vld [vmem:[#allocation8 + $0x140] sm:$0xff]   ;;  %v18214_v35 = vld [vmem:[#allocation47_spill] sm:$0xff] }
 0x722   :  { %v18215_v14 = vld [vmem:[#allocation48_spill] sm:$0xff] }
 0x727   :  { %13517 = vmatmul.mubr.bf16.gmra.mrb[12].mxu1 %v17334_v33 }
 0x728   :  { %13520 = vmatprep.mubr.bf16.mxu1 %v17338_v23 }
 0x72f   :  { %13521 = vmatmul.mubr.bf16.gmra.mrb[16].mxu1 %v17350_v19 }
 0x730   :  { %13524 = vmatprep.mubr.bf16.mxu1 %v17354_v58 }
 0x737   :  { %13525 = vmatmul.mubr.bf16.gmra.mrb[20].mxu1 %v17366_v0 }
 0x738   :  { %13528 = vmatprep.mubr.bf16.mxu1 %v17370_v11 }
 0x73f   :  { %13529 = vmatmul.mubr.bf16.gmra.mrb[24].mxu1 %v17378_v48 }
 0x740   :  { %13532 = vmatprep.mubr.bf16.mxu1 %v17382_v24 }
 0x747   :  { %13533 = vmatmul.mubr.bf16.gmra.mrb[28].mxu1 %v17386_v45 }
 0x748   :  { %13552 = vmatprep.mubr.bf16.mxu1 %v18205_v47  ;;  %v17401_v47 = vld [vmem:[#allocation2 + $0x188] sm:$0xff] }
 0x74f   :  { %13553 = vmatmul.mubr.bf16.vlgmr.msra.gmra.mrb[32].mxu1 %v18206_v37 }
 0x750   :  { %13556 = vmatprep.mubr.bf16.mxu1 %v18207_v3  ;;  %13617 = vmatpush3.bf16.msra.mxu1 %v17218_v8  ;;  %v15279_v8 = vld [vmem:[#allocation8 + $0x130] sm:$0xff]  }
 0x751   :  { %13618 = vmatprep.subr.bf16.mxu1 %v15274_v1 }
 0x754   :  { %13619 = vmatpush3.bf16.msra.mxu1 %v15274_v1  ;;  %v18216_v1 = vld [vmem:[#allocation49_spill] sm:$0xff] }
 0x755   :  { %13620 = vmatprep.subr.bf16.mxu1 %v15275_v63 }
 0x757   :  { %13557 = vmatmul.mubr.bf16.gmra.mrb[36].mxu1 %v18208_v56 }
 0x758   :  { %13560 = vmatprep.mubr.bf16.mxu1 %v18209_v54  ;;  %13621 = vmatpush3.bf16.msra.mxu1 %v15275_v63  ;;  %v5602_v63 = vsel %vm474_vm6, %v17401_v47, 0 }
 0x759   :  { %13622 = vmatprep.subr.bf16.mxu1 %v15276_v18  ;;  %v8151_v32 = vshll.u32 %v5602_v63, 16 }
 0x75c   :  { %13623 = vmatpush3.bf16.msra.mxu1 %v15276_v18  ;;  %v18217_v18 = vld [vmem:[#allocation50_spill] sm:$0xff] }
 0x75d   :  { %13624 = vmatprep.subr.bf16.mxu1 %v15277_v27 }
 0x75f   :  { %13561 = vmatmul.mubr.bf16.gmra.mrb[40].mxu1 %v18210_v41 }
 0x760   :  { %13564 = vmatprep.mubr.bf16.mxu1 %v18211_v9  ;;  %13625 = vmatpush3.bf16.msra.mxu1 %v15277_v27  ;;  %v5549_v27 = vld [vmem:[#allocation2 + $0x180] sm:$0x80] }
 0x761   :  { %13626 = vmatprep.subr.bf16.mxu1 %v15278_v42 }
 0x764   :  { %13627 = vmatpush3.bf16.msra.mxu1 %v15278_v42  ;;  %v8148_v42 = vshrl.u32 %v5602_v63, 16  ;;  %v18227_v63 = vld [vmem:[#allocation18_spill] sm:$0xff] }
 0x765   :  { %13628 = vmatprep.subr.bf16.mxu1 %v15279_v8 }
 0x766   :  { %v8150_v61 = vrot.slane %v8148_v42, 7  ;;  %v18225_v42 = vld [vmem:[#allocation65_spill] sm:$0xff] }
 0x767   :  { %13565 = vmatmul.mubr.bf16.gmra.mrb[44].mxu1 %v18212_v31 }
 0x768   :  { %13568 = vmatprep.mubr.bf16.mxu1 %v18213_v38  ;;  %13629 = vmatpush3.bf16.msra.mxu1 %v15279_v8  ;;  %v5601_v8 = vsel %vm473_vm7, %v5549_v27, 0  ;;  %v8153_v52 = vor.u32 %v8151_v32, %v8150_v61  ;;  %v18224_v27 = vld [vmem:[#allocation62_spill] sm:$0xff]  ;;  %v18228_v32 = vld [vmem:[#allocation19_spill] sm:$0xff]  ;;  %v18231_v61 = vld [vmem:[#allocation24_spill] sm:$0xff] }
 0x769   :  { %13630 = vmatprep.subr.bf16.mxu1 %v15280_v2 }
 0x76c   :  { %13631 = vmatpush3.bf16.msra.mxu1 %v15280_v2  ;;  %v8144_v2 = vshrl.u32 %v5601_v8, 16  ;;  %v18226_v8 = vld [vmem:[#allocation66_spill] sm:$0xff] }
 0x76d   :  { %13696 = vmatprep.subr.bf16.mxu1 %v15281_v55 }
 0x76e   :  { %v8146_v21 = vrot.slane %v8144_v2, 7  ;;  %v18232_v2 = vld [vmem:[#allocation25_spill] sm:$0xff] }
 0x76f   :  { %13569 = vmatmul.mubr.bf16.gmra.mrb[48].mxu1 %v18214_v35 }
 0x770   :  { %13572 = vmatprep.mubr.bf16.mxu1 %v18215_v14  ;;  %v17413_v5 = vsel %vm711_vm8, %v8146_v21, %v8153_v52  ;;  %v18229_v52 = vld [vmem:[#allocation22_spill] sm:$0xff]  ;;  %v18230_v21 = vld [vmem:[#allocation23_spill] sm:$0xff] }
 0x771   :  { %18220 = vst [vmem:[#allocation64_spill] sm:$0xff] %v17413_v5 }
 0x777   :  { %13573 = vmatmul.mubr.bf16.gmra.mrb[52].mxu1 %v18216_v1  ;;  %v18223_v1 = vld [vmem:[#allocation61_spill] sm:$0xff] }
 0x778   :  { %13576 = vmatprep.mubr.bf16.mxu1 %v18217_v18  ;;  %v18222_v18 = vld [vmem:[#allocation58_spill] sm:$0xff] }
 0x77f   :  { %13577 = vmatmul.mubr.bf16.gmra.mrb[56].mxu1 %v18218_v44 }
 0x780   :  { %13580 = vmatprep.mubr.bf16.mxu1 %v18219_v60 }
 0x787   :  { %13581 = vmatmul.mubr.bf16.gmra.mrb[60].mxu1 %v17413_v5  ;;  %v17442_v5 = vld [vmem:[#allocation2 + $0x38] sm:$0xff] }
 0x788   :  { %13584 = vmatprep.mubr.bf16.mxu1 %v18221_v50  ;;  %v17427_v50 = vld [vmem:[#allocation2 + $0x338] sm:$0xff] }
 0x78f   :  { %13585 = vmatmul.mubr.bf16.gmra.mrb[0].mxu1 %v18222_v18  ;;  %v15282_v18 = vld [vmem:[#allocation8 + $0x148] sm:$0xff]  }
 0x790   :  { %13588 = vmatprep.mubr.bf16.mxu1 %v18223_v1 }
 0x797   :  { %13589 = vmatmul.mubr.bf16.gmra.mrb[4].mxu1 %v18224_v27 }
 0x798   :  { %13592 = vmatprep.mubr.bf16.mxu1 %v18225_v42  ;;  %v5638_v42 = vsel %vm474_vm6, %v17427_v50, 0 }
 0x79f   :  { %13593 = vmatmul.mubr.bf16.gmra.mrb[8].mxu1 %v18226_v8  ;;  %v5567_v8 = vld [vmem:[#allocation2 + $0x330] sm:$0x80] }
 0x7a0   :  { %13596 = vmatprep.mubr.bf16.mxu1 %v18227_v63  ;;  %v8160_v63 = vshrl.u32 %v5638_v42, 16 }
 0x7a2   :  { %v8162_v27 = vrot.slane %v8160_v63, 7  ;;  %v17448_v63 = vld [vmem:[#allocation2 + $0x68] sm:$0xff] }
 0x7a7   :  { %13597 = vmatmul.mubr.bf16.gmra.mrb[12].mxu1 %v18228_v32  ;;  %v5637_v32 = vsel %vm473_vm7, %v5567_v8, 0  ;;  %v17445_v8 = vld [vmem:[#allocation2 + $0x50] sm:$0xff] }
 0x7a8   :  { %13600 = vmatprep.mubr.bf16.mxu1 %v18229_v52  ;;  %v8156_v52 = vshrl.u32 %v5637_v32, 16  ;;  %v15285_v32 = vld [vmem:[#allocation8 + $0x160] sm:$0xff]  }
 0x7af   :  { %13601 = vmatmul.mubr.bf16.gmra.mrb[16].mxu1 %v18230_v21  ;;  %v8158_v21 = vrot.slane %v8156_v52, 7  ;;  %v15286_v52 = vld [vmem:[#allocation8 + $0x168] sm:$0xff]  }
 0x7b0   :  { %13604 = vmatprep.mubr.bf16.mxu1 %v18231_v61  ;;  %v8163_v61 = vshll.u32 %v5638_v42, 16  ;;  %v15283_v42 = vld [vmem:[#allocation8 + $0x150] sm:$0xff]  }
 0x7b7   :  { %13605 = vmatmul.mubr.bf16.gmra.mrb[20].mxu1 %v18232_v2  ;;  %v8165_v2 = vor.u32 %v8163_v61, %v8162_v27  ;;  %v15284_v27 = vld [vmem:[#allocation8 + $0x158] sm:$0xff]  }
 0x7b8   :  { %13608 = vmatprep.mubr.bf16.mxu1 %v16997_v29  ;;  %v15376_v29 = vld [vmem:[#allocation2 + $0x20] sm:$0xff]  ;;  %v15288_v61 = vld [vmem:[#allocation8 + $0x178] sm:$0xff]  }
 0x7b9   :  { %v17439_v1 = vsel %vm711_vm8, %v8158_v21, %v8165_v2  ;;  %v15287_v21 = vld [vmem:[#allocation8 + $0x170] sm:$0xff]   ;;  %v17460_v2 = vld [vmem:[#allocation2 + $0xc8] sm:$0xff] }
 0x7ba   :  { %18234 = vst [vmem:[#allocation68_spill] sm:$0xff] %v17460_v2 }
 0x7bf   :  { %13609 = vmatmul.mubr.bf16.gmra.mrb[24].mxu1 %v17002_v16 }
 0x7c0   :  { %13612 = vmatprep.mubr.bf16.mxu1 %v17009_v53 }
 0x7c7   :  { %13613 = vmatmul.mubr.bf16.gmra.mrb[28].mxu1 %v17439_v1 }
 0x7c8   :  { %13632 = vmatprep.mubr.bf16.mxu1 %v15376_v29  ;;  %v17451_v29 = vld [vmem:[#allocation2 + $0x80] sm:$0xff] }
 0x7cf   :  { %13633 = vmatmul.mubr.bf16.vlgmr.msra.gmra.mrb[32].mxu1 %v17442_v5 }
 0x7d0   :  { %13636 = vmatprep.mubr.bf16.mxu1 %v17445_v8  ;;  %13697 = vmatpush3.bf16.msra.mxu1 %v15281_v55  ;;  %v17454_v55 = vld [vmem:[#allocation2 + $0x98] sm:$0xff] }
 0x7d1   :  { %13698 = vmatprep.subr.bf16.mxu1 %v15282_v18 }
 0x7d4   :  { %13699 = vmatpush3.bf16.msra.mxu1 %v15282_v18  ;;  %v17457_v18 = vld [vmem:[#allocation2 + $0xb0] sm:$0xff] }
 0x7d5   :  { %13700 = vmatprep.subr.bf16.mxu1 %v15283_v42  ;;  %18233 = vst [vmem:[#allocation63_spill] sm:$0xff] %v17457_v18 }
 0x7d7   :  { %13637 = vmatmul.mubr.bf16.gmra.mrb[36].mxu1 %v17448_v63 }
 0x7d8   :  { %13640 = vmatprep.mubr.bf16.mxu1 %v17451_v29  ;;  %13701 = vmatpush3.bf16.msra.mxu1 %v15283_v42  ;;  %v17463_v42 = vld [vmem:[#allocation2 + $0xe0] sm:$0xff] }
 0x7d9   :  { %13702 = vmatprep.subr.bf16.mxu1 %v15284_v27 }
 0x7dc   :  { %13703 = vmatpush3.bf16.msra.mxu1 %v15284_v27  ;;  %v15289_v27 = vld [vmem:[#allocation8 + $0x180] sm:$0xff]  }
 0x7dd   :  { %13704 = vmatprep.subr.bf16.mxu1 %v15285_v32 }
 0x7df   :  { %13641 = vmatmul.mubr.bf16.gmra.mrb[40].mxu1 %v17454_v55 }
 0x7e0   :  { %13644 = vmatprep.mubr.bf16.mxu1 %v17457_v18  ;;  %13705 = vmatpush3.bf16.msra.mxu1 %v15285_v32  ;;  %v17466_v18 = vld [vmem:[#allocation2 + $0xf8] sm:$0xff]  ;;  %v17469_v32 = vld [vmem:[#allocation2 + $0x110] sm:$0xff] }
 0x7e1   :  { %13706 = vmatprep.subr.bf16.mxu1 %v15286_v52  ;;  %18235 = vst [vmem:[#allocation67_spill] sm:$0xff] %v17466_v18  ;;  %18236 = vst [vmem:[#allocation17_spill] sm:$0xff] %v17469_v32 }
 0x7e4   :  { %13707 = vmatpush3.bf16.msra.mxu1 %v15286_v52  ;;  %v17472_v52 = vld [vmem:[#allocation2 + $0x128] sm:$0xff] }
 0x7e5   :  { %13708 = vmatprep.subr.bf16.mxu1 %v15287_v21  ;;  %18237 = vst [vmem:[#allocation21_spill] sm:$0xff] %v17472_v52 }
 0x7e7   :  { %13645 = vmatmul.mubr.bf16.gmra.mrb[44].mxu1 %v17460_v2  ;;  %v17475_v2 = vld [vmem:[#allocation2 + $0x140] sm:$0xff] }
 0x7e8   :  { %13648 = vmatprep.mubr.bf16.mxu1 %v17463_v42  ;;  %13709 = vmatpush3.bf16.msra.mxu1 %v15287_v21  ;;  %18238 = vst [vmem:[#allocation20_spill] sm:$0xff] %v17475_v2  ;;  %v17478_v21 = vld [vmem:[#allocation2 + $0x158] sm:$0xff] }
 0x7e9   :  { %13710 = vmatprep.subr.bf16.mxu1 %v15288_v61  ;;  %18239 = vst [vmem:[#allocation16_spill] sm:$0xff] %v17478_v21 }
 0x7ec   :  { %13711 = vmatpush3.bf16.msra.mxu1 %v15288_v61  ;;  %v17481_v61 = vld [vmem:[#allocation2 + $0x170] sm:$0xff] }
 0x7ed   :  { %13776 = vmatprep.subr.bf16.mxu1 %v15289_v27  ;;  %18240 = vst [vmem:[#allocation30_spill] sm:$0xff] %v17481_v61 }
 0x7ef   :  { %13649 = vmatmul.mubr.bf16.gmra.mrb[48].mxu1 %v17466_v18  ;;  %v15391_v18 = vld [vmem:[#allocation2 + $0x1d0] sm:$0xff] }
 0x7f0   :  { %13652 = vmatprep.mubr.bf16.mxu1 %v17469_v32  ;;  %v17485_v32 = vld [vmem:[#allocation2 + $0x1e8] sm:$0xff] }
 0x7f1   :  { %18241 = vst [vmem:[#allocation31_spill] sm:$0xff] %v17485_v32 }
 0x7f7   :  { %13653 = vmatmul.mubr.bf16.gmra.mrb[52].mxu1 %v17472_v52  ;;  %v17488_v52 = vld [vmem:[#allocation2 + $0x200] sm:$0xff] }
 0x7f8   :  { %13656 = vmatprep.mubr.bf16.mxu1 %v17475_v2  ;;  %18242 = vst [vmem:[#allocation32_spill] sm:$0xff] %v17488_v52  ;;  %v17491_v2 = vld [vmem:[#allocation2 + $0x218] sm:$0xff] }
 0x7f9   :  { %18243 = vst [vmem:[#allocation33_spill] sm:$0xff] %v17491_v2 }
 0x7ff   :  { %13657 = vmatmul.mubr.bf16.gmra.mrb[56].mxu1 %v17478_v21  ;;  %v17494_v21 = vld [vmem:[#allocation2 + $0x230] sm:$0xff] }
 0x800   :  { %13660 = vmatprep.mubr.bf16.mxu1 %v17481_v61  ;;  %18244 = vst [vmem:[#allocation34_spill] sm:$0xff] %v17494_v21  ;;  %v17497_v61 = vld [vmem:[#allocation2 + $0x248] sm:$0xff] }
 0x801   :  { %18245 = vst [vmem:[#allocation35_spill] sm:$0xff] %v17497_v61 }
 0x807   :  { %13661 = vmatmul.mubr.bf16.gmra.mrb[60].mxu1 %v17401_v47 }
 0x808   :  { %13664 = vmatprep.mubr.bf16.mxu1 %v15391_v18  ;;  %v17500_v18 = vld [vmem:[#allocation2 + $0x260] sm:$0xff] }
 0x809   :  { %18246 = vst [vmem:[#allocation36_spill] sm:$0xff] %v17500_v18 }
 0x80f   :  { %13665 = vmatmul.mubr.bf16.gmra.mrb[0].mxu1 %v17485_v32  ;;  %v17503_v32 = vld [vmem:[#allocation2 + $0x278] sm:$0xff] }
 0x810   :  { %13668 = vmatprep.mubr.bf16.mxu1 %v17488_v52  ;;  %18247 = vst [vmem:[#allocation37_spill] sm:$0xff] %v17503_v32  ;;  %v17506_v52 = vld [vmem:[#allocation2 + $0x290] sm:$0xff] }
 0x811   :  { %18248 = vst [vmem:[#allocation46_spill] sm:$0xff] %v17506_v52 }
 0x817   :  { %13669 = vmatmul.mubr.bf16.gmra.mrb[4].mxu1 %v17491_v2  ;;  %v17509_v2 = vld [vmem:[#allocation2 + $0x2a8] sm:$0xff] }
 0x818   :  { %13672 = vmatprep.mubr.bf16.mxu1 %v17494_v21  ;;  %v17512_v21 = vld [vmem:[#allocation2 + $0x2c0] sm:$0xff] }
 0x819   :  { %18249 = vst [vmem:[#allocation47_spill] sm:$0xff] %v17512_v21 }
 0x81f   :  { %13673 = vmatmul.mubr.bf16.gmra.mrb[8].mxu1 %v17497_v61  ;;  %v17515_v61 = vld [vmem:[#allocation2 + $0x2d8] sm:$0xff] }
 0x820   :  { %13676 = vmatprep.mubr.bf16.mxu1 %v17500_v18  ;;  %18250 = vst [vmem:[#allocation48_spill] sm:$0xff] %v17515_v61  ;;  %v17518_v18 = vld [vmem:[#allocation2 + $0x2f0] sm:$0xff] }
 0x821   :  { %18251 = vst [vmem:[#allocation51_spill] sm:$0xff] %v17518_v18 }
 0x827   :  { %13677 = vmatmul.mubr.bf16.gmra.mrb[12].mxu1 %v17503_v32  ;;  %v17521_v32 = vld [vmem:[#allocation2 + $0x308] sm:$0xff] }
 0x828   :  { %13680 = vmatprep.mubr.bf16.mxu1 %v17506_v52  ;;  %v17524_v52 = vld [vmem:[#allocation2 + $0x320] sm:$0xff] }
 0x829   :  { %18252 = vst [vmem:[#allocation44_spill] sm:$0xff] %v17524_v52 }
 0x82f   :  { %13681 = vmatmul.mubr.bf16.gmra.mrb[16].mxu1 %v17509_v2 }
 0x830   :  { %13684 = vmatprep.mubr.bf16.mxu1 %v17512_v21  ;;  %v15290_v21 = vld [vmem:[#allocation8 + $0x188] sm:$0xff]  }
 0x837   :  { %13685 = vmatmul.mubr.bf16.gmra.mrb[20].mxu1 %v17515_v61  ;;  %v15292_v61 = vld [vmem:[#allocation8 + $0x198] sm:$0xff]  }
 0x838   :  { %13688 = vmatprep.mubr.bf16.mxu1 %v17518_v18  ;;  %v15291_v18 = vld [vmem:[#allocation8 + $0x190] sm:$0xff]  }
 0x83f   :  { %13689 = vmatmul.mubr.bf16.gmra.mrb[24].mxu1 %v17521_v32 }
 0x840   :  { %13692 = vmatprep.mubr.bf16.mxu1 %v17524_v52  ;;  %v15293_v52 = vld [vmem:[#allocation8 + $0x1a0] sm:$0xff]  }
 0x847   :  { %13693 = vmatmul.mubr.bf16.gmra.mrb[28].mxu1 %v17427_v50 }
 0x848   :  { %13712 = vmatprep.mubr.bf16.mxu1 %v17158_v22  ;;  %v15294_v22 = vld [vmem:[#allocation8 + $0x1a8] sm:$0xff]  }
 0x84f   :  { %13713 = vmatmul.mubr.bf16.vlgmr.msra.gmra.mrb[32].mxu1 %v17162_v28 }
 0x850   :  { %13716 = vmatprep.mubr.bf16.mxu1 %v17175_v10  ;;  %13777 = vmatpush3.bf16.msra.mxu1 %v15289_v27  ;;  %v15295_v27 = vld [vmem:[#allocation8 + $0x1b0] sm:$0xff]  }
 0x851   :  { %13778 = vmatprep.subr.bf16.mxu1 %v15290_v21 }
 0x854   :  { %13779 = vmatpush3.bf16.msra.mxu1 %v15290_v21  ;;  %v15296_v21 = vld [vmem:[#allocation8 + $0x1b8] sm:$0xff]  }
 0x855   :  { %13780 = vmatprep.subr.bf16.mxu1 %v15291_v18 }
 0x857   :  { %13717 = vmatmul.mubr.bf16.gmra.mrb[36].mxu1 %v17179_v15 }
 0x858   :  { %13720 = vmatprep.mubr.bf16.mxu1 %v17191_v26  ;;  %13781 = vmatpush3.bf16.msra.mxu1 %v15291_v18  ;;  %v15297_v18 = vld [vmem:[#allocation8 + $0x1c0] sm:$0xff]  }
 0x859   :  { %13782 = vmatprep.subr.bf16.mxu1 %v15292_v61 }
 0x85c   :  { %13783 = vmatpush3.bf16.msra.mxu1 %v15292_v61  ;;  %v5674_v61 = vld [vmem:[#allocation2 + $0x190] sm:$0x1] }
 0x85d   :  { %13784 = vmatprep.subr.bf16.mxu1 %v15293_v52 }
 0x85f   :  { %13721 = vmatmul.mubr.bf16.gmra.mrb[40].mxu1 %v17195_v20 }
 0x860   :  { %13724 = vmatprep.mubr.bf16.mxu1 %v17207_v46  ;;  %13785 = vmatpush3.bf16.msra.mxu1 %v15293_v52  ;;  %v5745_v52 = vsel %vm637_vm9, %v17401_v47, 0 }
 0x861   :  { %13786 = vmatprep.subr.bf16.mxu1 %v15294_v22 }
 0x864   :  { %13787 = vmatpush3.bf16.msra.mxu1 %v15294_v22  ;;  %v9008_v22 = vshll.u32 %v5745_v52, 16 }
 0x865   :  { %13788 = vmatprep.subr.bf16.mxu1 %v15295_v27 }
 0x867   :  { %13725 = vmatmul.mubr.bf16.gmra.mrb[44].mxu1 %v17211_v7 }
 0x868   :  { %13728 = vmatprep.mubr.bf16.mxu1 %v17226_v17  ;;  %13789 = vmatpush3.bf16.msra.mxu1 %v15295_v27  ;;  %v5746_v27 = vsel %vm638_vm10, %v5674_v61, 0  ;;  %v9010_v17 = vrot.slane %v9008_v22, 1 }
 0x869   :  { %13790 = vmatprep.subr.bf16.mxu1 %v15296_v21 }
 0x86c   :  { %13791 = vmatpush3.bf16.msra.mxu1 %v15296_v21  ;;  %v9013_v21 = vshll.u32 %v5746_v27, 16 }
 0x86d   :  { %13856 = vmatprep.subr.bf16.mxu1 %v15297_v18 }
 0x86f   :  { %13729 = vmatmul.mubr.bf16.gmra.mrb[48].mxu1 %v17230_v25 }
 0x870   :  { %13732 = vmatprep.mubr.bf16.mxu1 %v17242_v40  ;;  %v9006_v40 = vshrl.u32 %v5745_v52, 16 }
 0x872   :  { %v9011_v25 = vor.u32 %v9010_v17, %v9006_v40  ;;  %v5710_v17 = vld [vmem:[#allocation2 + $0x340] sm:$0x1] }
 0x873   :  { %v5782_v40 = vsel %vm638_vm10, %v5710_v17, 0  ;;  %v15299_v17 = vld [vmem:[#allocation8 + $0x1d0] sm:$0xff]  }
 0x874   :  { %v9025_v52 = vshll.u32 %v5782_v40, 16 }
 0x876   :  { %v9027_v27 = vrot.slane %v9025_v52, 1  ;;  %v18255_v52 = vld [vmem:[#allocation64_spill] sm:$0xff] }
 0x877   :  { %13733 = vmatmul.mubr.bf16.gmra.mrb[52].mxu1 %v17246_v39  ;;  %v9015_v39 = vrot.slane %v9013_v21, 1 }
 0x878   :  { %13736 = vmatprep.mubr.bf16.mxu1 %v17256_v6 }
 0x879   :  { %v17549_v7 = vsel %vm1835_vm11, %v9011_v25, %v9015_v39 }
 0x87f   :  { %13737 = vmatmul.mubr.bf16.gmra.mrb[56].mxu1 %v17260_v30 }
 0x880   :  { %13740 = vmatprep.mubr.bf16.mxu1 %v17274_v43 }
 0x887   :  { %13741 = vmatmul.mubr.bf16.gmra.mrb[60].mxu1 %v17549_v7 }
 0x888   :  { %13744 = vmatprep.mubr.bf16.mxu1 %v17286_v62  ;;  %v5781_v62 = vsel %vm637_vm9, %v17427_v50, 0 }
 0x889   :  { %v9020_v25 = vshll.u32 %v5781_v62, 16  ;;  %v9018_v61 = vshrl.u32 %v5781_v62, 16  ;;  %v15300_v62 = vld [vmem:[#allocation8 + $0x1d8] sm:$0xff]  }
 0x88b   :  { %v9022_v39 = vrot.slane %v9020_v25, 1  ;;  %v15301_v25 = vld [vmem:[#allocation8 + $0x1e0] sm:$0xff]  }
 0x88d   :  { %v9023_v22 = vor.u32 %v9022_v39, %v9018_v61 }
 0x88f   :  { %13745 = vmatmul.mubr.bf16.gmra.mrb[0].mxu1 %v17290_v34  ;;  %v17573_v21 = vsel %vm1835_vm11, %v9023_v22, %v9027_v27  ;;  %v18256_v27 = vld [vmem:[#allocation58_spill] sm:$0xff] }
 0x890   :  { %13748 = vmatprep.mubr.bf16.mxu1 %v17302_v12 }
 0x897   :  { %13749 = vmatmul.mubr.bf16.gmra.mrb[4].mxu1 %v17306_v36 }
 0x898   :  { %13752 = vmatprep.mubr.bf16.mxu1 %v17318_v51 }
 0x89f   :  { %13753 = vmatmul.mubr.bf16.gmra.mrb[8].mxu1 %v17322_v13 }
 0x8a0   :  { %13756 = vmatprep.mubr.bf16.mxu1 %v17334_v33 }
 0x8a7   :  { %13757 = vmatmul.mubr.bf16.gmra.mrb[12].mxu1 %v17338_v23 }
 0x8a8   :  { %13760 = vmatprep.mubr.bf16.mxu1 %v17350_v19 }
 0x8af   :  { %13761 = vmatmul.mubr.bf16.gmra.mrb[16].mxu1 %v17354_v58 }
 0x8b0   :  { %13764 = vmatprep.mubr.bf16.mxu1 %v17366_v0 }
 0x8b7   :  { %13765 = vmatmul.mubr.bf16.gmra.mrb[20].mxu1 %v17370_v11 }
 0x8b8   :  { %13768 = vmatprep.mubr.bf16.mxu1 %v17378_v48  ;;  %v15298_v48 = vld [vmem:[#allocation8 + $0x1c8] sm:$0xff]  }
 0x8bf   :  { %13769 = vmatmul.mubr.bf16.gmra.mrb[24].mxu1 %v17382_v24 }
 0x8c0   :  { %13772 = vmatprep.mubr.bf16.mxu1 %v17386_v45 }
 0x8c7   :  { %13773 = vmatmul.mubr.bf16.gmra.mrb[28].mxu1 %v17573_v21 }
 0x8c8   :  { %13792 = vmatprep.mubr.bf16.mxu1 %v18206_v37  ;;  %v15302_v37 = vld [vmem:[#allocation8 + $0x1e8] sm:$0xff]  }
 0x8cf   :  { %13793 = vmatmul.mubr.bf16.vlgmr.msra.gmra.mrb[32].mxu1 %v18207_v3  ;;  %v15303_v3 = vld [vmem:[#allocation8 + $0x1f0] sm:$0xff]  }
 0x8d0   :  { %13796 = vmatprep.mubr.bf16.mxu1 %v18208_v56  ;;  %13857 = vmatpush3.bf16.msra.mxu1 %v15297_v18  ;;  %v15305_v56 = vld [vmem:[#allocation8 + $0x200] sm:$0xff]   ;;  %v18254_v18 = vld [vmem:[#allocation50_spill] sm:$0xff] }
 0x8d1   :  { %13858 = vmatprep.subr.bf16.mxu1 %v15298_v48 }
 0x8d4   :  { %13859 = vmatpush3.bf16.msra.mxu1 %v15298_v48  ;;  %v15304_v48 = vld [vmem:[#allocation8 + $0x1f8] sm:$0xff]  }
 0x8d5   :  { %13860 = vmatprep.subr.bf16.mxu1 %v15299_v17 }
 0x8d7   :  { %13797 = vmatmul.mubr.bf16.gmra.mrb[36].mxu1 %v18209_v54  ;;  %v18253_v54 = vld [vmem:[#allocation49_spill] sm:$0xff] }
 0x8d8   :  { %13800 = vmatprep.mubr.bf16.mxu1 %v18210_v41  ;;  %13861 = vmatpush3.bf16.msra.mxu1 %v15299_v17  ;;  %v17587_v41 = vld [vmem:[#allocation2 + $0x8] sm:$0xff] }
 0x8d9   :  { %13862 = vmatprep.subr.bf16.mxu1 %v15300_v62  ;;  %v18257_v17 = vld [vmem:[#allocation61_spill] sm:$0xff] }
 0x8dc   :  { %13863 = vmatpush3.bf16.msra.mxu1 %v15300_v62  ;;  %v18259_v62 = vld [vmem:[#allocation65_spill] sm:$0xff] }
 0x8dd   :  { %13864 = vmatprep.subr.bf16.mxu1 %v15301_v25 }
 0x8df   :  { %13801 = vmatmul.mubr.bf16.gmra.mrb[40].mxu1 %v18211_v9  ;;  %v5604_v9 = vsel %vm474_vm6, %v17587_v41, 0 }
 0x8e0   :  { %13804 = vmatprep.mubr.bf16.mxu1 %v18212_v31  ;;  %13865 = vmatpush3.bf16.msra.mxu1 %v15301_v25  ;;  %v5550_v31 = vld [vmem:[#allocation2 + $0x198] sm:$0x80]  ;;  %v18260_v25 = vld [vmem:[#allocation66_spill] sm:$0xff] }
 0x8e1   :  { %13866 = vmatprep.subr.bf16.mxu1 %v15302_v37 }
 0x8e4   :  { %13867 = vmatpush3.bf16.msra.mxu1 %v15302_v37  ;;  %v18261_v37 = vld [vmem:[#allocation18_spill] sm:$0xff] }
 0x8e5   :  { %13868 = vmatprep.subr.bf16.mxu1 %v15303_v3 }
 0x8e7   :  { %13805 = vmatmul.mubr.bf16.gmra.mrb[44].mxu1 %v18213_v38  ;;  %v9454_v38 = vshrl.u32 %v5604_v9, 16 }
 0x8e8   :  { %13808 = vmatprep.mubr.bf16.mxu1 %v18214_v35  ;;  %13869 = vmatpush3.bf16.msra.mxu1 %v15303_v3  ;;  %v5603_v35 = vsel %vm473_vm7, %v5550_v31, 0  ;;  %v18263_v3 = vld [vmem:[#allocation22_spill] sm:$0xff]  ;;  %v5568_v31 = vld [vmem:[#allocation2 + $0x348] sm:$0x80] }
 0x8e9   :  { %13870 = vmatprep.subr.bf16.mxu1 %v15304_v48  ;;  %v9450_v40 = vshrl.u32 %v5603_v35, 16  ;;  %v9456_v39 = vrot.slane %v9454_v38, 7  ;;  %v5639_v38 = vsel %vm473_vm7, %v5568_v31, 0  ;;  %v18292_v31 = vld [vmem:[#allocation60_spill] sm:$0xff] }
 0x8ea   :  { %v9462_v35 = vshrl.u32 %v5639_v38, 16 }
 0x8eb   :  { %v9452_v61 = vrot.slane %v9450_v40, 7 }
 0x8ec   :  { %13871 = vmatpush3.bf16.msra.mxu1 %v15304_v48  ;;  %v18264_v48 = vld [vmem:[#allocation23_spill] sm:$0xff]  ;;  %v9464_v40 = vrot.slane %v9462_v35, 7 }
 0x8ed   :  { %13936 = vmatprep.subr.bf16.mxu1 %v15305_v56 }
 0x8ef   :  { %13809 = vmatmul.mubr.bf16.gmra.mrb[48].mxu1 %v18215_v14  ;;  %v9457_v14 = vshll.u32 %v5604_v9, 16  ;;  %v18266_v9 = vld [vmem:[#allocation25_spill] sm:$0xff] }
 0x8f0   :  { %13812 = vmatprep.mubr.bf16.mxu1 %v18253_v54  ;;  %v18265_v54 = vld [vmem:[#allocation24_spill] sm:$0xff] }
 0x8f1   :  { %v9459_v22 = vor.u32 %v9457_v14, %v9456_v39  ;;  %v15306_v14 = vld [vmem:[#allocation8 + $0x208] sm:$0xff]  }
 0x8f3   :  { %v9460_v59 = vsel %vm711_vm8, %v9452_v61, %v9459_v22  ;;  %v9472_v39 = vsel %vm711_vm8, %v9464_v40, %v9459_v22  ;;  %v18273_v61 = vld [vmem:[#allocation20_spill] sm:$0xff] }
 0x8f4   :  { %v18274_v22 = vld [vmem:[#allocation16_spill] sm:$0xff] }
 0x8f7   :  { %13813 = vmatmul.mubr.bf16.gmra.mrb[52].mxu1 %v18254_v18  ;;  %v18267_v18 = vld [vmem:[#allocation26_spill] sm:$0xff] }
 0x8f8   :  { %13816 = vmatprep.mubr.bf16.mxu1 %v18218_v44  ;;  %v18258_v44 = vld [vmem:[#allocation62_spill] sm:$0xff] }
 0x8ff   :  { %13817 = vmatmul.mubr.bf16.gmra.mrb[56].mxu1 %v18219_v60  ;;  %v18262_v60 = vld [vmem:[#allocation19_spill] sm:$0xff] }
 0x900   :  { %13820 = vmatprep.mubr.bf16.mxu1 %v18255_v52  ;;  %v18272_v52 = vld [vmem:[#allocation21_spill] sm:$0xff] }
 0x907   :  { %13821 = vmatmul.mubr.bf16.gmra.mrb[60].mxu1 %v9460_v59  ;;  %v18275_v59 = vld [vmem:[#allocation30_spill] sm:$0xff] }
 0x908   :  { %13824 = vmatprep.mubr.bf16.mxu1 %v18256_v27  ;;  %v18277_v27 = vld [vmem:[#allocation32_spill] sm:$0xff] }
 0x90f   :  { %13825 = vmatmul.mubr.bf16.gmra.mrb[0].mxu1 %v18257_v17  ;;  %v18278_v17 = vld [vmem:[#allocation33_spill] sm:$0xff] }
 0x910   :  { %13828 = vmatprep.mubr.bf16.mxu1 %v18258_v44  ;;  %v18279_v44 = vld [vmem:[#allocation34_spill] sm:$0xff] }
 0x917   :  { %13829 = vmatmul.mubr.bf16.gmra.mrb[4].mxu1 %v18259_v62  ;;  %v18280_v62 = vld [vmem:[#allocation35_spill] sm:$0xff] }
 0x918   :  { %13832 = vmatprep.mubr.bf16.mxu1 %v18260_v25  ;;  %v18281_v25 = vld [vmem:[#allocation36_spill] sm:$0xff] }
 0x91f   :  { %13833 = vmatmul.mubr.bf16.gmra.mrb[8].mxu1 %v18261_v37  ;;  %v18282_v37 = vld [vmem:[#allocation37_spill] sm:$0xff] }
 0x920   :  { %13836 = vmatprep.mubr.bf16.mxu1 %v18262_v60  ;;  %v18283_v60 = vld [vmem:[#allocation46_spill] sm:$0xff] }
 0x927   :  { %13837 = vmatmul.mubr.bf16.gmra.mrb[12].mxu1 %v18263_v3  ;;  %v18285_v3 = vld [vmem:[#allocation48_spill] sm:$0xff] }
 0x928   :  { %13840 = vmatprep.mubr.bf16.mxu1 %v18264_v48  ;;  %v18286_v48 = vld [vmem:[#allocation51_spill] sm:$0xff] }
 0x92f   :  { %13841 = vmatmul.mubr.bf16.gmra.mrb[16].mxu1 %v18265_v54  ;;  %v18287_v54 = vld [vmem:[#allocation44_spill] sm:$0xff] }
 0x930   :  { %13844 = vmatprep.mubr.bf16.mxu1 %v18266_v9  ;;  %v18290_v9 = vld [vmem:[#allocation56_spill] sm:$0xff] }
 0x937   :  { %13845 = vmatmul.mubr.bf16.gmra.mrb[20].mxu1 %v18267_v18 }
 0x938   :  { %13848 = vmatprep.mubr.bf16.mxu1 %v17002_v16  ;;  %v15308_v16 = vld [vmem:[#allocation8 + $0x218] sm:$0xff]  }
 0x93f   :  { %13849 = vmatmul.mubr.bf16.gmra.mrb[24].mxu1 %v17009_v53  ;;  %v15309_v53 = vld [vmem:[#allocation8 + $0x220] sm:$0xff]  }
 0x940   :  { %13852 = vmatprep.mubr.bf16.mxu1 %v17439_v1  ;;  %v18268_v1 = vld [vmem:[#allocation63_spill] sm:$0xff] }
 0x947   :  { %13853 = vmatmul.mubr.bf16.gmra.mrb[28].mxu1 %v9472_v39 }
 0x948   :  { %13872 = vmatprep.mubr.bf16.mxu1 %v17442_v5  ;;  %v15310_v5 = vld [vmem:[#allocation8 + $0x228] sm:$0xff]  }
 0x94f   :  { %13873 = vmatmul.mubr.bf16.vlgmr.msra.gmra.mrb[32].mxu1 %v17445_v8  ;;  %v18269_v8 = vld [vmem:[#allocation68_spill] sm:$0xff] }
 0x950   :  { %13876 = vmatprep.mubr.bf16.mxu1 %v17448_v63  ;;  %13937 = vmatpush3.bf16.msra.mxu1 %v15305_v56  ;;  %v15311_v63 = vld [vmem:[#allocation8 + $0x230] sm:$0xff]   ;;  %v15312_v56 = vld [vmem:[#allocation8 + $0x238] sm:$0xff]  }
 0x951   :  { %13938 = vmatprep.subr.bf16.mxu1 %v15306_v14 }
 0x954   :  { %13939 = vmatpush3.bf16.msra.mxu1 %v15306_v14 }
 0x955   :  { %13940 = vmatprep.subr.bf16.mxu1 %v15307_v57 }
 0x957   :  { %13877 = vmatmul.mubr.bf16.gmra.mrb[36].mxu1 %v17451_v29  ;;  %v18270_v29 = vld [vmem:[#allocation67_spill] sm:$0xff] }
 0x958   :  { %13880 = vmatprep.mubr.bf16.mxu1 %v17454_v55  ;;  %13941 = vmatpush3.bf16.msra.mxu1 %v15307_v57  ;;  %v18271_v55 = vld [vmem:[#allocation17_spill] sm:$0xff] }
 0x959   :  { %13942 = vmatprep.subr.bf16.mxu1 %v15308_v16 }
 0x95c   :  { %13943 = vmatpush3.bf16.msra.mxu1 %v15308_v16 }
 0x95d   :  { %13944 = vmatprep.subr.bf16.mxu1 %v15309_v53 }
 0x95f   :  { %13881 = vmatmul.mubr.bf16.gmra.mrb[40].mxu1 %v18268_v1 }
 0x960   :  { %13884 = vmatprep.mubr.bf16.mxu1 %v18269_v8  ;;  %13945 = vmatpush3.bf16.msra.mxu1 %v15309_v53 }
 0x961   :  { %13946 = vmatprep.subr.bf16.mxu1 %v15310_v5 }
 0x964   :  { %13947 = vmatpush3.bf16.msra.mxu1 %v15310_v5 }
 0x965   :  { %13948 = vmatprep.subr.bf16.mxu1 %v15311_v63 }
 0x967   :  { %13885 = vmatmul.mubr.bf16.gmra.mrb[44].mxu1 %v17463_v42  ;;  %v18276_v42 = vld [vmem:[#allocation31_spill] sm:$0xff] }
 0x968   :  { %13888 = vmatprep.mubr.bf16.mxu1 %v18270_v29  ;;  %13949 = vmatpush3.bf16.msra.mxu1 %v15311_v63  ;;  %v18298_v63 = vld [vmem:[#allocation39_spill] sm:$0xff] }
 0x969   :  { %13950 = vmatprep.subr.bf16.mxu1 %v15312_v56 }
 0x96c   :  { %13951 = vmatpush3.bf16.msra.mxu1 %v15312_v56 }
 0x96f   :  { %13889 = vmatmul.mubr.bf16.gmra.mrb[48].mxu1 %v18271_v55 }
 0x970   :  { %13892 = vmatprep.mubr.bf16.mxu1 %v18272_v52  ;;  %v18299_v52 = vld [vmem:[#allocation40_spill] sm:$0xff] }
 0x977   :  { %13893 = vmatmul.mubr.bf16.gmra.mrb[52].mxu1 %v18273_v61 }
 0x978   :  { %13896 = vmatprep.mubr.bf16.mxu1 %v18274_v22 }
 0x97f   :  { %13897 = vmatmul.mubr.bf16.gmra.mrb[56].mxu1 %v18275_v59 }
 0x980   :  { %13900 = vmatprep.mubr.bf16.mxu1 %v17401_v47  ;;  %v18284_v47 = vld [vmem:[#allocation47_spill] sm:$0xff] }
 0x987   :  { %13901 = vmatmul.mubr.bf16.gmra.mrb[60].mxu1 %v17587_v41 }
 0x988   :  { %13904 = vmatprep.mubr.bf16.mxu1 %v18276_v42  ;;  %v18300_v42 = vld [vmem:[#allocation41_spill] sm:$0xff] }
 0x98f   :  { %13905 = vmatmul.mubr.bf16.gmra.mrb[0].mxu1 %v18277_v27 }
 0x990   :  { %13908 = vmatprep.mubr.bf16.mxu1 %v18278_v17 }
 0x997   :  { %13909 = vmatmul.mubr.bf16.gmra.mrb[4].mxu1 %v18279_v44 }
 0x998   :  { %13912 = vmatprep.mubr.bf16.mxu1 %v18280_v62  ;;  %v18301_v62 = vld [vmem:[#allocation42_spill] sm:$0xff] }
 0x99f   :  { %13913 = vmatmul.mubr.bf16.gmra.mrb[8].mxu1 %v18281_v25 }
 0x9a0   :  { %13916 = vmatprep.mubr.bf16.mxu1 %v18282_v37 }
 0x9a7   :  { %13917 = vmatmul.mubr.bf16.gmra.mrb[12].mxu1 %v18283_v60 }
 0x9a8   :  { %13920 = vmatprep.mubr.bf16.mxu1 %v17509_v2  ;;  %v18288_v2 = vld [vmem:[#allocation53_spill] sm:$0xff] }
 0x9af   :  { %13921 = vmatmul.mubr.bf16.gmra.mrb[16].mxu1 %v18284_v47 }
 0x9b0   :  { %13924 = vmatprep.mubr.bf16.mxu1 %v18285_v3 }
 0x9b7   :  { %13925 = vmatmul.mubr.bf16.gmra.mrb[20].mxu1 %v18286_v48 }
 0x9b8   :  { %13928 = vmatprep.mubr.bf16.mxu1 %v17521_v32  ;;  %v18289_v32 = vld [vmem:[#allocation52_spill] sm:$0xff] }
 0x9bf   :  { %13929 = vmatmul.mubr.bf16.gmra.mrb[24].mxu1 %v18287_v54 }
 0x9c0   :  { %13932 = vmatprep.mubr.bf16.mxu1 %v17427_v50  ;;  %v18291_v50 = vld [vmem:[#allocation55_spill] sm:$0xff] }
 0x9c7   :  { %13933 = vmatmul.mubr.bf16.gmra.mrb[28].mxu1 %v17587_v41 }
 0x9c8   :  { %13952 = vmatprep.mubr.bf16.mxu1 %v17162_v28  ;;  %v5747_v28 = vsel %vm637_vm9, %v17587_v41, 0  ;;  %v18297_v41 = vld [vmem:[#allocation38_spill] sm:$0xff] }
 0x9cf   :  { %13953 = vmatmul.mubr.bf16.vlgmr.msra.gmra.mrb[32].mxu1 %v17175_v10  ;;  %v5676_v10 = vld [vmem:[#allocation2 + $0x1a8] sm:$0x1] }
 0x9d0   :  { %13956 = vmatprep.mubr.bf16.mxu1 %v17179_v15  ;;  %v10314_v15 = vshll.u32 %v5747_v28, 16 }
 0x9d7   :  { %13957 = vmatmul.mubr.bf16.gmra.mrb[36].mxu1 %v17191_v26  ;;  %v5748_v26 = vsel %vm638_vm10, %v5676_v10, 0  ;;  %v18303_v10 = vld [vmem:[#allocation45_spill] sm:$0xff] }
 0x9d8   :  { %13960 = vmatprep.mubr.bf16.mxu1 %v17195_v20  ;;  %v10312_v20 = vshrl.u32 %v5747_v28, 16  ;;  %v10319_v18 = vshll.u32 %v5748_v26, 16 }
 0x9da   :  { %v10321_v35 = vrot.slane %v10319_v18, 1 }
 0x9df   :  { %13961 = vmatmul.mubr.bf16.gmra.mrb[40].mxu1 %v17207_v46  ;;  %v10316_v46 = vrot.slane %v10314_v15, 1 }
 0x9e0   :  { %13964 = vmatprep.mubr.bf16.mxu1 %v18288_v2 }
 0x9e1   :  { %v10317_v38 = vor.u32 %v10316_v46, %v10312_v20  ;;  %v18304_v46 = vld [vmem:[#allocation54_spill] sm:$0xff] }
 0x9e3   :  { %v10322_v4 = vsel %vm1835_vm11, %v10317_v38, %v10321_v35 }
 0x9e7   :  { %13965 = vmatmul.mubr.bf16.gmra.mrb[44].mxu1 %v18289_v32 }
 0x9e8   :  { %13968 = vmatprep.mubr.bf16.mxu1 %v18290_v9  ;;  %v18302_v9 = vld [vmem:[#allocation43_spill] sm:$0xff] }
 0x9ef   :  { %13969 = vmatmul.mubr.bf16.gmra.mrb[48].mxu1 %v18291_v50 }
 0x9f0   :  { %13972 = vmatprep.mubr.bf16.mxu1 %v18292_v31 }
 0x9f7   :  { %13973 = vmatmul.mubr.bf16.gmra.mrb[52].mxu1 %v17256_v6  ;;  %v5712_v6 = vld [vmem:[#allocation2 + $0x358] sm:$0x1] }
 0x9f8   :  { %13976 = vmatprep.mubr.bf16.mxu1 %v17260_v30 }
 0x9ff   :  { %13977 = vmatmul.mubr.bf16.gmra.mrb[56].mxu1 %v17274_v43  ;;  %v17691_v43 = vld [vmem:[%s17809_s5] ss:$0 sm:$0xff]  ;;  %s15533_s5 = smov [#allocation11]  }
 0xa00   :  { %13980 = vmatprep.mubr.bf16.mxu1 %v17549_v7  ;;  %s11215_s26 = sshll.u32 %s15533_s5, 4  ;;  %s11216_s26 = int_to_ptr.vmem [resolvable:$true] %s11215_s26 }
 0xa01   :  { %s15495_s27 = scalar_lea.vmem %s11216_s26, 4096  ;;  %p15500_p5 = scmp.lt.s32.totalorder %s11216_s26, %s11216_s26 }
 0xa02   :  { %p15496_p4 = scmp.ne.s32.totalorder %s11216_s26, %s15495_s27  ;;  %p15501_p6 = scmp.lt.s32.totalorder %s15495_s27, %s15495_s27 }
 0xa04   :  { %p15502_p7 = por %p15501_p6, %p15500_p5 }
 0xa06   :  { %p15503_p8 = pnand %p15502_p7, %p15496_p4 }
 0xa07   :  { %13981 = vmatmul.mubr.bf16.gmra.mrb[60].mxu1 %v10322_v4  ;;  %v18305_v4 = vld [vmem:[#allocation69_spill] sm:$0xff] }
 0xa08   :  { %13984 = vmatprep.mubr.bf16.mxu1 %v17290_v34  ;;  %v18294_v34 = vld [vmem:[#allocation27_spill] sm:$0xff] }
 0xa0f   :  { %13985 = vmatmul.mubr.bf16.gmra.mrb[0].mxu1 %v17302_v12  ;;  %v18293_v12 = vld [vmem:[#allocation59_spill] sm:$0xff] }
 0xa10   :  { %13988 = vmatprep.mubr.bf16.mxu1 %v17306_v36 }
 0xa17   :  { %13989 = vmatmul.mubr.bf16.gmra.mrb[4].mxu1 %v17318_v51  ;;  %v5784_v51 = vsel %vm638_vm10, %v5712_v6, 0 }
 0xa18   :  { %13992 = vmatprep.mubr.bf16.mxu1 %v17322_v13  ;;  %v10331_v7 = vshll.u32 %v5784_v51, 16 }
 0xa1f   :  { %13993 = vmatmul.mubr.bf16.gmra.mrb[8].mxu1 %v17334_v33 }
 0xa20   :  { %13996 = vmatprep.mubr.bf16.mxu1 %v17338_v23 }
 0xa27   :  { %13997 = vmatmul.mubr.bf16.gmra.mrb[12].mxu1 %v17350_v19  ;;  %v10333_v19 = vrot.slane %v10331_v7, 1 }
 0xa28   :  { %14000 = vmatprep.mubr.bf16.mxu1 %v17354_v58 }
 0xa29   :  { %v10334_v33 = vsel %vm1835_vm11, %v10317_v38, %v10333_v19 }
 0xa2f   :  { %14001 = vmatmul.mubr.bf16.gmra.mrb[16].mxu1 %v17366_v0 }
 0xa30   :  { %14004 = vmatprep.mubr.bf16.mxu1 %v17370_v11  ;;  %v18296_v11 = vld [vmem:[#allocation29_spill] sm:$0xff] }
 0xa37   :  { %14005 = vmatmul.mubr.bf16.gmra.mrb[20].mxu1 %v18293_v12 }
 0xa38   :  { %14008 = vmatprep.mubr.bf16.mxu1 %v17382_v24 }
 0xa3f   :  { %14009 = vmatmul.mubr.bf16.gmra.mrb[24].mxu1 %v17386_v45 }
 0xa40   :  { %14012 = vmatprep.mubr.bf16.mxu1 %v17573_v21 }
 0xa47   :  { %14013 = vmatmul.mubr.bf16.gmra.mrb[28].mxu1 %v10334_v33 }
 0xaa2   :  { %v13954_v30 = vpop.f32.mrb[32].mxu1 }
 0xaa3   :  { %v14032_v36 = vadd.f32 %v13954_v30, %v18294_v34  ;;  %v10436_v13 = vpop.f32.mrb[33].mxu1 }
 0xaa4   :  { %v14033_v23 = vadd.f32 %v10436_v13, %v18295_v49  ;;  %v13955_v58 = vpop.f32.mrb[34].mxu1  ;;  %v18306_v13 = vld [vmem:[#allocation70_spill] sm:$0xff] }
 0xaa5   :  { %v10764_v0 = vadd.f32 %v14032_v36, %v17691_v43  ;;  %v14034_v24 = vadd.f32 %v13955_v58, %v18296_v11  ;;  %v10439_v45 = vpop.f32.mrb[35].mxu1 }
 0xaa6   :  { %v10762_v21 = vadd.f32 %v14033_v23, %v17691_v43  ;;  %v14035_v40 = vadd.f32 %v10439_v45, %v18297_v41 }
 0xaa7   :  { %v10765_v39 = vadd.f32 %v14034_v24, %v17691_v43  ;;  %v10828_v57 = vmax.f32 %v10764_v0, 0.0  ;;  %v18307_v0 = vld [vmem:[#allocation71_spill] sm:$0xff] }
 0xaa8   :  { %v10763_v14 = vadd.f32 %v14035_v40, %v17691_v43  ;;  %v10826_v53 = vmax.f32 %v10762_v21, 0.0  ;;  %v18308_v21 = vld [vmem:[#allocation72_spill] sm:$0xff] }
 0xaa9   :  { %v10829_v16 = vmax.f32 %v10765_v39, 0.0 }
 0xaaa   :  { %v10827_v5 = vmax.f32 %v10763_v14, 0.0  ;;  %v13958_v1 = vpop.f32.mrb[36].mxu1  ;;  %v18309_v14 = vld [vmem:[#allocation73_spill] sm:$0xff] }
 0xaab   :  { %v11553_v8 = vpack.c.bf16 %v10829_v16, %v10828_v57  ;;  %v14036_v56 = vadd.f32 %v13958_v1, %v18298_v63  ;;  %v10452_v29 = vpop.f32.mrb[37].mxu1 }
 0xaac   :  { %v11548_v55 = vpack.c.bf16 %v10827_v5, %v10826_v53  ;;  %v14037_v61 = vadd.f32 %v10452_v29, %v18299_v52  ;;  %v13959_v22 = vpop.f32.mrb[38].mxu1 }
 0xaad   :  { %11705 = vst [vmem:[#allocation11 + $0x8] sm:$0xff] %v11553_v8   ;;  %v10768_v59 = vadd.f32 %v14036_v56, %v17691_v43  ;;  %v14038_v27 = vadd.f32 %v13959_v22, %v18300_v42  ;;  %v10455_v17 = vpop.f32.mrb[39].mxu1 }
 0xaae   :  { %11549 = vst [vmem:[#allocation11] sm:$0xff] %v11548_v55   ;;  %v10766_v44 = vadd.f32 %v14037_v61, %v17691_v43  ;;  %v14039_v25 = vadd.f32 %v10455_v17, %v18301_v62  ;;  %v18310_v55 = vld [vmem:[#allocation74_spill] sm:$0xff] }
 0xaaf   :  { %v10769_v37 = vadd.f32 %v14038_v27, %v17691_v43  ;;  %v10832_v47 = vmax.f32 %v10768_v59, 0.0  ;;  %v18311_v59 = vld [vmem:[#allocation75_spill] sm:$0xff] }
 0xab0   :  { %v10767_v60 = vadd.f32 %v14039_v25, %v17691_v43  ;;  %v10830_v48 = vmax.f32 %v10766_v44, 0.0  ;;  %v18312_v44 = vld [vmem:[#allocation76_spill] sm:$0xff] }
 0xab1   :  { %v10833_v3 = vmax.f32 %v10769_v37, 0.0 }
 0xab2   :  { %v10831_v54 = vmax.f32 %v10767_v60, 0.0  ;;  %v13962_v2 = vpop.f32.mrb[40].mxu1  ;;  %v18313_v60 = vld [vmem:[#allocation77_spill] sm:$0xff] }
 0xab3   :  { %v11563_v32 = vpack.c.bf16 %v10833_v3, %v10832_v47  ;;  %v14040_v50 = vadd.f32 %v13962_v2, %v18302_v9  ;;  %v10468_v31 = vpop.f32.mrb[41].mxu1 }
 0xab4   :  { %v11558_v28 = vpack.c.bf16 %v10831_v54, %v10830_v48  ;;  %v14041_v15 = vadd.f32 %v10468_v31, %v18303_v10  ;;  %v13963_v26 = vpop.f32.mrb[42].mxu1 }
 0xab5   :  { %11707 = vst [vmem:[#allocation11 + $0x18] sm:$0xff] %v11563_v32   ;;  %v10772_v20 = vadd.f32 %v14040_v50, %v17691_v43  ;;  %v14042_v18 = vadd.f32 %v13963_v26, %v18304_v46  ;;  %v10471_v38 = vpop.f32.mrb[43].mxu1 }
 0xab6   :  { %11706 = vst [vmem:[#allocation11 + $0x10] sm:$0xff] %v11558_v28   ;;  %v10770_v35 = vadd.f32 %v14041_v15, %v17691_v43  ;;  %v14043_v6 = vadd.f32 %v10471_v38, %v18305_v4  ;;  %v18314_v28 = vld [vmem:[#allocation78_spill] sm:$0xff] }
 0xab7   :  { %v10773_v12 = vadd.f32 %v14042_v18, %v17691_v43  ;;  %v10836_v7 = vmax.f32 %v10772_v20, 0.0  ;;  %v18315_v20 = vld [vmem:[#allocation79_spill] sm:$0xff] }
 0xab8   :  { %v10771_v51 = vadd.f32 %v14043_v6, %v17691_v43  ;;  %v10834_v33 = vmax.f32 %v10770_v35, 0.0  ;;  %v18316_v35 = vld [vmem:[#allocation80_spill] sm:$0xff] }
 0xab9   :  { %v10837_v19 = vmax.f32 %v10773_v12, 0.0 }
 0xaba   :  { %v10835_v30 = vmax.f32 %v10771_v51, 0.0  ;;  %v13966_v34 = vpop.f32.mrb[44].mxu1  ;;  %v18317_v51 = vld [vmem:[#allocation81_spill] sm:$0xff] }
 0xabb   :  { %v11573_v36 = vpack.c.bf16 %v10837_v19, %v10836_v7  ;;  %v14044_v49 = vadd.f32 %v13966_v34, %v18306_v13  ;;  %v10484_v23 = vpop.f32.mrb[45].mxu1 }
 0xabc   :  { %v11568_v58 = vpack.c.bf16 %v10835_v30, %v10834_v33  ;;  %v14045_v11 = vadd.f32 %v10484_v23, %v18307_v0  ;;  %v13967_v24 = vpop.f32.mrb[46].mxu1 }
 0xabd   :  { %11709 = vst [vmem:[#allocation11 + $0x28] sm:$0xff] %v11573_v36   ;;  %v10776_v45 = vadd.f32 %v14044_v49, %v17691_v43  ;;  %v14046_v41 = vadd.f32 %v13967_v24, %v18308_v21  ;;  %v10487_v40 = vpop.f32.mrb[47].mxu1 }
 0xabe   :  { %11708 = vst [vmem:[#allocation11 + $0x20] sm:$0xff] %v11568_v58   ;;  %v10774_v39 = vadd.f32 %v14045_v11, %v17691_v43  ;;  %v14047_v57 = vadd.f32 %v10487_v40, %v18309_v14  ;;  %v18318_v58 = vld [vmem:[#allocation82_spill] sm:$0xff] }
 0xabf   :  { %v10777_v16 = vadd.f32 %v14046_v41, %v17691_v43  ;;  %v10840_v5 = vmax.f32 %v10776_v45, 0.0  ;;  %v18319_v45 = vld [vmem:[#allocation83_spill] sm:$0xff] }
 0xac0   :  { %v10775_v53 = vadd.f32 %v14047_v57, %v17691_v43  ;;  %v10838_v8 = vmax.f32 %v10774_v39, 0.0  ;;  %v18320_v39 = vld [vmem:[#allocation84_spill] sm:$0xff] }
 0xac1   :  { %v10841_v1 = vmax.f32 %v10777_v16, 0.0 }
 0xac2   :  { %v10839_v63 = vmax.f32 %v10775_v53, 0.0  ;;  %v13970_v56 = vpop.f32.mrb[48].mxu1  ;;  %v18321_v53 = vld [vmem:[#allocation85_spill] sm:$0xff] }
 0xac3   :  { %v11583_v29 = vpack.c.bf16 %v10841_v1, %v10840_v5  ;;  %v14048_v52 = vadd.f32 %v13970_v56, %v18310_v55  ;;  %v10500_v61 = vpop.f32.mrb[49].mxu1 }
 0xac4   :  { %v11578_v22 = vpack.c.bf16 %v10839_v63, %v10838_v8  ;;  %v14049_v42 = vadd.f32 %v10500_v61, %v18311_v59  ;;  %v13971_v27 = vpop.f32.mrb[50].mxu1 }
 0xac5   :  { %11711 = vst [vmem:[#allocation11 + $0x38] sm:$0xff] %v11583_v29   ;;  %v10780_v17 = vadd.f32 %v14048_v52, %v17691_v43  ;;  %v14050_v62 = vadd.f32 %v13971_v27, %v18312_v44  ;;  %v10503_v25 = vpop.f32.mrb[51].mxu1 }
 0xac6   :  { %11710 = vst [vmem:[#allocation11 + $0x30] sm:$0xff] %v11578_v22   ;;  %v10778_v37 = vadd.f32 %v14049_v42, %v17691_v43  ;;  %v14051_v47 = vadd.f32 %v10503_v25, %v18313_v60  ;;  %v18322_v22 = vld [vmem:[#allocation86_spill] sm:$0xff] }
 0xac7   :  { %v10781_v3 = vadd.f32 %v14050_v62, %v17691_v43  ;;  %v10844_v54 = vmax.f32 %v10780_v17, 0.0  ;;  %v18323_v17 = vld [vmem:[#allocation87_spill] sm:$0xff] }
 0xac8   :  { %v10779_v48 = vadd.f32 %v14051_v47, %v17691_v43  ;;  %v10842_v32 = vmax.f32 %v10778_v37, 0.0  ;;  %v18324_v37 = vld [vmem:[#allocation88_spill] sm:$0xff] }
 0xac9   :  { %v10845_v2 = vmax.f32 %v10781_v3, 0.0 }
 0xaca   :  { %v10843_v9 = vmax.f32 %v10779_v48, 0.0  ;;  %v13974_v50 = vpop.f32.mrb[52].mxu1  ;;  %v18325_v48 = vld [vmem:[#allocation89_spill] sm:$0xff] }
 0xacb   :  { %v11593_v31 = vpack.c.bf16 %v10845_v2, %v10844_v54  ;;  %v14052_v10 = vadd.f32 %v13974_v50, %v18314_v28  ;;  %v10516_v15 = vpop.f32.mrb[53].mxu1 }
 0xacc   :  { %v11588_v26 = vpack.c.bf16 %v10843_v9, %v10842_v32  ;;  %v14053_v46 = vadd.f32 %v10516_v15, %v18315_v20  ;;  %v13975_v18 = vpop.f32.mrb[54].mxu1 }
 0xacd   :  { %11713 = vst [vmem:[#allocation11 + $0x48] sm:$0xff] %v11593_v31   ;;  %v10784_v38 = vadd.f32 %v14052_v10, %v17691_v43  ;;  %v14054_v4 = vadd.f32 %v13975_v18, %v18316_v35  ;;  %v10519_v6 = vpop.f32.mrb[55].mxu1 }
 0xace   :  { %11712 = vst [vmem:[#allocation11 + $0x40] sm:$0xff] %v11588_v26   ;;  %v10782_v12 = vadd.f32 %v14053_v46, %v17691_v43  ;;  %v14055_v7 = vadd.f32 %v10519_v6, %v18317_v51 }
 0xacf   :  { %v10785_v19 = vadd.f32 %v14054_v4, %v17691_v43  ;;  %v10848_v30 = vmax.f32 %v10784_v38, 0.0 }
 0xad0   :  { %v10783_v33 = vadd.f32 %v14055_v7, %v17691_v43  ;;  %v10846_v36 = vmax.f32 %v10782_v12, 0.0 }
 0xad1   :  { %v10849_v34 = vmax.f32 %v10785_v19, 0.0 }
 0xad2   :  { %v10847_v13 = vmax.f32 %v10783_v33, 0.0  ;;  %v13978_v49 = vpop.f32.mrb[56].mxu1 }
 0xad3   :  { %v11603_v23 = vpack.c.bf16 %v10849_v34, %v10848_v30  ;;  %v14056_v0 = vadd.f32 %v13978_v49, %v18318_v58  ;;  %v10532_v11 = vpop.f32.mrb[57].mxu1 }
 0xad4   :  { %v11598_v24 = vpack.c.bf16 %v10847_v13, %v10846_v36  ;;  %v14057_v21 = vadd.f32 %v10532_v11, %v18319_v45  ;;  %v13979_v41 = vpop.f32.mrb[58].mxu1 }
 0xad5   :  { %11715 = vst [vmem:[#allocation11 + $0x58] sm:$0xff] %v11603_v23   ;;  %v10788_v40 = vadd.f32 %v14056_v0, %v17691_v43  ;;  %v14058_v14 = vadd.f32 %v13979_v41, %v18320_v39  ;;  %v10535_v57 = vpop.f32.mrb[59].mxu1 }
 0xad6   :  { %11714 = vst [vmem:[#allocation11 + $0x50] sm:$0xff] %v11598_v24   ;;  %v10786_v16 = vadd.f32 %v14057_v21, %v17691_v43  ;;  %v14059_v5 = vadd.f32 %v10535_v57, %v18321_v53 }
 0xad7   :  { %v10789_v1 = vadd.f32 %v14058_v14, %v17691_v43  ;;  %v10852_v63 = vmax.f32 %v10788_v40, 0.0 }
 0xad8   :  { %v10787_v8 = vadd.f32 %v14059_v5, %v17691_v43  ;;  %v10850_v29 = vmax.f32 %v10786_v16, 0.0 }
 0xad9   :  { %v10853_v56 = vmax.f32 %v10789_v1, 0.0 }
 0xada   :  { %v10851_v55 = vmax.f32 %v10787_v8, 0.0  ;;  %v13982_v52 = vpop.f32.mrb[60].mxu1 }
 0xadb   :  { %v11613_v61 = vpack.c.bf16 %v10853_v56, %v10852_v63  ;;  %v14060_v59 = vadd.f32 %v13982_v52, %v18322_v22  ;;  %v10548_v42 = vpop.f32.mrb[61].mxu1 }
 0xadc   :  { %v11608_v27 = vpack.c.bf16 %v10851_v55, %v10850_v29  ;;  %v14061_v44 = vadd.f32 %v10548_v42, %v18323_v17  ;;  %v13983_v62 = vpop.f32.mrb[62].mxu1 }
 0xadd   :  { %11717 = vst [vmem:[#allocation11 + $0x68] sm:$0xff] %v11613_v61   ;;  %v10792_v25 = vadd.f32 %v14060_v59, %v17691_v43  ;;  %v14062_v60 = vadd.f32 %v13983_v62, %v18324_v37  ;;  %v10551_v47 = vpop.f32.mrb[63].mxu1 }
 0xade   :  { %11716 = vst [vmem:[#allocation11 + $0x60] sm:$0xff] %v11608_v27   ;;  %v10790_v3 = vadd.f32 %v14061_v44, %v17691_v43  ;;  %v14063_v54 = vadd.f32 %v10551_v47, %v18325_v48 }
 0xadf   :  { %v10793_v2 = vadd.f32 %v14062_v60, %v17691_v43  ;;  %v10856_v9 = vmax.f32 %v10792_v25, 0.0 }
 0xae0   :  { %v10791_v32 = vadd.f32 %v14063_v54, %v17691_v43  ;;  %v10854_v31 = vmax.f32 %v10790_v3, 0.0 }
 0xae1   :  { %v10857_v50 = vmax.f32 %v10793_v2, 0.0 }
 0xae2   :  { %v10855_v28 = vmax.f32 %v10791_v32, 0.0  ;;  %v13986_v10 = vpop.f32.mrb[0].mxu1 }
 0xae3   :  { %v11623_v15 = vpack.c.bf16 %v10857_v50, %v10856_v9  ;;  %v10796_v26 = vadd.f32 %v13986_v10, %v17691_v43  ;;  %v10564_v20 = vpop.f32.mrb[1].mxu1 }
 0xae4   :  { %v11618_v46 = vpack.c.bf16 %v10855_v28, %v10854_v31  ;;  %v10794_v18 = vadd.f32 %v17691_v43, %v10564_v20  ;;  %v13987_v38 = vpop.f32.mrb[2].mxu1 }
 0xae5   :  { %11719 = vst [vmem:[#allocation11 + $0x78] sm:$0xff] %v11623_v15   ;;  %v10797_v35 = vadd.f32 %v13987_v38, %v17691_v43  ;;  %v10567_v4 = vpop.f32.mrb[3].mxu1  ;;  %v10860_v12 = vmax.f32 %v10796_v26, 0.0 }
 0xae6   :  { %11718 = vst [vmem:[#allocation11 + $0x70] sm:$0xff] %v11618_v46   ;;  %v10795_v6 = vadd.f32 %v17691_v43, %v10567_v4  ;;  %v10858_v7 = vmax.f32 %v10794_v18, 0.0 }
 0xae7   :  { %v10861_v51 = vmax.f32 %v10797_v35, 0.0 }
 0xae8   :  { %v10859_v19 = vmax.f32 %v10795_v6, 0.0 }
 0xae9   :  { %v11633_v33 = vpack.c.bf16 %v10861_v51, %v10860_v12 }
 0xaea   :  { %v11628_v30 = vpack.c.bf16 %v10859_v19, %v10858_v7  ;;  %v13990_v34 = vpop.f32.mrb[4].mxu1 }
 0xaeb   :  { %11721 = vst [vmem:[#allocation11 + $0x88] sm:$0xff] %v11633_v33   ;;  %v10800_v36 = vadd.f32 %v13990_v34, %v17691_v43  ;;  %v10580_v13 = vpop.f32.mrb[5].mxu1 }
 0xaec   :  { %11720 = vst [vmem:[#allocation11 + $0x80] sm:$0xff] %v11628_v30   ;;  %v10798_v49 = vadd.f32 %v17691_v43, %v10580_v13  ;;  %v13991_v23 = vpop.f32.mrb[6].mxu1 }
 0xaed   :  { %v10801_v58 = vadd.f32 %v13991_v23, %v17691_v43  ;;  %v10583_v0 = vpop.f32.mrb[7].mxu1  ;;  %v10864_v24 = vmax.f32 %v10800_v36, 0.0 }
 0xaee   :  { %v10799_v11 = vadd.f32 %v17691_v43, %v10583_v0  ;;  %v10862_v21 = vmax.f32 %v10798_v49, 0.0 }
 0xaef   :  { %v10865_v45 = vmax.f32 %v10801_v58, 0.0 }
 0xaf0   :  { %v10863_v41 = vmax.f32 %v10799_v11, 0.0 }
 0xaf1   :  { %v11643_v40 = vpack.c.bf16 %v10865_v45, %v10864_v24 }
 0xaf2   :  { %v11638_v39 = vpack.c.bf16 %v10863_v41, %v10862_v21  ;;  %v13994_v14 = vpop.f32.mrb[8].mxu1 }
 0xaf3   :  { %11723 = vst [vmem:[#allocation11 + $0x98] sm:$0xff] %v11643_v40   ;;  %v10804_v57 = vadd.f32 %v13994_v14, %v17691_v43  ;;  %v10596_v16 = vpop.f32.mrb[9].mxu1 }
 0xaf4   :  { %11722 = vst [vmem:[#allocation11 + $0x90] sm:$0xff] %v11638_v39   ;;  %v10802_v53 = vadd.f32 %v17691_v43, %v10596_v16  ;;  %v13995_v5 = vpop.f32.mrb[10].mxu1 }
 0xaf5   :  { %v10805_v1 = vadd.f32 %v13995_v5, %v17691_v43  ;;  %v10599_v8 = vpop.f32.mrb[11].mxu1  ;;  %v10868_v56 = vmax.f32 %v10804_v57, 0.0 }
 0xaf6   :  { %v10803_v63 = vadd.f32 %v17691_v43, %v10599_v8  ;;  %v10866_v55 = vmax.f32 %v10802_v53, 0.0 }
 0xaf7   :  { %v10869_v29 = vmax.f32 %v10805_v1, 0.0 }
 0xaf8   :  { %v10867_v52 = vmax.f32 %v10803_v63, 0.0 }
 0xaf9   :  { %v11653_v61 = vpack.c.bf16 %v10869_v29, %v10868_v56 }
 0xafa   :  { %v11648_v22 = vpack.c.bf16 %v10867_v52, %v10866_v55  ;;  %v13998_v59 = vpop.f32.mrb[12].mxu1 }
 0xafb   :  { %11725 = vst [vmem:[#allocation11 + $0xa8] sm:$0xff] %v11653_v61   ;;  %v10808_v42 = vadd.f32 %v13998_v59, %v17691_v43  ;;  %v10612_v27 = vpop.f32.mrb[13].mxu1 }
 0xafc   :  { %11724 = vst [vmem:[#allocation11 + $0xa0] sm:$0xff] %v11648_v22   ;;  %v10806_v17 = vadd.f32 %v17691_v43, %v10612_v27  ;;  %v13999_v44 = vpop.f32.mrb[14].mxu1 }
 0xafd   :  { %v10809_v62 = vadd.f32 %v13999_v44, %v17691_v43  ;;  %v10615_v25 = vpop.f32.mrb[15].mxu1  ;;  %v10872_v60 = vmax.f32 %v10808_v42, 0.0 }
 0xafe   :  { %v10807_v37 = vadd.f32 %v17691_v43, %v10615_v25  ;;  %v10870_v3 = vmax.f32 %v10806_v17, 0.0 }
 0xaff   :  { %v10873_v47 = vmax.f32 %v10809_v62, 0.0 }
 0xb00   :  { %v10871_v48 = vmax.f32 %v10807_v37, 0.0 }
 0xb01   :  { %v11663_v54 = vpack.c.bf16 %v10873_v47, %v10872_v60 }
 0xb02   :  { %v11658_v2 = vpack.c.bf16 %v10871_v48, %v10870_v3  ;;  %v14002_v32 = vpop.f32.mrb[16].mxu1 }
 0xb03   :  { %11727 = vst [vmem:[#allocation11 + $0xb8] sm:$0xff] %v11663_v54   ;;  %v10812_v9 = vadd.f32 %v14002_v32, %v17691_v43  ;;  %v10628_v50 = vpop.f32.mrb[17].mxu1 }
 0xb04   :  { %11726 = vst [vmem:[#allocation11 + $0xb0] sm:$0xff] %v11658_v2   ;;  %v10810_v31 = vadd.f32 %v17691_v43, %v10628_v50  ;;  %v14003_v28 = vpop.f32.mrb[18].mxu1 }
 0xb05   :  { %v10813_v10 = vadd.f32 %v14003_v28, %v17691_v43  ;;  %v10631_v15 = vpop.f32.mrb[19].mxu1  ;;  %v10876_v20 = vmax.f32 %v10812_v9, 0.0 }
 0xb06   :  { %v10811_v26 = vadd.f32 %v17691_v43, %v10631_v15  ;;  %v10874_v18 = vmax.f32 %v10810_v31, 0.0 }
 0xb07   :  { %v10877_v46 = vmax.f32 %v10813_v10, 0.0 }
 0xb08   :  { %v10875_v38 = vmax.f32 %v10811_v26, 0.0 }
 0xb09   :  { %v11673_v35 = vpack.c.bf16 %v10877_v46, %v10876_v20 }
 0xb0a   :  { %v11668_v4 = vpack.c.bf16 %v10875_v38, %v10874_v18  ;;  %v14006_v6 = vpop.f32.mrb[20].mxu1 }
 0xb0b   :  { %11729 = vst [vmem:[#allocation11 + $0xc8] sm:$0xff] %v11673_v35   ;;  %v10816_v12 = vadd.f32 %v14006_v6, %v17691_v43  ;;  %v10644_v51 = vpop.f32.mrb[21].mxu1 }
 0xb0c   :  { %11728 = vst [vmem:[#allocation11 + $0xc0] sm:$0xff] %v11668_v4   ;;  %v10814_v7 = vadd.f32 %v17691_v43, %v10644_v51  ;;  %v14007_v19 = vpop.f32.mrb[22].mxu1 }
 0xb0d   :  { %v10817_v33 = vadd.f32 %v14007_v19, %v17691_v43  ;;  %v10647_v30 = vpop.f32.mrb[23].mxu1  ;;  %v10880_v36 = vmax.f32 %v10816_v12, 0.0 }
 0xb0e   :  { %v10815_v34 = vadd.f32 %v17691_v43, %v10647_v30  ;;  %v10878_v49 = vmax.f32 %v10814_v7, 0.0 }
 0xb0f   :  { %v10881_v13 = vmax.f32 %v10817_v33, 0.0 }
 0xb10   :  { %v10879_v23 = vmax.f32 %v10815_v34, 0.0 }
 0xb11   :  { %v11683_v58 = vpack.c.bf16 %v10881_v13, %v10880_v36 }
 0xb12   :  { %v11678_v0 = vpack.c.bf16 %v10879_v23, %v10878_v49  ;;  %v14010_v11 = vpop.f32.mrb[24].mxu1 }
 0xb13   :  { %11731 = vst [vmem:[#allocation11 + $0xd8] sm:$0xff] %v11683_v58   ;;  %v10820_v24 = vadd.f32 %v14010_v11, %v17691_v43  ;;  %v10660_v45 = vpop.f32.mrb[25].mxu1 }
 0xb14   :  { %11730 = vst [vmem:[#allocation11 + $0xd0] sm:$0xff] %v11678_v0   ;;  %v10818_v21 = vadd.f32 %v17691_v43, %v10660_v45  ;;  %v14011_v41 = vpop.f32.mrb[26].mxu1 }
 0xb15   :  { %v10821_v40 = vadd.f32 %v14011_v41, %v17691_v43  ;;  %v10663_v39 = vpop.f32.mrb[27].mxu1  ;;  %v10884_v57 = vmax.f32 %v10820_v24, 0.0 }
 0xb16   :  { %v10819_v14 = vadd.f32 %v17691_v43, %v10663_v39  ;;  %v10882_v53 = vmax.f32 %v10818_v21, 0.0 }
 0xb17   :  { %v10885_v16 = vmax.f32 %v10821_v40, 0.0 }
 0xb18   :  { %v10883_v5 = vmax.f32 %v10819_v14, 0.0 }
 0xb19   :  { %v11693_v1 = vpack.c.bf16 %v10885_v16, %v10884_v57 }
 0xb1a   :  { %v11688_v8 = vpack.c.bf16 %v10883_v5, %v10882_v53  ;;  %v14014_v63 = vpop.f32.mrb[28].mxu1 }
 0xb1b   :  { %11733 = vst [vmem:[#allocation11 + $0xe8] sm:$0xff] %v11693_v1   ;;  %v10824_v56 = vadd.f32 %v14014_v63, %v17691_v43  ;;  %v10676_v29 = vpop.f32.mrb[29].mxu1 }
 0xb1c   :  { %11732 = vst [vmem:[#allocation11 + $0xe0] sm:$0xff] %v11688_v8   ;;  %v10822_v55 = vadd.f32 %v17691_v43, %v10676_v29  ;;  %v14015_v52 = vpop.f32.mrb[30].mxu1 }
 0xb1d   :  { %v10825_v61 = vadd.f32 %v14015_v52, %v17691_v43  ;;  %v10679_v22 = vpop.f32.mrb[31].mxu1  ;;  %v10888_v42 = vmax.f32 %v10824_v56, 0.0 }
 0xb1e   :  { %v10823_v59 = vadd.f32 %v17691_v43, %v10679_v22  ;;  %v10886_v17 = vmax.f32 %v10822_v55, 0.0 }
 0xb1f   :  { %v10889_v27 = vmax.f32 %v10825_v61, 0.0 }
 0xb20   :  { %v10887_v44 = vmax.f32 %v10823_v59, 0.0 }
 0xb21   :  { %v11703_v62 = vpack.c.bf16 %v10889_v27, %v10888_v42 }
 0xb22   :  { %v11698_v25 = vpack.c.bf16 %v10887_v44, %v10886_v17 }
 0xb23   :  { %11735 = vst [vmem:[#allocation11 + $0xf8] sm:$0xff] %v11703_v62  }
 0xb24   :  { %11734 = vst [vmem:[#allocation11 + $0xf0] sm:$0xff] %v11698_v25  }
 0xb25   :  { %15506 = shalt.err (!%p15503_p8)
}
 0xb26   :  { %s15507_s30 = scalar_lea.hbm %s17810_s6, 4096 }
 0xb27   :  { %p15508_p9 = scmp.ne.s32.totalorder %s17810_s6, %s15507_s30  ;;  %p15511_p10 = scmp.lt.u32.totalorder %s15507_s30, %s17810_s6 }
 0xb29   :  { %p15513_p11 = pnand %p15511_p10, %p15508_p9 }
 0xb2b   :  { %15516 = shalt.err (!%p15513_p11)
}
 0xb2c   :  { %11221 = dma.vmem_to_hbm [thread:$0]  %s11216_s26, 4096, %s17810_s6, [#allocation5], %s15527_s9, %s15527_s9, %s15528_s10  }
 0xb2d   :  { %15523 = dma.done.wait [#allocation5], 4096  }
 0xb2e   :  { %15524 = vsyncadd [#allocation5], 4294963200 }
 0xb2f   :  { %11225 = vsyncpa [#allocation4], 1 }
 0xb30   :  { %11226 = vsyncpa [#allocation7], 1 }
 0xb31   :  { %11227 = vsyncpa [#allocation10], 1 }
 0xb32   :  { %11228 = vsyncpa [#allocation5], 1 }

</bundles_post_ra>
